<compile_context>
chip_gen: v5e
topology: v5e:2x2
jax: 0.10.0
libtpu: 0.0.40
codegen_flags: <defaults>
</compile_context>

<pallas_src>
import jax
import jax.numpy as jnp
from jax import lax
from jax.experimental import pallas as pl
from jax.experimental.pallas import tpu as pltpu

# ----------------------------- configuration -------------------------------
B = 2
C_IN = 3
H = 32
W = 32
N_SCALES = 2
EMBED_DIMS = [32, 32]                 # cfg.MODEL.MR.EMBED_DIM
PATCH_SIZES = [8, 4]                  # cfg.MODEL.MR.PATCH_SIZES
MIN_PATCH = 4                         # backbones[0].min_patch_size
ALL_OUT_FEATURES = ['res3', 'res2']   # cfg.MODEL.MR.OUT_FEATURES
ALL_OUT_FEATURES_SCALES = {f: len(ALL_OUT_FEATURES) - i - 1
                           for i, f in enumerate(ALL_OUT_FEATURES)}
FEATURE_STRIDES = {'res3': 8, 'res2': 4}
BACKBONE_OUT_FEATURES = [['res3'], ['res3', 'res2']]
BORDER_SIZE = 5
ORACLE_TEACHER_RATIO = 0.75           # unused in eval mode

DEBUG_CHECKS = False                  # host-sync pos check; only valid un-jitted


# --------------------------- in-kernel helpers ------------------------------
def _edge_mask(lab, pad_h, pad_w, border=BORDER_SIZE):
    """Ignore mask + 4-neighbor edge mask (bool (H, W)); traced inside the kernel."""
    Hh, Ww = lab.shape
    row = lax.broadcasted_iota(jnp.int32, (Hh, Ww), 0)
    col = lax.broadcasted_iota(jnp.int32, (Hh, Ww), 1)
    usable_h = Hh - pad_h
    usable_w = Ww - pad_w
    ign = (lab == 0)
    bord = ((row < border) & (col < usable_w)) \
         | ((row >= usable_h - border) & (row < usable_h) & (col < usable_w)) \
         | ((row < usable_h) & (col < border)) \
         | ((row < usable_h) & (col >= usable_w - border) & (col < usable_w))
    ign = ign | ((lab == 1) & bord)
    ign_i = ign.astype(jnp.int32)

    def pair(axis, shift):
        lab_s = jnp.roll(lab, shift, axis=axis)
        ign_s = jnp.roll(ign_i, shift, axis=axis)
        idx = row if axis == 0 else col
        lim = Hh if axis == 0 else Ww
        valid_rng = (idx >= 1) if shift == 1 else (idx < (lim - 1))
        return valid_rng & (ign_i == 0) & (ign_s == 0) & (lab != lab_s)

    return pair(0, 1) | pair(0, -1) | pair(1, 1) | pair(1, -1)


def _gather_counts_row(counts_f32, celly_row, cellx_row):
    """Gather counts[(celly, cellx)] per token as a lane-dense (1, N) row via
    0/1 selection matmuls (exact: counts are small integers)."""
    Hp, Wp = counts_f32.shape
    n = celly_row.shape[-1]
    colsel = (lax.broadcasted_iota(jnp.int32, (Wp, n), 0) ==
              cellx_row).astype(jnp.bfloat16)                      # (Wp, N)
    bsel = jnp.dot(counts_f32.astype(jnp.bfloat16), colsel,
                   preferred_element_type=jnp.float32)             # (Hp, N)
    rowsel = (lax.broadcasted_iota(jnp.int32, (Hp, n), 0) ==
              celly_row).astype(jnp.float32)                       # (Hp, N)
    return jnp.sum(rowsel * bsel, axis=0, keepdims=True)           # (1, N)


def _normalize_row(x_row):
    """(x - mean) / sqrt(var_unbiased + 1e-6) over the lane axis (torch.var)."""
    n = x_row.shape[-1]
    mean = jnp.mean(x_row)
    var = jnp.sum((x_row - mean) ** 2) / (n - 1)
    return (x_row - mean) * lax.rsqrt(var + 1e-6)


# ------------------------------ fused Pallas kernel -------------------------
def _mrotb_kernel(pad_ref, p0_ref, p3_ref, p2_ref, lab_ref,
                  aggh_ref, aggwT_ref, poolh_ref, poolwT_ref,
                  celly0_ref, cellx0_ref, celly1_ref, cellx1_ref,
                  we0_ref, be0_ref, w1_ref, b1_ref, w2_ref, b2_ref, w3r_ref, b3_ref,
                  we3_ref, be3_ref, we2_ref, be2_ref, g2_ref, bb2_ref,
                  feat0_ref, feat3_ref, res2_ref, rows_ref):
    # ---- learned matmuls, batch flattened into rows (f32 operands, f32 acc) ----
    feat0 = jnp.dot(p0_ref[...], we0_ref[...],
                    preferred_element_type=jnp.float32) + be0_ref[...]
    feat0_ref[...] = feat0
    feat3_ref[...] = jnp.dot(p3_ref[...], we3_ref[...],
                             preferred_element_type=jnp.float32) + be3_ref[...]
    feat2 = jnp.dot(p2_ref[...], we2_ref[...],
                    preferred_element_type=jnp.float32) + be2_ref[...]
    # res2 LayerNorm folded in (saves a separate pallas_call + HBM round trip)
    mu = jnp.mean(feat2, axis=-1, keepdims=True)
    var = jnp.mean((feat2 - mu) ** 2, axis=-1, keepdims=True)
    res2_ref[...] = (feat2 - mu) * lax.rsqrt(var + 1e-5) * g2_ref[...] + bb2_ref[...]

    # ---- MLP3 upsampling-mask head on feat0 ----
    h = jnp.maximum(jnp.dot(feat0, w1_ref[...],
                            preferred_element_type=jnp.float32) + b1_ref[...], 0.0)
    h = jnp.maximum(jnp.dot(h, w2_ref[...],
                            preferred_element_type=jnp.float32) + b2_ref[...], 0.0)
    # lane-dense (1, B*N0) prediction row straight off the MXU
    pred_row = lax.dot_general(w3r_ref[...], h, (((1,), (1,)), ((), ())),
                               preferred_element_type=jnp.float32) + b3_ref[...]

    # ---- oracles: edge mask computed ONCE per batch; both scales reuse it ----
    celly0 = celly0_ref[...]
    cellx0 = cellx0_ref[...]
    celly1 = celly1_ref[...]
    cellx1 = cellx1_ref[...]
    pieces = [pred_row]
    o1_pieces = []
    for b in range(lab_ref.shape[0]):            # static unroll, B is small
        pad_h = pad_ref[2 * b]
        pad_w = pad_ref[2 * b + 1]
        edge = _edge_mask(lab_ref[b], pad_h, pad_w).astype(jnp.bfloat16)
        # P=4 per-patch edge counts via 0/1 aggregation matmuls (exact)
        counts4 = jnp.dot(
            jnp.dot(aggh_ref[...], edge,
                    preferred_element_type=jnp.float32).astype(jnp.bfloat16),
            aggwT_ref[...], preferred_element_type=jnp.float32)    # (H/4, W/4)
        # P=8 counts = exact 2x2 sum-pool of the P=4 counts (tiny 0/1 matmuls)
        counts8 = jnp.dot(
            jnp.dot(poolh_ref[...], counts4.astype(jnp.bfloat16),
                    preferred_element_type=jnp.float32).astype(jnp.bfloat16),
            poolwT_ref[...], preferred_element_type=jnp.float32)   # (H/8, W/8)
        pieces.append(_normalize_row(_gather_counts_row(counts8, celly0, cellx0)))
        o1_pieces.append(_normalize_row(
            _gather_counts_row(counts4, celly1[b:b + 1], cellx1[b:b + 1])))
    # one packed lane-dense output row: [pred | oracle0(b0,b1) | oracle1(b0,b1)]
    rows_ref[...] = jnp.concatenate(pieces + o1_pieces, axis=1)


# ------------------------------ Pallas wrapper ------------------------------
def mrotb_fused(patches0, patches3, patches2, lab, target_pad_flat,
                aggh, aggwT, poolh, poolwT, celly0, cellx0, celly1, cellx1,
                embed0, mlp, embed3, embed2, norm2):
    Bq, Hq, Wq = lab.shape
    M0, K0 = patches0.shape
    M3, K3 = patches3.shape
    M2, K2 = patches2.shape
    we0, be0 = embed0
    (w1, b1), (w2, b2), (w3, b3) = mlp
    we3, be3 = embed3
    we2, be2 = embed2
    g2, bb2 = norm2
    Cc = we0.shape[1]
    N0 = M0 // Bq
    Hp4, Wp4 = aggh.shape[0], aggwT.shape[1]
    Hp8, Wp8 = poolh.shape[0], poolwT.shape[1]
    n_rows = M0 + 2 * Bq * N0

    def full(shape):
        return pl.BlockSpec(shape, lambda i, _s=shape: tuple(0 for _ in _s))

    feat0, feat3, res2, rows = pl.pallas_call(
        _mrotb_kernel,
        out_shape=(jax.ShapeDtypeStruct((M0, Cc), jnp.float32),
                   jax.ShapeDtypeStruct((M3, Cc), jnp.float32),
                   jax.ShapeDtypeStruct((M2, Cc), jnp.float32),
                   jax.ShapeDtypeStruct((1, n_rows), jnp.float32)),
        grid=(1,),
        in_specs=[
            pl.BlockSpec(memory_space=pltpu.MemorySpace.SMEM),   # target_pad (2B,)
            full((M0, K0)),                                      # res3 patches, scale 0
            full((M3, K3)),                                      # res3 patches, scale 1
            full((M2, K2)),                                      # res2 patches
            full((Bq, Hq, Wq)),                                  # label maps
            full((Hp4, Hq)), full((Wq, Wp4)),                    # P=4 agg (bf16 0/1)
            full((Hp8, Hp4)), full((Wp4, Wp8)),                  # 2x2 pool (bf16 0/1)
            full((1, N0)), full((1, N0)),                        # celly0 / cellx0
            full((Bq, N0)), full((Bq, N0)),                      # celly1 / cellx1
            full((K0, Cc)), full((1, Cc)),                       # embed0 W, b
            full((Cc, Cc)), full((1, Cc)),                       # mlp w1, b1
            full((Cc, Cc)), full((1, Cc)),                       # mlp w2, b2
            full((1, Cc)), full((1, 1)),                         # mlp w3 (row), b3
            full((K3, Cc)), full((1, Cc)),                       # embed3 W, b
            full((K2, Cc)), full((1, Cc)),                       # embed2 W, b
            full((1, Cc)), full((1, Cc)),                        # res2 LN gamma, beta
        ],
        out_specs=(full((M0, Cc)), full((M3, Cc)), full((M2, Cc)),
                   full((1, n_rows))),
        compiler_params=pltpu.CompilerParams(dimension_semantics=("arbitrary",)),
    )(target_pad_flat, patches0, patches3, patches2, lab,
      aggh, aggwT, poolh, poolwT, celly0, cellx0, celly1, cellx1,
      we0, be0.reshape(1, Cc),
      w1, b1.reshape(1, Cc), w2, b2.reshape(1, Cc),
      w3.reshape(1, Cc), b3.reshape(1, 1),
      we3, be3.reshape(1, Cc), we2, be2.reshape(1, Cc),
      g2.reshape(1, Cc), bb2.reshape(1, Cc))
    return feat0, feat3, res2, rows


# ----------------------------- glue / parameters ---------------------------
def trunc_normal(key, shape, std=0.02):
    return (std * jax.random.truncated_normal(key, -2.0, 2.0, shape)).astype(jnp.float32)


def init_params(key):
    keys = iter(jax.random.split(key, 64))
    params = {'embed': {}, 'upsamplers': [], 'out_norms': []}
    for s in range(N_SCALES):
        for f in BACKBONE_OUT_FEATURES[s]:
            stride = FEATURE_STRIDES[f]
            k_in = stride * stride * C_IN
            params['embed'][(s, f)] = (trunc_normal(next(keys), (k_in, EMBED_DIMS[s])),
                                       jnp.zeros((EMBED_DIMS[s],), jnp.float32))
    for s in range(N_SCALES - 1):
        c = EMBED_DIMS[s]
        layers = []
        for di, do in zip([c, c, c], [c, c, 1]):        # MLP(c, c, 1, num_layers=3)
            layers.append((trunc_normal(next(keys), (di, do)),
                           jnp.zeros((do,), jnp.float32)))
        params['upsamplers'].append(layers)
    for i in range(N_SCALES):
        dim = sum(EMBED_DIMS[i:])
        params['out_norms'].append((jnp.ones((dim,), jnp.float32),
                                    jnp.zeros((dim,), jnp.float32)))
    return params


def patchify(im, s):
    Bq, Cq, Hq, Wq = im.shape
    x = im.reshape(Bq, Cq, Hq // s, s, Wq // s, s)
    x = jnp.transpose(x, (0, 2, 4, 1, 3, 5))
    return x.reshape(Bq, (Hq // s) * (Wq // s), Cq * s * s)


def make_pos(Hs, Ws, stride, Bq):
    yy, xx = jnp.meshgrid(jnp.arange(Hs), jnp.arange(Ws), indexing='ij')
    pos = jnp.stack([xx.reshape(-1), yy.reshape(-1)], axis=-1).astype(jnp.float32)
    pos = pos * (stride / MIN_PATCH)                 # (x, y) in min-patch units
    return jnp.broadcast_to(pos[None], (Bq, Hs * Ws, 2))


def find_pos_org_order(pos_org, pos_shuffled):
    # torch.cdist(p=1) + argmin(dim=2); N<=64 so plain jnp (fused by XLA).
    d = jnp.sum(jnp.abs(pos_org[:, :, None, :] - pos_shuffled[:, None, :, :]), axis=-1)
    return jnp.argmin(d, axis=-1).astype(jnp.int32)


def layer_norm(x, g, b, eps=1e-5):
    mu = jnp.mean(x, axis=-1, keepdims=True)
    var = jnp.mean((x - mu) ** 2, axis=-1, keepdims=True)
    return (x - mu) * lax.rsqrt(var + eps) * g + b


def forward(im, sem_seg_gt, target_pad, params):
    assert im.ndim == 4, f'MRML takes an input of shape (N, C, H, W). Got {im.shape}!'
    Bq, _, Hq, Wq = im.shape
    lab = (sem_seg_gt.astype(jnp.uint8) + jnp.uint8(2)).astype(jnp.int32)
    outs = {}

    # ------------------------------ scale 0 ---------------------------------
    stride0 = FEATURE_STRIDES['res3']
    Hs0, Ws0 = Hq // stride0, Wq // stride0
    N0 = Hs0 * Ws0
    patches0 = patchify(im, stride0)
    pos0 = make_pos(Hs0, Ws0, stride0, Bq)
    sc0 = jnp.full((Bq, N0), float(ALL_OUT_FEATURES_SCALES['res3']), jnp.float32)

    # ------------------------------ scale 1 inputs --------------------------
    perm = jnp.arange(N0 - 1, -1, -1)                 # deterministic "shuffle"
    patches3 = patches0[:, perm]
    pos3_shuf = pos0[:, perm]
    sc3_shuf = sc0[:, perm]

    stride2 = FEATURE_STRIDES['res2']
    Hs2, Ws2 = Hq // stride2, Wq // stride2
    N2 = Hs2 * Ws2
    patches2 = patchify(im, stride2)
    pos2 = make_pos(Hs2, Ws2, stride2, Bq)
    sc2 = jnp.full((Bq, N2), float(ALL_OUT_FEATURES_SCALES['res2']), jnp.float32)

    # pos matching (torch.cdist p=1 + argmin): tiny, plain jnp
    idx = find_pos_org_order(pos0, pos3_shuf)                        # (B, N0)
    pos3_r = jnp.take_along_axis(pos3_shuf, idx[:, :, None], axis=1)
    sc3_r = jnp.take_along_axis(sc3_shuf, idx, axis=1)
    if DEBUG_CHECKS:       # host sync: debug only (run un-jitted)
        assert bool(jnp.all(pos0 == pos3_r))

    # oracle gather cells + 0/1 aggregation & pooling matrices
    P0, P1 = PATCH_SIZES[0], PATCH_SIZES[1]
    tok = jnp.arange(N0, dtype=jnp.int32)
    celly0 = (tok // Ws0)[None, :]                     # raster over (H/P0, W/P0)
    cellx0 = (tok % Ws0)[None, :]
    p_org = (pos3_r * MIN_PATCH).astype(jnp.int32)     # pixel coords
    cellx1 = p_org[..., 0] // P1                       # cells in the (H/P1, W/P1) grid
    celly1 = p_org[..., 1] // P1
    aggh = (jnp.arange(Hq)[None, :] // P1 ==
            jnp.arange(Hq // P1)[:, None]).astype(jnp.bfloat16)      # (H/P1, H)
    aggwT = (jnp.arange(Wq)[:, None] // P1 ==
             jnp.arange(Wq // P1)[None, :]).astype(jnp.bfloat16)     # (W, W/P1)
    r = P0 // P1
    poolh = (jnp.arange(Hq // P1)[None, :] // r ==
             jnp.arange(Hq // P0)[:, None]).astype(jnp.bfloat16)     # (H/P0, H/P1)
    poolwT = (jnp.arange(Wq // P1)[:, None] // r ==
              jnp.arange(Wq // P0)[None, :]).astype(jnp.bfloat16)    # (W/P1, W/P0)

    # --------------------------- single fused kernel ------------------------
    feat0_f, feat3_f, res2_f, rows = mrotb_fused(
        patches0.reshape(Bq * N0, -1),
        patches3.reshape(Bq * N0, -1),
        patches2.reshape(Bq * N2, -1),
        lab, target_pad.reshape(-1).astype(jnp.int32),
        aggh, aggwT, poolh, poolwT,
        celly0, cellx0, celly1, cellx1,
        params['embed'][(0, 'res3')], params['upsamplers'][0],
        params['embed'][(1, 'res3')], params['embed'][(1, 'res2')],
        params['out_norms'][1])

    feat0 = feat0_f.reshape(Bq, N0, -1)
    feat3_shuf = feat3_f.reshape(Bq, N0, -1)
    pred0 = rows[0, :Bq * N0].reshape(Bq, N0)
    oracle0 = rows[0, Bq * N0:2 * Bq * N0].reshape(Bq, N0)
    oracle1 = rows[0, 2 * Bq * N0:3 * Bq * N0].reshape(Bq, N0)
    # oracle1 is computed for parity with the reference module but unused at
    # the last scale (eval mode keeps the predicted mask).

    outs['res3_pos'] = pos0
    outs['res3_scale'] = sc0
    outs['res3_spatial_shape'] = jnp.array([Hs0, Ws0], jnp.int32)
    outs['upsampling_mask_pred_0'] = pred0
    outs['upsampling_mask_oracle_0'] = oracle0
    outs['upsampling_mask_pos_0'] = jnp.concatenate([sc0[:, :, None], pos0], axis=2)
    # eval mode (training == False) -> the predicted mask would be fed forward.
    # TODO(synk): features / features_pos feedback omitted; the synthetic
    # backbone (stand-in for build_backbone_indexed) ignores them.

    # reorder scale-1 res3 tokens back to original raster order, concat channels
    feat3_r = jnp.take_along_axis(feat3_shuf, idx[:, :, None], axis=1)
    res3 = jnp.concatenate([feat0, feat3_r], axis=2)
    g3, b3 = params['out_norms'][0]
    outs['res3'] = layer_norm(res3, g3, b3)            # 32 rows x 64 ch: XLA fuses

    outs['res2'] = res2_f.reshape(Bq, N2, -1)           # LN already applied in-kernel
    outs['res2_pos'] = pos2
    outs['res2_scale'] = sc2
    outs['res2_spatial_shape'] = jnp.array([Hs2, Ws2], jnp.int32)
    outs['min_spatial_shape'] = jnp.array([Hq // MIN_PATCH, Wq // MIN_PATCH], jnp.int32)
    _ = (sc3_r, oracle1)   # kept for data-flow parity; unused downstream
    return outs


# ----------------------------------- main -----------------------------------
if __name__ == "__main__":
    key = jax.random.PRNGKey(0)
    k_im, k_seg, k_par = jax.random.split(key, 3)
    im = jax.random.normal(k_im, (B, C_IN, H, W), jnp.float32)
    sem_seg_gt = jax.random.randint(k_seg, (B, H, W), 0, 4).astype(jnp.int32)
    target_pad = jnp.array([[0, 0], [4, 8]], jnp.int32)
    params = init_params(k_par)

    fwd = jax.jit(forward)
    outs = fwd(im, sem_seg_gt, target_pad, params)
    jax.block_until_ready(outs)

    assert outs['res3'].shape == (B, (H // 8) * (W // 8), sum(EMBED_DIMS))
    assert outs['res2'].shape == (B, (H // 4) * (W // 4), EMBED_DIMS[1])
    assert outs['upsampling_mask_pred_0'].shape == (B, (H // 8) * (W // 8))
    assert outs['upsampling_mask_oracle_0'].shape == (B, (H // 8) * (W // 8))
    assert outs['upsampling_mask_pos_0'].shape == (B, (H // 8) * (W // 8), 3)
    print("KERNEL_OK")
</pallas_src>

<mosaic_0001>
module attributes {stable_mosaic.version = 11 : i64} {
  func.func @_mrotb_kernel(%arg0: i32, %arg1: memref<4xi32, #tpu.memory_space<smem>>, %arg2: memref<32x192xf32, #tpu.memory_space<vmem>>, %arg3: memref<32x192xf32, #tpu.memory_space<vmem>>, %arg4: memref<128x48xf32, #tpu.memory_space<vmem>>, %arg5: memref<2x32x32xi32, #tpu.memory_space<vmem>>, %arg6: memref<8x32xbf16, #tpu.memory_space<vmem>>, %arg7: memref<32x8xbf16, #tpu.memory_space<vmem>>, %arg8: memref<4x8xbf16, #tpu.memory_space<vmem>>, %arg9: memref<8x4xbf16, #tpu.memory_space<vmem>>, %arg10: memref<1x16xi32, #tpu.memory_space<vmem>>, %arg11: memref<1x16xi32, #tpu.memory_space<vmem>>, %arg12: memref<2x16xi32, #tpu.memory_space<vmem>>, %arg13: memref<2x16xi32, #tpu.memory_space<vmem>>, %arg14: memref<192x32xf32, #tpu.memory_space<vmem>>, %arg15: memref<1x32xf32, #tpu.memory_space<vmem>>, %arg16: memref<32x32xf32, #tpu.memory_space<vmem>>, %arg17: memref<1x32xf32, #tpu.memory_space<vmem>>, %arg18: memref<32x32xf32, #tpu.memory_space<vmem>>, %arg19: memref<1x32xf32, #tpu.memory_space<vmem>>, %arg20: memref<1x32xf32, #tpu.memory_space<vmem>>, %arg21: memref<1x1xf32, #tpu.memory_space<vmem>>, %arg22: memref<192x32xf32, #tpu.memory_space<vmem>>, %arg23: memref<1x32xf32, #tpu.memory_space<vmem>>, %arg24: memref<48x32xf32, #tpu.memory_space<vmem>>, %arg25: memref<1x32xf32, #tpu.memory_space<vmem>>, %arg26: memref<1x32xf32, #tpu.memory_space<vmem>>, %arg27: memref<1x32xf32, #tpu.memory_space<vmem>>, %arg28: memref<32x32xf32, #tpu.memory_space<vmem>>, %arg29: memref<32x32xf32, #tpu.memory_space<vmem>>, %arg30: memref<128x32xf32, #tpu.memory_space<vmem>>, %arg31: memref<1x96xf32, #tpu.memory_space<vmem>>) attributes {dimension_semantics = [#tpu.dimension_semantics<arbitrary>], iteration_bounds = array<i64: 1>, scalar_prefetch = 0 : i64, scratch_operands = 0 : i64, tpu.core_type = #tpu.core_type<tc>, window_params = [{transform_indices = @transform_0, window_bounds = array<i64: 4>}, {pipeline_mode = #tpu.pipeline_mode<synchronous>, transform_indices = @transform_1, window_bounds = array<i64: 32, 192>}, {pipeline_mode = #tpu.pipeline_mode<synchronous>, transform_indices = @transform_2, window_bounds = array<i64: 32, 192>}, {pipeline_mode = #tpu.pipeline_mode<synchronous>, transform_indices = @transform_3, window_bounds = array<i64: 128, 48>}, {pipeline_mode = #tpu.pipeline_mode<synchronous>, transform_indices = @transform_4, window_bounds = array<i64: 2, 32, 32>}, {pipeline_mode = #tpu.pipeline_mode<synchronous>, transform_indices = @transform_5, window_bounds = array<i64: 8, 32>}, {pipeline_mode = #tpu.pipeline_mode<synchronous>, transform_indices = @transform_6, window_bounds = array<i64: 32, 8>}, {pipeline_mode = #tpu.pipeline_mode<synchronous>, transform_indices = @transform_7, window_bounds = array<i64: 4, 8>}, {pipeline_mode = #tpu.pipeline_mode<synchronous>, transform_indices = @transform_8, window_bounds = array<i64: 8, 4>}, {pipeline_mode = #tpu.pipeline_mode<synchronous>, transform_indices = @transform_9, window_bounds = array<i64: 1, 16>}, {pipeline_mode = #tpu.pipeline_mode<synchronous>, transform_indices = @transform_10, window_bounds = array<i64: 1, 16>}, {pipeline_mode = #tpu.pipeline_mode<synchronous>, transform_indices = @transform_11, window_bounds = array<i64: 2, 16>}, {pipeline_mode = #tpu.pipeline_mode<synchronous>, transform_indices = @transform_12, window_bounds = array<i64: 2, 16>}, {pipeline_mode = #tpu.pipeline_mode<synchronous>, transform_indices = @transform_13, window_bounds = array<i64: 192, 32>}, {pipeline_mode = #tpu.pipeline_mode<synchronous>, transform_indices = @transform_14, window_bounds = array<i64: 1, 32>}, {pipeline_mode = #tpu.pipeline_mode<synchronous>, transform_indices = @transform_15, window_bounds = array<i64: 32, 32>}, {pipeline_mode = #tpu.pipeline_mode<synchronous>, transform_indices = @transform_16, window_bounds = array<i64: 1, 32>}, {pipeline_mode = #tpu.pipeline_mode<synchronous>, transform_indices = @transform_17, window_bounds = array<i64: 32, 32>}, {pipeline_mode = #tpu.pipeline_mode<synchronous>, transform_indices = @transform_18, window_bounds = array<i64: 1, 32>}, {pipeline_mode = #tpu.pipeline_mode<synchronous>, transform_indices = @transform_19, window_bounds = array<i64: 1, 32>}, {pipeline_mode = #tpu.pipeline_mode<synchronous>, transform_indices = @transform_20, window_bounds = array<i64: 1, 1>}, {pipeline_mode = #tpu.pipeline_mode<synchronous>, transform_indices = @transform_21, window_bounds = array<i64: 192, 32>}, {pipeline_mode = #tpu.pipeline_mode<synchronous>, transform_indices = @transform_22, window_bounds = array<i64: 1, 32>}, {pipeline_mode = #tpu.pipeline_mode<synchronous>, transform_indices = @transform_23, window_bounds = array<i64: 48, 32>}, {pipeline_mode = #tpu.pipeline_mode<synchronous>, transform_indices = @transform_24, window_bounds = array<i64: 1, 32>}, {pipeline_mode = #tpu.pipeline_mode<synchronous>, transform_indices = @transform_25, window_bounds = array<i64: 1, 32>}, {pipeline_mode = #tpu.pipeline_mode<synchronous>, transform_indices = @transform_26, window_bounds = array<i64: 1, 32>}, {pipeline_mode = #tpu.pipeline_mode<synchronous>, transform_indices = @transform_27, window_bounds = array<i64: 32, 32>}, {pipeline_mode = #tpu.pipeline_mode<synchronous>, transform_indices = @transform_28, window_bounds = array<i64: 32, 32>}, {pipeline_mode = #tpu.pipeline_mode<synchronous>, transform_indices = @transform_29, window_bounds = array<i64: 128, 32>}, {pipeline_mode = #tpu.pipeline_mode<synchronous>, transform_indices = @transform_30, window_bounds = array<i64: 1, 96>}]} {
    %c0 = arith.constant 0 : index
    %c0_0 = arith.constant 0 : index
    %0 = vector.load %arg2[%c0, %c0_0] : memref<32x192xf32, #tpu.memory_space<vmem>>, vector<32x192xf32>
    %c0_1 = arith.constant 0 : index
    %c0_2 = arith.constant 0 : index
    %1 = vector.load %arg14[%c0_1, %c0_2] : memref<192x32xf32, #tpu.memory_space<vmem>>, vector<192x32xf32>
    %cst = arith.constant dense<0.000000e+00> : vector<32x32xf32>
    %2 = tpu.matmul %0, %1, %cst {dimension_numbers = #tpu.dot_dimension_numbers<[1], [0], [0], [1], [0, 0, 1, 1], [], []>} : vector<32x192xf32>, vector<192x32xf32>, vector<32x32xf32> -> vector<32x32xf32>
    %c0_3 = arith.constant 0 : index
    %c0_4 = arith.constant 0 : index
    %3 = vector.load %arg15[%c0_3, %c0_4] : memref<1x32xf32, #tpu.memory_space<vmem>>, vector<1x32xf32>
    %4 = vector.broadcast %3 : vector<1x32xf32> to vector<32x32xf32>
    %5 = arith.addf %2, %4 : vector<32x32xf32>
    %c0_5 = arith.constant 0 : index
    %c0_6 = arith.constant 0 : index
    %6 = vector.load %arg28[%c0_5, %c0_6] : memref<32x32xf32, #tpu.memory_space<vmem>>, vector<32x32xf32>
    tpu.vector_store %arg28[%c0_5, %c0_6], %5 {strides = array<i32>} : memref<32x32xf32, #tpu.memory_space<vmem>>, vector<32x32xf32>,
    %c0_7 = arith.constant 0 : index
    %c0_8 = arith.constant 0 : index
    %7 = vector.load %arg3[%c0_7, %c0_8] : memref<32x192xf32, #tpu.memory_space<vmem>>, vector<32x192xf32>
    %c0_9 = arith.constant 0 : index
    %c0_10 = arith.constant 0 : index
    %8 = vector.load %arg22[%c0_9, %c0_10] : memref<192x32xf32, #tpu.memory_space<vmem>>, vector<192x32xf32>
    %cst_11 = arith.constant dense<0.000000e+00> : vector<32x32xf32>
    %9 = tpu.matmul %7, %8, %cst_11 {dimension_numbers = #tpu.dot_dimension_numbers<[1], [0], [0], [1], [0, 0, 1, 1], [], []>} : vector<32x192xf32>, vector<192x32xf32>, vector<32x32xf32> -> vector<32x32xf32>
    %c0_12 = arith.constant 0 : index
    %c0_13 = arith.constant 0 : index
    %10 = vector.load %arg23[%c0_12, %c0_13] : memref<1x32xf32, #tpu.memory_space<vmem>>, vector<1x32xf32>
    %11 = vector.broadcast %10 : vector<1x32xf32> to vector<32x32xf32>
    %12 = arith.addf %9, %11 : vector<32x32xf32>
    %c0_14 = arith.constant 0 : index
    %c0_15 = arith.constant 0 : index
    %13 = vector.load %arg29[%c0_14, %c0_15] : memref<32x32xf32, #tpu.memory_space<vmem>>, vector<32x32xf32>
    tpu.vector_store %arg29[%c0_14, %c0_15], %12 {strides = array<i32>} : memref<32x32xf32, #tpu.memory_space<vmem>>, vector<32x32xf32>,
    %c0_16 = arith.constant 0 : index
    %c0_17 = arith.constant 0 : index
    %14 = vector.load %arg4[%c0_16, %c0_17] : memref<128x48xf32, #tpu.memory_space<vmem>>, vector<128x48xf32>
    %c0_18 = arith.constant 0 : index
    %c0_19 = arith.constant 0 : index
    %15 = vector.load %arg24[%c0_18, %c0_19] : memref<48x32xf32, #tpu.memory_space<vmem>>, vector<48x32xf32>
    %cst_20 = arith.constant dense<0.000000e+00> : vector<128x32xf32>
    %16 = tpu.matmul %14, %15, %cst_20 {dimension_numbers = #tpu.dot_dimension_numbers<[1], [0], [0], [1], [0, 0, 1, 1], [], []>} : vector<128x48xf32>, vector<48x32xf32>, vector<128x32xf32> -> vector<128x32xf32>
    %c0_21 = arith.constant 0 : index
    %c0_22 = arith.constant 0 : index
    %17 = vector.load %arg25[%c0_21, %c0_22] : memref<1x32xf32, #tpu.memory_space<vmem>>, vector<1x32xf32>
    %18 = vector.broadcast %17 : vector<1x32xf32> to vector<128x32xf32>
    %19 = arith.addf %16, %18 : vector<128x32xf32>
    %cst_23 = arith.constant dense<0.000000e+00> : vector<128xf32>
    %20 = vector.multi_reduction <add>, %19, %cst_23 [1] : vector<128x32xf32> to vector<128xf32>
    %21 = vector.shape_cast %20 : vector<128xf32> to vector<128x1xf32>
    %cst_24 = arith.constant 3.200000e+01 : f32
    %22 = vector.broadcast %cst_24 : f32 to vector<128x1xf32>
    %23 = arith.divf %21, %22 : vector<128x1xf32>
    %24 = vector.broadcast %23 : vector<128x1xf32> to vector<128x32xf32>
    %25 = arith.subf %19, %24 : vector<128x32xf32>
    %26 = arith.mulf %25, %25 : vector<128x32xf32>
    %cst_25 = arith.constant dense<0.000000e+00> : vector<128xf32>
    %27 = vector.multi_reduction <add>, %26, %cst_25 [1] : vector<128x32xf32> to vector<128xf32>
    %28 = vector.shape_cast %27 : vector<128xf32> to vector<128x1xf32>
    %cst_26 = arith.constant 3.200000e+01 : f32
    %29 = vector.broadcast %cst_26 : f32 to vector<128x1xf32>
    %30 = arith.divf %28, %29 : vector<128x1xf32>
    %31 = vector.broadcast %23 : vector<128x1xf32> to vector<128x32xf32>
    %32 = arith.subf %19, %31 : vector<128x32xf32>
    %cst_27 = arith.constant 9.99999974E-6 : f32
    %33 = vector.broadcast %cst_27 : f32 to vector<128x1xf32>
    %34 = arith.addf %30, %33 : vector<128x1xf32>
    %35 = math.rsqrt %34 : vector<128x1xf32>
    %36 = vector.broadcast %35 : vector<128x1xf32> to vector<128x32xf32>
    %37 = arith.mulf %32, %36 : vector<128x32xf32>
    %c0_28 = arith.constant 0 : index
    %c0_29 = arith.constant 0 : index
    %38 = vector.load %arg26[%c0_28, %c0_29] : memref<1x32xf32, #tpu.memory_space<vmem>>, vector<1x32xf32>
    %39 = vector.broadcast %38 : vector<1x32xf32> to vector<128x32xf32>
    %40 = arith.mulf %37, %39 : vector<128x32xf32>
    %c0_30 = arith.constant 0 : index
    %c0_31 = arith.constant 0 : index
    %41 = vector.load %arg27[%c0_30, %c0_31] : memref<1x32xf32, #tpu.memory_space<vmem>>, vector<1x32xf32>
    %42 = vector.broadcast %41 : vector<1x32xf32> to vector<128x32xf32>
    %43 = arith.addf %40, %42 : vector<128x32xf32>
    %c0_32 = arith.constant 0 : index
    %c0_33 = arith.constant 0 : index
    %44 = vector.load %arg30[%c0_32, %c0_33] : memref<128x32xf32, #tpu.memory_space<vmem>>, vector<128x32xf32>
    tpu.vector_store %arg30[%c0_32, %c0_33], %43 {strides = array<i32>} : memref<128x32xf32, #tpu.memory_space<vmem>>, vector<128x32xf32>,
    %c0_34 = arith.constant 0 : index
    %c0_35 = arith.constant 0 : index
    %45 = vector.load %arg16[%c0_34, %c0_35] : memref<32x32xf32, #tpu.memory_space<vmem>>, vector<32x32xf32>
    %cst_36 = arith.constant dense<0.000000e+00> : vector<32x32xf32>
    %46 = tpu.matmul %5, %45, %cst_36 {dimension_numbers = #tpu.dot_dimension_numbers<[1], [0], [0], [1], [0, 0, 1, 1], [], []>} : vector<32x32xf32>, vector<32x32xf32>, vector<32x32xf32> -> vector<32x32xf32>
    %c0_37 = arith.constant 0 : index
    %c0_38 = arith.constant 0 : index
    %47 = vector.load %arg17[%c0_37, %c0_38] : memref<1x32xf32, #tpu.memory_space<vmem>>, vector<1x32xf32>
    %48 = vector.broadcast %47 : vector<1x32xf32> to vector<32x32xf32>
    %49 = arith.addf %46, %48 : vector<32x32xf32>
    %cst_39 = arith.constant 0.000000e+00 : f32
    %50 = vector.broadcast %cst_39 : f32 to vector<32x32xf32>
    %51 = arith.maximumf %49, %50 : vector<32x32xf32>
    %c0_40 = arith.constant 0 : index
    %c0_41 = arith.constant 0 : index
    %52 = vector.load %arg18[%c0_40, %c0_41] : memref<32x32xf32, #tpu.memory_space<vmem>>, vector<32x32xf32>
    %cst_42 = arith.constant dense<0.000000e+00> : vector<32x32xf32>
    %53 = tpu.matmul %51, %52, %cst_42 {dimension_numbers = #tpu.dot_dimension_numbers<[1], [0], [0], [1], [0, 0, 1, 1], [], []>} : vector<32x32xf32>, vector<32x32xf32>, vector<32x32xf32> -> vector<32x32xf32>
    %c0_43 = arith.constant 0 : index
    %c0_44 = arith.constant 0 : index
    %54 = vector.load %arg19[%c0_43, %c0_44] : memref<1x32xf32, #tpu.memory_space<vmem>>, vector<1x32xf32>
    %55 = vector.broadcast %54 : vector<1x32xf32> to vector<32x32xf32>
    %56 = arith.addf %53, %55 : vector<32x32xf32>
    %cst_45 = arith.constant 0.000000e+00 : f32
    %57 = vector.broadcast %cst_45 : f32 to vector<32x32xf32>
    %58 = arith.maximumf %56, %57 : vector<32x32xf32>
    %c0_46 = arith.constant 0 : index
    %c0_47 = arith.constant 0 : index
    %59 = vector.load %arg20[%c0_46, %c0_47] : memref<1x32xf32, #tpu.memory_space<vmem>>, vector<1x32xf32>
    %cst_48 = arith.constant dense<0.000000e+00> : vector<1x32xf32>
    %60 = tpu.matmul %59, %58, %cst_48 {dimension_numbers = #tpu.dot_dimension_numbers<[1], [1], [0], [0], [0, 0, 1, 0], [], []>} : vector<1x32xf32>, vector<32x32xf32>, vector<1x32xf32> -> vector<1x32xf32>
    %c0_49 = arith.constant 0 : index
    %c0_50 = arith.constant 0 : index
    %61 = vector.load %arg21[%c0_49, %c0_50] : memref<1x1xf32, #tpu.memory_space<vmem>>, vector<1x1xf32>
    %62 = vector.broadcast %61 : vector<1x1xf32> to vector<1x32xf32>
    %63 = arith.addf %60, %62 : vector<1x32xf32>
    %c0_51 = arith.constant 0 : index
    %c0_52 = arith.constant 0 : index
    %64 = vector.load %arg10[%c0_51, %c0_52] : memref<1x16xi32, #tpu.memory_space<vmem>>, vector<1x16xi32>
    %c0_53 = arith.constant 0 : index
    %c0_54 = arith.constant 0 : index
    %65 = vector.load %arg11[%c0_53, %c0_54] : memref<1x16xi32, #tpu.memory_space<vmem>>, vector<1x16xi32>
    %c0_55 = arith.constant 0 : index
    %c0_56 = arith.constant 0 : index
    %66 = vector.load %arg12[%c0_55, %c0_56] : memref<2x16xi32, #tpu.memory_space<vmem>>, vector<2x16xi32>
    %c0_57 = arith.constant 0 : index
    %c0_58 = arith.constant 0 : index
    %67 = vector.load %arg13[%c0_57, %c0_58] : memref<2x16xi32, #tpu.memory_space<vmem>>, vector<2x16xi32>
    %c0_59 = arith.constant 0 : index
    %68 = memref.load %arg1[%c0_59] : memref<4xi32, #tpu.memory_space<smem>>
    %c1 = arith.constant 1 : index
    %69 = memref.load %arg1[%c1] : memref<4xi32, #tpu.memory_space<smem>>
    %c0_60 = arith.constant 0 : index
    %c0_61 = arith.constant 0 : index
    %c0_62 = arith.constant 0 : index
    %70 = vector.load %arg5[%c0_60, %c0_61, %c0_62] : memref<2x32x32xi32, #tpu.memory_space<vmem>>, vector<1x32x32xi32>
    %71 = vector.shape_cast %70 : vector<1x32x32xi32> to vector<32x32xi32>
    %72 = tpu.iota {dimensions = array<i32: 0>} : vector<32x32xi32>
    %73 = tpu.iota {dimensions = array<i32: 1>} : vector<32x32xi32>
    %c32_i32 = arith.constant 32 : i32
    %74 = arith.subi %c32_i32, %68 : i32
    %c32_i32_63 = arith.constant 32 : i32
    %75 = arith.subi %c32_i32_63, %69 : i32
    %c0_i32 = arith.constant 0 : i32
    %76 = vector.broadcast %c0_i32 : i32 to vector<32x32xi32>
    %77 = arith.cmpi eq, %71, %76 : vector<32x32xi32>
    %c5_i32 = arith.constant 5 : i32
    %78 = vector.broadcast %c5_i32 : i32 to vector<32x32xi32>
    %79 = arith.cmpi slt, %72, %78 : vector<32x32xi32>
    %80 = vector.broadcast %75 : i32 to vector<32x32xi32>
    %81 = arith.cmpi slt, %73, %80 : vector<32x32xi32>
    %82 = arith.andi %79, %81 : vector<32x32xi1>
    %c5_i32_64 = arith.constant 5 : i32
    %83 = arith.subi %74, %c5_i32_64 : i32
    %84 = vector.broadcast %83 : i32 to vector<32x32xi32>
    %85 = arith.cmpi sge, %72, %84 : vector<32x32xi32>
    %86 = vector.broadcast %74 : i32 to vector<32x32xi32>
    %87 = arith.cmpi slt, %72, %86 : vector<32x32xi32>
    %88 = arith.andi %85, %87 : vector<32x32xi1>
    %89 = vector.broadcast %75 : i32 to vector<32x32xi32>
    %90 = arith.cmpi slt, %73, %89 : vector<32x32xi32>
    %91 = arith.andi %88, %90 : vector<32x32xi1>
    %92 = arith.ori %82, %91 : vector<32x32xi1>
    %93 = vector.broadcast %74 : i32 to vector<32x32xi32>
    %94 = arith.cmpi slt, %72, %93 : vector<32x32xi32>
    %c5_i32_65 = arith.constant 5 : i32
    %95 = vector.broadcast %c5_i32_65 : i32 to vector<32x32xi32>
    %96 = arith.cmpi slt, %73, %95 : vector<32x32xi32>
    %97 = arith.andi %94, %96 : vector<32x32xi1>
    %98 = arith.ori %92, %97 : vector<32x32xi1>
    %99 = vector.broadcast %74 : i32 to vector<32x32xi32>
    %100 = arith.cmpi slt, %72, %99 : vector<32x32xi32>
    %c5_i32_66 = arith.constant 5 : i32
    %101 = arith.subi %75, %c5_i32_66 : i32
    %102 = vector.broadcast %101 : i32 to vector<32x32xi32>
    %103 = arith.cmpi sge, %73, %102 : vector<32x32xi32>
    %104 = arith.andi %100, %103 : vector<32x32xi1>
    %105 = vector.broadcast %75 : i32 to vector<32x32xi32>
    %106 = arith.cmpi slt, %73, %105 : vector<32x32xi32>
    %107 = arith.andi %104, %106 : vector<32x32xi1>
    %108 = arith.ori %98, %107 : vector<32x32xi1>
    %c1_i32 = arith.constant 1 : i32
    %109 = vector.broadcast %c1_i32 : i32 to vector<32x32xi32>
    %110 = arith.cmpi eq, %71, %109 : vector<32x32xi32>
    %111 = arith.andi %110, %108 : vector<32x32xi1>
    %112 = arith.ori %77, %111 : vector<32x32xi1>
    %113 = arith.extui %112 : vector<32x32xi1> to vector<32x32xi32>
    %114 = vector.extract_strided_slice %71 {offsets = [31, 0], sizes = [1, 32], strides = [1, 1]} : vector<32x32xi32> to vector<1x32xi32>
    %115 = vector.extract_strided_slice %71 {offsets = [0, 0], sizes = [31, 32], strides = [1, 1]} : vector<32x32xi32> to vector<31x32xi32>
    %116 = tpu.concatenate %114, %115 in 0 : vector<1x32xi32>, vector<31x32xi32> -> vector<32x32xi32>
    %117 = vector.extract_strided_slice %113 {offsets = [31, 0], sizes = [1, 32], strides = [1, 1]} : vector<32x32xi32> to vector<1x32xi32>
    %118 = vector.extract_strided_slice %113 {offsets = [0, 0], sizes = [31, 32], strides = [1, 1]} : vector<32x32xi32> to vector<31x32xi32>
    %119 = tpu.concatenate %117, %118 in 0 : vector<1x32xi32>, vector<31x32xi32> -> vector<32x32xi32>
    %c1_i32_67 = arith.constant 1 : i32
    %120 = vector.broadcast %c1_i32_67 : i32 to vector<32x32xi32>
    %121 = arith.cmpi sge, %72, %120 : vector<32x32xi32>
    %c0_i32_68 = arith.constant 0 : i32
    %122 = vector.broadcast %c0_i32_68 : i32 to vector<32x32xi32>
    %123 = arith.cmpi eq, %113, %122 : vector<32x32xi32>
    %124 = arith.andi %121, %123 : vector<32x32xi1>
    %c0_i32_69 = arith.constant 0 : i32
    %125 = vector.broadcast %c0_i32_69 : i32 to vector<32x32xi32>
    %126 = arith.cmpi eq, %119, %125 : vector<32x32xi32>
    %127 = arith.andi %124, %126 : vector<32x32xi1>
    %128 = arith.cmpi ne, %71, %116 : vector<32x32xi32>
    %129 = arith.andi %127, %128 : vector<32x32xi1>
    %130 = vector.extract_strided_slice %71 {offsets = [1, 0], sizes = [31, 32], strides = [1, 1]} : vector<32x32xi32> to vector<31x32xi32>
    %131 = vector.extract_strided_slice %71 {offsets = [0, 0], sizes = [1, 32], strides = [1, 1]} : vector<32x32xi32> to vector<1x32xi32>
    %132 = tpu.concatenate %130, %131 in 0 : vector<31x32xi32>, vector<1x32xi32> -> vector<32x32xi32>
    %133 = vector.extract_strided_slice %113 {offsets = [1, 0], sizes = [31, 32], strides = [1, 1]} : vector<32x32xi32> to vector<31x32xi32>
    %134 = vector.extract_strided_slice %113 {offsets = [0, 0], sizes = [1, 32], strides = [1, 1]} : vector<32x32xi32> to vector<1x32xi32>
    %135 = tpu.concatenate %133, %134 in 0 : vector<31x32xi32>, vector<1x32xi32> -> vector<32x32xi32>
    %c31_i32 = arith.constant 31 : i32
    %136 = vector.broadcast %c31_i32 : i32 to vector<32x32xi32>
    %137 = arith.cmpi slt, %72, %136 : vector<32x32xi32>
    %c0_i32_70 = arith.constant 0 : i32
    %138 = vector.broadcast %c0_i32_70 : i32 to vector<32x32xi32>
    %139 = arith.cmpi eq, %113, %138 : vector<32x32xi32>
    %140 = arith.andi %137, %139 : vector<32x32xi1>
    %c0_i32_71 = arith.constant 0 : i32
    %141 = vector.broadcast %c0_i32_71 : i32 to vector<32x32xi32>
    %142 = arith.cmpi eq, %135, %141 : vector<32x32xi32>
    %143 = arith.andi %140, %142 : vector<32x32xi1>
    %144 = arith.cmpi ne, %71, %132 : vector<32x32xi32>
    %145 = arith.andi %143, %144 : vector<32x32xi1>
    %146 = arith.ori %129, %145 : vector<32x32xi1>
    %147 = vector.extract_strided_slice %71 {offsets = [0, 31], sizes = [32, 1], strides = [1, 1]} : vector<32x32xi32> to vector<32x1xi32>
    %148 = vector.extract_strided_slice %71 {offsets = [0, 0], sizes = [32, 31], strides = [1, 1]} : vector<32x32xi32> to vector<32x31xi32>
    %149 = tpu.concatenate %147, %148 in 1 : vector<32x1xi32>, vector<32x31xi32> -> vector<32x32xi32>
    %150 = vector.extract_strided_slice %113 {offsets = [0, 31], sizes = [32, 1], strides = [1, 1]} : vector<32x32xi32> to vector<32x1xi32>
    %151 = vector.extract_strided_slice %113 {offsets = [0, 0], sizes = [32, 31], strides = [1, 1]} : vector<32x32xi32> to vector<32x31xi32>
    %152 = tpu.concatenate %150, %151 in 1 : vector<32x1xi32>, vector<32x31xi32> -> vector<32x32xi32>
    %c1_i32_72 = arith.constant 1 : i32
    %153 = vector.broadcast %c1_i32_72 : i32 to vector<32x32xi32>
    %154 = arith.cmpi sge, %73, %153 : vector<32x32xi32>
    %c0_i32_73 = arith.constant 0 : i32
    %155 = vector.broadcast %c0_i32_73 : i32 to vector<32x32xi32>
    %156 = arith.cmpi eq, %113, %155 : vector<32x32xi32>
    %157 = arith.andi %154, %156 : vector<32x32xi1>
    %c0_i32_74 = arith.constant 0 : i32
    %158 = vector.broadcast %c0_i32_74 : i32 to vector<32x32xi32>
    %159 = arith.cmpi eq, %152, %158 : vector<32x32xi32>
    %160 = arith.andi %157, %159 : vector<32x32xi1>
    %161 = arith.cmpi ne, %71, %149 : vector<32x32xi32>
    %162 = arith.andi %160, %161 : vector<32x32xi1>
    %163 = arith.ori %146, %162 : vector<32x32xi1>
    %164 = vector.extract_strided_slice %71 {offsets = [0, 1], sizes = [32, 31], strides = [1, 1]} : vector<32x32xi32> to vector<32x31xi32>
    %165 = vector.extract_strided_slice %71 {offsets = [0, 0], sizes = [32, 1], strides = [1, 1]} : vector<32x32xi32> to vector<32x1xi32>
    %166 = tpu.concatenate %164, %165 in 1 : vector<32x31xi32>, vector<32x1xi32> -> vector<32x32xi32>
    %167 = vector.extract_strided_slice %113 {offsets = [0, 1], sizes = [32, 31], strides = [1, 1]} : vector<32x32xi32> to vector<32x31xi32>
    %168 = vector.extract_strided_slice %113 {offsets = [0, 0], sizes = [32, 1], strides = [1, 1]} : vector<32x32xi32> to vector<32x1xi32>
    %169 = tpu.concatenate %167, %168 in 1 : vector<32x31xi32>, vector<32x1xi32> -> vector<32x32xi32>
    %c31_i32_75 = arith.constant 31 : i32
    %170 = vector.broadcast %c31_i32_75 : i32 to vector<32x32xi32>
    %171 = arith.cmpi slt, %73, %170 : vector<32x32xi32>
    %c0_i32_76 = arith.constant 0 : i32
    %172 = vector.broadcast %c0_i32_76 : i32 to vector<32x32xi32>
    %173 = arith.cmpi eq, %113, %172 : vector<32x32xi32>
    %174 = arith.andi %171, %173 : vector<32x32xi1>
    %c0_i32_77 = arith.constant 0 : i32
    %175 = vector.broadcast %c0_i32_77 : i32 to vector<32x32xi32>
    %176 = arith.cmpi eq, %169, %175 : vector<32x32xi32>
    %177 = arith.andi %174, %176 : vector<32x32xi1>
    %178 = arith.cmpi ne, %71, %166 : vector<32x32xi32>
    %179 = arith.andi %177, %178 : vector<32x32xi1>
    %180 = arith.ori %163, %179 : vector<32x32xi1>
    %181 = arith.extui %180 : vector<32x32xi1> to vector<32x32xi32>
    %182 = arith.sitofp %181 : vector<32x32xi32> to vector<32x32xf32>
    %183 = arith.truncf %182 : vector<32x32xf32> to vector<32x32xbf16>
    %c0_78 = arith.constant 0 : index
    %c0_79 = arith.constant 0 : index
    %184 = vector.load %arg6[%c0_78, %c0_79] : memref<8x32xbf16, #tpu.memory_space<vmem>>, vector<8x32xbf16>
    %cst_80 = arith.constant dense<0.000000e+00> : vector<8x32xf32>
    %185 = tpu.matmul %184, %183, %cst_80 {dimension_numbers = #tpu.dot_dimension_numbers<[1], [0], [0], [1], [0, 0, 1, 1], [], []>} : vector<8x32xbf16>, vector<32x32xbf16>, vector<8x32xf32> -> vector<8x32xf32>
    %186 = arith.truncf %185 : vector<8x32xf32> to vector<8x32xbf16>
    %c0_81 = arith.constant 0 : index
    %c0_82 = arith.constant 0 : index
    %187 = vector.load %arg7[%c0_81, %c0_82] : memref<32x8xbf16, #tpu.memory_space<vmem>>, vector<32x8xbf16>
    %cst_83 = arith.constant dense<0.000000e+00> : vector<8x8xf32>
    %188 = tpu.matmul %186, %187, %cst_83 {dimension_numbers = #tpu.dot_dimension_numbers<[1], [0], [0], [1], [0, 0, 1, 1], [], []>} : vector<8x32xbf16>, vector<32x8xbf16>, vector<8x8xf32> -> vector<8x8xf32>
    %c0_84 = arith.constant 0 : index
    %c0_85 = arith.constant 0 : index
    %189 = vector.load %arg8[%c0_84, %c0_85] : memref<4x8xbf16, #tpu.memory_space<vmem>>, vector<4x8xbf16>
    %190 = arith.truncf %188 : vector<8x8xf32> to vector<8x8xbf16>
    %cst_86 = arith.constant dense<0.000000e+00> : vector<4x8xf32>
    %191 = tpu.matmul %189, %190, %cst_86 {dimension_numbers = #tpu.dot_dimension_numbers<[1], [0], [0], [1], [0, 0, 1, 1], [], []>} : vector<4x8xbf16>, vector<8x8xbf16>, vector<4x8xf32> -> vector<4x8xf32>
    %192 = arith.truncf %191 : vector<4x8xf32> to vector<4x8xbf16>
    %c0_87 = arith.constant 0 : index
    %c0_88 = arith.constant 0 : index
    %193 = vector.load %arg9[%c0_87, %c0_88] : memref<8x4xbf16, #tpu.memory_space<vmem>>, vector<8x4xbf16>
    %cst_89 = arith.constant dense<0.000000e+00> : vector<4x4xf32>
    %194 = tpu.matmul %192, %193, %cst_89 {dimension_numbers = #tpu.dot_dimension_numbers<[1], [0], [0], [1], [0, 0, 1, 1], [], []>} : vector<4x8xbf16>, vector<8x4xbf16>, vector<4x4xf32> -> vector<4x4xf32>
    %195 = tpu.iota {dimensions = array<i32: 0>} : vector<4x16xi32>
    %196 = vector.broadcast %65 : vector<1x16xi32> to vector<4x16xi32>
    %197 = arith.cmpi eq, %195, %196 : vector<4x16xi32>
    %198 = arith.extui %197 : vector<4x16xi1> to vector<4x16xi32>
    %199 = arith.sitofp %198 : vector<4x16xi32> to vector<4x16xf32>
    %200 = arith.truncf %199 : vector<4x16xf32> to vector<4x16xbf16>
    %201 = arith.truncf %194 : vector<4x4xf32> to vector<4x4xbf16>
    %cst_90 = arith.constant dense<0.000000e+00> : vector<4x16xf32>
    %202 = tpu.matmul %201, %200, %cst_90 {dimension_numbers = #tpu.dot_dimension_numbers<[1], [0], [0], [1], [0, 0, 1, 1], [], []>} : vector<4x4xbf16>, vector<4x16xbf16>, vector<4x16xf32> -> vector<4x16xf32>
    %203 = tpu.iota {dimensions = array<i32: 0>} : vector<4x16xi32>
    %204 = vector.broadcast %64 : vector<1x16xi32> to vector<4x16xi32>
    %205 = arith.cmpi eq, %203, %204 : vector<4x16xi32>
    %206 = arith.extui %205 : vector<4x16xi1> to vector<4x16xi32>
    %207 = arith.sitofp %206 : vector<4x16xi32> to vector<4x16xf32>
    %208 = arith.mulf %207, %202 : vector<4x16xf32>
    %cst_91 = arith.constant dense<0.000000e+00> : vector<16xf32>
    %209 = vector.multi_reduction <add>, %208, %cst_91 [0] : vector<4x16xf32> to vector<16xf32>
    %210 = vector.shape_cast %209 : vector<16xf32> to vector<1x16xf32>
    %211 = vector.shape_cast %210 : vector<1x16xf32> to vector<1x1x16xf32>
    %cst_92 = arith.constant dense<0.000000e+00> : vector<1xf32>
    %212 = vector.multi_reduction <add>, %211, %cst_92 [1, 2] : vector<1x1x16xf32> to vector<1xf32>
    %213 = vector.shape_cast %212 : vector<1xf32> to vector<1x1x1xf32>
    %214 = vector.extract %213[0, 0, 0] : f32 from vector<1x1x1xf32>
    %cst_93 = arith.constant 1.600000e+01 : f32
    %215 = arith.divf %214, %cst_93 : f32
    %216 = vector.broadcast %215 : f32 to vector<1x16xf32>
    %217 = arith.subf %210, %216 : vector<1x16xf32>
    %218 = arith.mulf %217, %217 : vector<1x16xf32>
    %219 = vector.shape_cast %218 : vector<1x16xf32> to vector<1x1x16xf32>
    %cst_94 = arith.constant dense<0.000000e+00> : vector<1xf32>
    %220 = vector.multi_reduction <add>, %219, %cst_94 [1, 2] : vector<1x1x16xf32> to vector<1xf32>
    %221 = vector.shape_cast %220 : vector<1xf32> to vector<1x1x1xf32>
    %222 = vector.extract %221[0, 0, 0] : f32 from vector<1x1x1xf32>
    %cst_95 = arith.constant 1.500000e+01 : f32
    %223 = arith.divf %222, %cst_95 : f32
    %224 = vector.broadcast %215 : f32 to vector<1x16xf32>
    %225 = arith.subf %210, %224 : vector<1x16xf32>
    %cst_96 = arith.constant 9.99999997E-7 : f32
    %226 = arith.addf %223, %cst_96 : f32
    %227 = math.rsqrt %226 : f32
    %228 = vector.broadcast %227 : f32 to vector<1x16xf32>
    %229 = arith.mulf %225, %228 : vector<1x16xf32>
    %230 = vector.extract_strided_slice %66 {offsets = [0, 0], sizes = [1, 16], strides = [1, 1]} : vector<2x16xi32> to vector<1x16xi32>
    %231 = vector.extract_strided_slice %67 {offsets = [0, 0], sizes = [1, 16], strides = [1, 1]} : vector<2x16xi32> to vector<1x16xi32>
    %232 = tpu.iota {dimensions = array<i32: 0>} : vector<8x16xi32>
    %233 = vector.broadcast %231 : vector<1x16xi32> to vector<8x16xi32>
    %234 = arith.cmpi eq, %232, %233 : vector<8x16xi32>
    %235 = arith.extui %234 : vector<8x16xi1> to vector<8x16xi32>
    %236 = arith.sitofp %235 : vector<8x16xi32> to vector<8x16xf32>
    %237 = arith.truncf %236 : vector<8x16xf32> to vector<8x16xbf16>
    %238 = arith.truncf %188 : vector<8x8xf32> to vector<8x8xbf16>
    %cst_97 = arith.constant dense<0.000000e+00> : vector<8x16xf32>
    %239 = tpu.matmul %238, %237, %cst_97 {dimension_numbers = #tpu.dot_dimension_numbers<[1], [0], [0], [1], [0, 0, 1, 1], [], []>} : vector<8x8xbf16>, vector<8x16xbf16>, vector<8x16xf32> -> vector<8x16xf32>
    %240 = tpu.iota {dimensions = array<i32: 0>} : vector<8x16xi32>
    %241 = vector.broadcast %230 : vector<1x16xi32> to vector<8x16xi32>
    %242 = arith.cmpi eq, %240, %241 : vector<8x16xi32>
    %243 = arith.extui %242 : vector<8x16xi1> to vector<8x16xi32>
    %244 = arith.sitofp %243 : vector<8x16xi32> to vector<8x16xf32>
    %245 = arith.mulf %244, %239 : vector<8x16xf32>
    %cst_98 = arith.constant dense<0.000000e+00> : vector<16xf32>
    %246 = vector.multi_reduction <add>, %245, %cst_98 [0] : vector<8x16xf32> to vector<16xf32>
    %247 = vector.shape_cast %246 : vector<16xf32> to vector<1x16xf32>
    %248 = vector.shape_cast %247 : vector<1x16xf32> to vector<1x1x16xf32>
    %cst_99 = arith.constant dense<0.000000e+00> : vector<1xf32>
    %249 = vector.multi_reduction <add>, %248, %cst_99 [1, 2] : vector<1x1x16xf32> to vector<1xf32>
    %250 = vector.shape_cast %249 : vector<1xf32> to vector<1x1x1xf32>
    %251 = vector.extract %250[0, 0, 0] : f32 from vector<1x1x1xf32>
    %cst_100 = arith.constant 1.600000e+01 : f32
    %252 = arith.divf %251, %cst_100 : f32
    %253 = vector.broadcast %252 : f32 to vector<1x16xf32>
    %254 = arith.subf %247, %253 : vector<1x16xf32>
    %255 = arith.mulf %254, %254 : vector<1x16xf32>
    %256 = vector.shape_cast %255 : vector<1x16xf32> to vector<1x1x16xf32>
    %cst_101 = arith.constant dense<0.000000e+00> : vector<1xf32>
    %257 = vector.multi_reduction <add>, %256, %cst_101 [1, 2] : vector<1x1x16xf32> to vector<1xf32>
    %258 = vector.shape_cast %257 : vector<1xf32> to vector<1x1x1xf32>
    %259 = vector.extract %258[0, 0, 0] : f32 from vector<1x1x1xf32>
    %cst_102 = arith.constant 1.500000e+01 : f32
    %260 = arith.divf %259, %cst_102 : f32
    %261 = vector.broadcast %252 : f32 to vector<1x16xf32>
    %262 = arith.subf %247, %261 : vector<1x16xf32>
    %cst_103 = arith.constant 9.99999997E-7 : f32
    %263 = arith.addf %260, %cst_103 : f32
    %264 = math.rsqrt %263 : f32
    %265 = vector.broadcast %264 : f32 to vector<1x16xf32>
    %266 = arith.mulf %262, %265 : vector<1x16xf32>
    %c2 = arith.constant 2 : index
    %267 = memref.load %arg1[%c2] : memref<4xi32, #tpu.memory_space<smem>>
    %c3 = arith.constant 3 : index
    %268 = memref.load %arg1[%c3] : memref<4xi32, #tpu.memory_space<smem>>
    %c1_104 = arith.constant 1 : index
    %c0_105 = arith.constant 0 : index
    %c0_106 = arith.constant 0 : index
    %269 = vector.load %arg5[%c1_104, %c0_105, %c0_106] : memref<2x32x32xi32, #tpu.memory_space<vmem>>, vector<1x32x32xi32>
    %270 = vector.shape_cast %269 : vector<1x32x32xi32> to vector<32x32xi32>
    %271 = tpu.iota {dimensions = array<i32: 0>} : vector<32x32xi32>
    %272 = tpu.iota {dimensions = array<i32: 1>} : vector<32x32xi32>
    %c32_i32_107 = arith.constant 32 : i32
    %273 = arith.subi %c32_i32_107, %267 : i32
    %c32_i32_108 = arith.constant 32 : i32
    %274 = arith.subi %c32_i32_108, %268 : i32
    %c0_i32_109 = arith.constant 0 : i32
    %275 = vector.broadcast %c0_i32_109 : i32 to vector<32x32xi32>
    %276 = arith.cmpi eq, %270, %275 : vector<32x32xi32>
    %c5_i32_110 = arith.constant 5 : i32
    %277 = vector.broadcast %c5_i32_110 : i32 to vector<32x32xi32>
    %278 = arith.cmpi slt, %271, %277 : vector<32x32xi32>
    %279 = vector.broadcast %274 : i32 to vector<32x32xi32>
    %280 = arith.cmpi slt, %272, %279 : vector<32x32xi32>
    %281 = arith.andi %278, %280 : vector<32x32xi1>
    %c5_i32_111 = arith.constant 5 : i32
    %282 = arith.subi %273, %c5_i32_111 : i32
    %283 = vector.broadcast %282 : i32 to vector<32x32xi32>
    %284 = arith.cmpi sge, %271, %283 : vector<32x32xi32>
    %285 = vector.broadcast %273 : i32 to vector<32x32xi32>
    %286 = arith.cmpi slt, %271, %285 : vector<32x32xi32>
    %287 = arith.andi %284, %286 : vector<32x32xi1>
    %288 = vector.broadcast %274 : i32 to vector<32x32xi32>
    %289 = arith.cmpi slt, %272, %288 : vector<32x32xi32>
    %290 = arith.andi %287, %289 : vector<32x32xi1>
    %291 = arith.ori %281, %290 : vector<32x32xi1>
    %292 = vector.broadcast %273 : i32 to vector<32x32xi32>
    %293 = arith.cmpi slt, %271, %292 : vector<32x32xi32>
    %c5_i32_112 = arith.constant 5 : i32
    %294 = vector.broadcast %c5_i32_112 : i32 to vector<32x32xi32>
    %295 = arith.cmpi slt, %272, %294 : vector<32x32xi32>
    %296 = arith.andi %293, %295 : vector<32x32xi1>
    %297 = arith.ori %291, %296 : vector<32x32xi1>
    %298 = vector.broadcast %273 : i32 to vector<32x32xi32>
    %299 = arith.cmpi slt, %271, %298 : vector<32x32xi32>
    %c5_i32_113 = arith.constant 5 : i32
    %300 = arith.subi %274, %c5_i32_113 : i32
    %301 = vector.broadcast %300 : i32 to vector<32x32xi32>
    %302 = arith.cmpi sge, %272, %301 : vector<32x32xi32>
    %303 = arith.andi %299, %302 : vector<32x32xi1>
    %304 = vector.broadcast %274 : i32 to vector<32x32xi32>
    %305 = arith.cmpi slt, %272, %304 : vector<32x32xi32>
    %306 = arith.andi %303, %305 : vector<32x32xi1>
    %307 = arith.ori %297, %306 : vector<32x32xi1>
    %c1_i32_114 = arith.constant 1 : i32
    %308 = vector.broadcast %c1_i32_114 : i32 to vector<32x32xi32>
    %309 = arith.cmpi eq, %270, %308 : vector<32x32xi32>
    %310 = arith.andi %309, %307 : vector<32x32xi1>
    %311 = arith.ori %276, %310 : vector<32x32xi1>
    %312 = arith.extui %311 : vector<32x32xi1> to vector<32x32xi32>
    %313 = vector.extract_strided_slice %270 {offsets = [31, 0], sizes = [1, 32], strides = [1, 1]} : vector<32x32xi32> to vector<1x32xi32>
    %314 = vector.extract_strided_slice %270 {offsets = [0, 0], sizes = [31, 32], strides = [1, 1]} : vector<32x32xi32> to vector<31x32xi32>
    %315 = tpu.concatenate %313, %314 in 0 : vector<1x32xi32>, vector<31x32xi32> -> vector<32x32xi32>
    %316 = vector.extract_strided_slice %312 {offsets = [31, 0], sizes = [1, 32], strides = [1, 1]} : vector<32x32xi32> to vector<1x32xi32>
    %317 = vector.extract_strided_slice %312 {offsets = [0, 0], sizes = [31, 32], strides = [1, 1]} : vector<32x32xi32> to vector<31x32xi32>
    %318 = tpu.concatenate %316, %317 in 0 : vector<1x32xi32>, vector<31x32xi32> -> vector<32x32xi32>
    %c1_i32_115 = arith.constant 1 : i32
    %319 = vector.broadcast %c1_i32_115 : i32 to vector<32x32xi32>
    %320 = arith.cmpi sge, %271, %319 : vector<32x32xi32>
    %c0_i32_116 = arith.constant 0 : i32
    %321 = vector.broadcast %c0_i32_116 : i32 to vector<32x32xi32>
    %322 = arith.cmpi eq, %312, %321 : vector<32x32xi32>
    %323 = arith.andi %320, %322 : vector<32x32xi1>
    %c0_i32_117 = arith.constant 0 : i32
    %324 = vector.broadcast %c0_i32_117 : i32 to vector<32x32xi32>
    %325 = arith.cmpi eq, %318, %324 : vector<32x32xi32>
    %326 = arith.andi %323, %325 : vector<32x32xi1>
    %327 = arith.cmpi ne, %270, %315 : vector<32x32xi32>
    %328 = arith.andi %326, %327 : vector<32x32xi1>
    %329 = vector.extract_strided_slice %270 {offsets = [1, 0], sizes = [31, 32], strides = [1, 1]} : vector<32x32xi32> to vector<31x32xi32>
    %330 = vector.extract_strided_slice %270 {offsets = [0, 0], sizes = [1, 32], strides = [1, 1]} : vector<32x32xi32> to vector<1x32xi32>
    %331 = tpu.concatenate %329, %330 in 0 : vector<31x32xi32>, vector<1x32xi32> -> vector<32x32xi32>
    %332 = vector.extract_strided_slice %312 {offsets = [1, 0], sizes = [31, 32], strides = [1, 1]} : vector<32x32xi32> to vector<31x32xi32>
    %333 = vector.extract_strided_slice %312 {offsets = [0, 0], sizes = [1, 32], strides = [1, 1]} : vector<32x32xi32> to vector<1x32xi32>
    %334 = tpu.concatenate %332, %333 in 0 : vector<31x32xi32>, vector<1x32xi32> -> vector<32x32xi32>
    %c31_i32_118 = arith.constant 31 : i32
    %335 = vector.broadcast %c31_i32_118 : i32 to vector<32x32xi32>
    %336 = arith.cmpi slt, %271, %335 : vector<32x32xi32>
    %c0_i32_119 = arith.constant 0 : i32
    %337 = vector.broadcast %c0_i32_119 : i32 to vector<32x32xi32>
    %338 = arith.cmpi eq, %312, %337 : vector<32x32xi32>
    %339 = arith.andi %336, %338 : vector<32x32xi1>
    %c0_i32_120 = arith.constant 0 : i32
    %340 = vector.broadcast %c0_i32_120 : i32 to vector<32x32xi32>
    %341 = arith.cmpi eq, %334, %340 : vector<32x32xi32>
    %342 = arith.andi %339, %341 : vector<32x32xi1>
    %343 = arith.cmpi ne, %270, %331 : vector<32x32xi32>
    %344 = arith.andi %342, %343 : vector<32x32xi1>
    %345 = arith.ori %328, %344 : vector<32x32xi1>
    %346 = vector.extract_strided_slice %270 {offsets = [0, 31], sizes = [32, 1], strides = [1, 1]} : vector<32x32xi32> to vector<32x1xi32>
    %347 = vector.extract_strided_slice %270 {offsets = [0, 0], sizes = [32, 31], strides = [1, 1]} : vector<32x32xi32> to vector<32x31xi32>
    %348 = tpu.concatenate %346, %347 in 1 : vector<32x1xi32>, vector<32x31xi32> -> vector<32x32xi32>
    %349 = vector.extract_strided_slice %312 {offsets = [0, 31], sizes = [32, 1], strides = [1, 1]} : vector<32x32xi32> to vector<32x1xi32>
    %350 = vector.extract_strided_slice %312 {offsets = [0, 0], sizes = [32, 31], strides = [1, 1]} : vector<32x32xi32> to vector<32x31xi32>
    %351 = tpu.concatenate %349, %350 in 1 : vector<32x1xi32>, vector<32x31xi32> -> vector<32x32xi32>
    %c1_i32_121 = arith.constant 1 : i32
    %352 = vector.broadcast %c1_i32_121 : i32 to vector<32x32xi32>
    %353 = arith.cmpi sge, %272, %352 : vector<32x32xi32>
    %c0_i32_122 = arith.constant 0 : i32
    %354 = vector.broadcast %c0_i32_122 : i32 to vector<32x32xi32>
    %355 = arith.cmpi eq, %312, %354 : vector<32x32xi32>
    %356 = arith.andi %353, %355 : vector<32x32xi1>
    %c0_i32_123 = arith.constant 0 : i32
    %357 = vector.broadcast %c0_i32_123 : i32 to vector<32x32xi32>
    %358 = arith.cmpi eq, %351, %357 : vector<32x32xi32>
    %359 = arith.andi %356, %358 : vector<32x32xi1>
    %360 = arith.cmpi ne, %270, %348 : vector<32x32xi32>
    %361 = arith.andi %359, %360 : vector<32x32xi1>
    %362 = arith.ori %345, %361 : vector<32x32xi1>
    %363 = vector.extract_strided_slice %270 {offsets = [0, 1], sizes = [32, 31], strides = [1, 1]} : vector<32x32xi32> to vector<32x31xi32>
    %364 = vector.extract_strided_slice %270 {offsets = [0, 0], sizes = [32, 1], strides = [1, 1]} : vector<32x32xi32> to vector<32x1xi32>
    %365 = tpu.concatenate %363, %364 in 1 : vector<32x31xi32>, vector<32x1xi32> -> vector<32x32xi32>
    %366 = vector.extract_strided_slice %312 {offsets = [0, 1], sizes = [32, 31], strides = [1, 1]} : vector<32x32xi32> to vector<32x31xi32>
    %367 = vector.extract_strided_slice %312 {offsets = [0, 0], sizes = [32, 1], strides = [1, 1]} : vector<32x32xi32> to vector<32x1xi32>
    %368 = tpu.concatenate %366, %367 in 1 : vector<32x31xi32>, vector<32x1xi32> -> vector<32x32xi32>
    %c31_i32_124 = arith.constant 31 : i32
    %369 = vector.broadcast %c31_i32_124 : i32 to vector<32x32xi32>
    %370 = arith.cmpi slt, %272, %369 : vector<32x32xi32>
    %c0_i32_125 = arith.constant 0 : i32
    %371 = vector.broadcast %c0_i32_125 : i32 to vector<32x32xi32>
    %372 = arith.cmpi eq, %312, %371 : vector<32x32xi32>
    %373 = arith.andi %370, %372 : vector<32x32xi1>
    %c0_i32_126 = arith.constant 0 : i32
    %374 = vector.broadcast %c0_i32_126 : i32 to vector<32x32xi32>
    %375 = arith.cmpi eq, %368, %374 : vector<32x32xi32>
    %376 = arith.andi %373, %375 : vector<32x32xi1>
    %377 = arith.cmpi ne, %270, %365 : vector<32x32xi32>
    %378 = arith.andi %376, %377 : vector<32x32xi1>
    %379 = arith.ori %362, %378 : vector<32x32xi1>
    %380 = arith.extui %379 : vector<32x32xi1> to vector<32x32xi32>
    %381 = arith.sitofp %380 : vector<32x32xi32> to vector<32x32xf32>
    %382 = arith.truncf %381 : vector<32x32xf32> to vector<32x32xbf16>
    %c0_127 = arith.constant 0 : index
    %c0_128 = arith.constant 0 : index
    %383 = vector.load %arg6[%c0_127, %c0_128] : memref<8x32xbf16, #tpu.memory_space<vmem>>, vector<8x32xbf16>
    %cst_129 = arith.constant dense<0.000000e+00> : vector<8x32xf32>
    %384 = tpu.matmul %383, %382, %cst_129 {dimension_numbers = #tpu.dot_dimension_numbers<[1], [0], [0], [1], [0, 0, 1, 1], [], []>} : vector<8x32xbf16>, vector<32x32xbf16>, vector<8x32xf32> -> vector<8x32xf32>
    %385 = arith.truncf %384 : vector<8x32xf32> to vector<8x32xbf16>
    %c0_130 = arith.constant 0 : index
    %c0_131 = arith.constant 0 : index
    %386 = vector.load %arg7[%c0_130, %c0_131] : memref<32x8xbf16, #tpu.memory_space<vmem>>, vector<32x8xbf16>
    %cst_132 = arith.constant dense<0.000000e+00> : vector<8x8xf32>
    %387 = tpu.matmul %385, %386, %cst_132 {dimension_numbers = #tpu.dot_dimension_numbers<[1], [0], [0], [1], [0, 0, 1, 1], [], []>} : vector<8x32xbf16>, vector<32x8xbf16>, vector<8x8xf32> -> vector<8x8xf32>
    %c0_133 = arith.constant 0 : index
    %c0_134 = arith.constant 0 : index
    %388 = vector.load %arg8[%c0_133, %c0_134] : memref<4x8xbf16, #tpu.memory_space<vmem>>, vector<4x8xbf16>
    %389 = arith.truncf %387 : vector<8x8xf32> to vector<8x8xbf16>
    %cst_135 = arith.constant dense<0.000000e+00> : vector<4x8xf32>
    %390 = tpu.matmul %388, %389, %cst_135 {dimension_numbers = #tpu.dot_dimension_numbers<[1], [0], [0], [1], [0, 0, 1, 1], [], []>} : vector<4x8xbf16>, vector<8x8xbf16>, vector<4x8xf32> -> vector<4x8xf32>
    %391 = arith.truncf %390 : vector<4x8xf32> to vector<4x8xbf16>
    %c0_136 = arith.constant 0 : index
    %c0_137 = arith.constant 0 : index
    %392 = vector.load %arg9[%c0_136, %c0_137] : memref<8x4xbf16, #tpu.memory_space<vmem>>, vector<8x4xbf16>
    %cst_138 = arith.constant dense<0.000000e+00> : vector<4x4xf32>
    %393 = tpu.matmul %391, %392, %cst_138 {dimension_numbers = #tpu.dot_dimension_numbers<[1], [0], [0], [1], [0, 0, 1, 1], [], []>} : vector<4x8xbf16>, vector<8x4xbf16>, vector<4x4xf32> -> vector<4x4xf32>
    %394 = tpu.iota {dimensions = array<i32: 0>} : vector<4x16xi32>
    %395 = vector.broadcast %65 : vector<1x16xi32> to vector<4x16xi32>
    %396 = arith.cmpi eq, %394, %395 : vector<4x16xi32>
    %397 = arith.extui %396 : vector<4x16xi1> to vector<4x16xi32>
    %398 = arith.sitofp %397 : vector<4x16xi32> to vector<4x16xf32>
    %399 = arith.truncf %398 : vector<4x16xf32> to vector<4x16xbf16>
    %400 = arith.truncf %393 : vector<4x4xf32> to vector<4x4xbf16>
    %cst_139 = arith.constant dense<0.000000e+00> : vector<4x16xf32>
    %401 = tpu.matmul %400, %399, %cst_139 {dimension_numbers = #tpu.dot_dimension_numbers<[1], [0], [0], [1], [0, 0, 1, 1], [], []>} : vector<4x4xbf16>, vector<4x16xbf16>, vector<4x16xf32> -> vector<4x16xf32>
    %402 = tpu.iota {dimensions = array<i32: 0>} : vector<4x16xi32>
    %403 = vector.broadcast %64 : vector<1x16xi32> to vector<4x16xi32>
    %404 = arith.cmpi eq, %402, %403 : vector<4x16xi32>
    %405 = arith.extui %404 : vector<4x16xi1> to vector<4x16xi32>
    %406 = arith.sitofp %405 : vector<4x16xi32> to vector<4x16xf32>
    %407 = arith.mulf %406, %401 : vector<4x16xf32>
    %cst_140 = arith.constant dense<0.000000e+00> : vector<16xf32>
    %408 = vector.multi_reduction <add>, %407, %cst_140 [0] : vector<4x16xf32> to vector<16xf32>
    %409 = vector.shape_cast %408 : vector<16xf32> to vector<1x16xf32>
    %410 = vector.shape_cast %409 : vector<1x16xf32> to vector<1x1x16xf32>
    %cst_141 = arith.constant dense<0.000000e+00> : vector<1xf32>
    %411 = vector.multi_reduction <add>, %410, %cst_141 [1, 2] : vector<1x1x16xf32> to vector<1xf32>
    %412 = vector.shape_cast %411 : vector<1xf32> to vector<1x1x1xf32>
    %413 = vector.extract %412[0, 0, 0] : f32 from vector<1x1x1xf32>
    %cst_142 = arith.constant 1.600000e+01 : f32
    %414 = arith.divf %413, %cst_142 : f32
    %415 = vector.broadcast %414 : f32 to vector<1x16xf32>
    %416 = arith.subf %409, %415 : vector<1x16xf32>
    %417 = arith.mulf %416, %416 : vector<1x16xf32>
    %418 = vector.shape_cast %417 : vector<1x16xf32> to vector<1x1x16xf32>
    %cst_143 = arith.constant dense<0.000000e+00> : vector<1xf32>
    %419 = vector.multi_reduction <add>, %418, %cst_143 [1, 2] : vector<1x1x16xf32> to vector<1xf32>
    %420 = vector.shape_cast %419 : vector<1xf32> to vector<1x1x1xf32>
    %421 = vector.extract %420[0, 0, 0] : f32 from vector<1x1x1xf32>
    %cst_144 = arith.constant 1.500000e+01 : f32
    %422 = arith.divf %421, %cst_144 : f32
    %423 = vector.broadcast %414 : f32 to vector<1x16xf32>
    %424 = arith.subf %409, %423 : vector<1x16xf32>
    %cst_145 = arith.constant 9.99999997E-7 : f32
    %425 = arith.addf %422, %cst_145 : f32
    %426 = math.rsqrt %425 : f32
    %427 = vector.broadcast %426 : f32 to vector<1x16xf32>
    %428 = arith.mulf %424, %427 : vector<1x16xf32>
    %429 = vector.extract_strided_slice %66 {offsets = [1, 0], sizes = [1, 16], strides = [1, 1]} : vector<2x16xi32> to vector<1x16xi32>
    %430 = vector.extract_strided_slice %67 {offsets = [1, 0], sizes = [1, 16], strides = [1, 1]} : vector<2x16xi32> to vector<1x16xi32>
    %431 = tpu.iota {dimensions = array<i32: 0>} : vector<8x16xi32>
    %432 = vector.broadcast %430 : vector<1x16xi32> to vector<8x16xi32>
    %433 = arith.cmpi eq, %431, %432 : vector<8x16xi32>
    %434 = arith.extui %433 : vector<8x16xi1> to vector<8x16xi32>
    %435 = arith.sitofp %434 : vector<8x16xi32> to vector<8x16xf32>
    %436 = arith.truncf %435 : vector<8x16xf32> to vector<8x16xbf16>
    %437 = arith.truncf %387 : vector<8x8xf32> to vector<8x8xbf16>
    %cst_146 = arith.constant dense<0.000000e+00> : vector<8x16xf32>
    %438 = tpu.matmul %437, %436, %cst_146 {dimension_numbers = #tpu.dot_dimension_numbers<[1], [0], [0], [1], [0, 0, 1, 1], [], []>} : vector<8x8xbf16>, vector<8x16xbf16>, vector<8x16xf32> -> vector<8x16xf32>
    %439 = tpu.iota {dimensions = array<i32: 0>} : vector<8x16xi32>
    %440 = vector.broadcast %429 : vector<1x16xi32> to vector<8x16xi32>
    %441 = arith.cmpi eq, %439, %440 : vector<8x16xi32>
    %442 = arith.extui %441 : vector<8x16xi1> to vector<8x16xi32>
    %443 = arith.sitofp %442 : vector<8x16xi32> to vector<8x16xf32>
    %444 = arith.mulf %443, %438 : vector<8x16xf32>
    %cst_147 = arith.constant dense<0.000000e+00> : vector<16xf32>
    %445 = vector.multi_reduction <add>, %444, %cst_147 [0] : vector<8x16xf32> to vector<16xf32>
    %446 = vector.shape_cast %445 : vector<16xf32> to vector<1x16xf32>
    %447 = vector.shape_cast %446 : vector<1x16xf32> to vector<1x1x16xf32>
    %cst_148 = arith.constant dense<0.000000e+00> : vector<1xf32>
    %448 = vector.multi_reduction <add>, %447, %cst_148 [1, 2] : vector<1x1x16xf32> to vector<1xf32>
    %449 = vector.shape_cast %448 : vector<1xf32> to vector<1x1x1xf32>
    %450 = vector.extract %449[0, 0, 0] : f32 from vector<1x1x1xf32>
    %cst_149 = arith.constant 1.600000e+01 : f32
    %451 = arith.divf %450, %cst_149 : f32
    %452 = vector.broadcast %451 : f32 to vector<1x16xf32>
    %453 = arith.subf %446, %452 : vector<1x16xf32>
    %454 = arith.mulf %453, %453 : vector<1x16xf32>
    %455 = vector.shape_cast %454 : vector<1x16xf32> to vector<1x1x16xf32>
    %cst_150 = arith.constant dense<0.000000e+00> : vector<1xf32>
    %456 = vector.multi_reduction <add>, %455, %cst_150 [1, 2] : vector<1x1x16xf32> to vector<1xf32>
    %457 = vector.shape_cast %456 : vector<1xf32> to vector<1x1x1xf32>
    %458 = vector.extract %457[0, 0, 0] : f32 from vector<1x1x1xf32>
    %cst_151 = arith.constant 1.500000e+01 : f32
    %459 = arith.divf %458, %cst_151 : f32
    %460 = vector.broadcast %451 : f32 to vector<1x16xf32>
    %461 = arith.subf %446, %460 : vector<1x16xf32>
    %cst_152 = arith.constant 9.99999997E-7 : f32
    %462 = arith.addf %459, %cst_152 : f32
    %463 = math.rsqrt %462 : f32
    %464 = vector.broadcast %463 : f32 to vector<1x16xf32>
    %465 = arith.mulf %461, %464 : vector<1x16xf32>
    %466 = tpu.concatenate %63, %229, %428, %266, %465 in 1 : vector<1x32xf32>, vector<1x16xf32>, vector<1x16xf32>, vector<1x16xf32>, vector<1x16xf32> -> vector<1x96xf32>
    %c0_153 = arith.constant 0 : index
    %c0_154 = arith.constant 0 : index
    %467 = vector.load %arg31[%c0_153, %c0_154] : memref<1x96xf32, #tpu.memory_space<vmem>>, vector<1x96xf32>
    tpu.vector_store %arg31[%c0_153, %c0_154], %466 {strides = array<i32>} : memref<1x96xf32, #tpu.memory_space<vmem>>, vector<1x96xf32>,
    return
  }
  func.func @transform_0(%arg0: i32) -> i32 {
    %c0_i32 = arith.constant 0 : i32
    %c0_i32_0 = arith.constant 0 : i32
    return %c0_i32 : i32
  }
  func.func @transform_1(%arg0: i32) -> (i32, i32) {
    %c0_i32 = arith.constant 0 : i32
    %c0_i32_0 = arith.constant 0 : i32
    %c0_i32_1 = arith.constant 0 : i32
    return %c0_i32, %c0_i32_0 : i32, i32
  }
  func.func @transform_2(%arg0: i32) -> (i32, i32) {
    %c0_i32 = arith.constant 0 : i32
    %c0_i32_0 = arith.constant 0 : i32
    %c0_i32_1 = arith.constant 0 : i32
    return %c0_i32, %c0_i32_0 : i32, i32
  }
  func.func @transform_3(%arg0: i32) -> (i32, i32) {
    %c0_i32 = arith.constant 0 : i32
    %c0_i32_0 = arith.constant 0 : i32
    %c0_i32_1 = arith.constant 0 : i32
    return %c0_i32, %c0_i32_0 : i32, i32
  }
  func.func @transform_4(%arg0: i32) -> (i32, i32, i32) {
    %c0_i32 = arith.constant 0 : i32
    %c0_i32_0 = arith.constant 0 : i32
    %c0_i32_1 = arith.constant 0 : i32
    %c0_i32_2 = arith.constant 0 : i32
    return %c0_i32, %c0_i32_0, %c0_i32_1 : i32, i32, i32
  }
  func.func @transform_5(%arg0: i32) -> (i32, i32) {
    %c0_i32 = arith.constant 0 : i32
    %c0_i32_0 = arith.constant 0 : i32
    %c0_i32_1 = arith.constant 0 : i32
    return %c0_i32, %c0_i32_0 : i32, i32
  }
  func.func @transform_6(%arg0: i32) -> (i32, i32) {
    %c0_i32 = arith.constant 0 : i32
    %c0_i32_0 = arith.constant 0 : i32
    %c0_i32_1 = arith.constant 0 : i32
    return %c0_i32, %c0_i32_0 : i32, i32
  }
  func.func @transform_7(%arg0: i32) -> (i32, i32) {
    %c0_i32 = arith.constant 0 : i32
    %c0_i32_0 = arith.constant 0 : i32
    %c0_i32_1 = arith.constant 0 : i32
    return %c0_i32, %c0_i32_0 : i32, i32
  }
  func.func @transform_8(%arg0: i32) -> (i32, i32) {
    %c0_i32 = arith.constant 0 : i32
    %c0_i32_0 = arith.constant 0 : i32
    %c0_i32_1 = arith.constant 0 : i32
    return %c0_i32, %c0_i32_0 : i32, i32
  }
  func.func @transform_9(%arg0: i32) -> (i32, i32) {
    %c0_i32 = arith.constant 0 : i32
    %c0_i32_0 = arith.constant 0 : i32
    %c0_i32_1 = arith.constant 0 : i32
    return %c0_i32, %c0_i32_0 : i32, i32
  }
  func.func @transform_10(%arg0: i32) -> (i32, i32) {
    %c0_i32 = arith.constant 0 : i32
    %c0_i32_0 = arith.constant 0 : i32
    %c0_i32_1 = arith.constant 0 : i32
    return %c0_i32, %c0_i32_0 : i32, i32
  }
  func.func @transform_11(%arg0: i32) -> (i32, i32) {
    %c0_i32 = arith.constant 0 : i32
    %c0_i32_0 = arith.constant 0 : i32
    %c0_i32_1 = arith.constant 0 : i32
    return %c0_i32, %c0_i32_0 : i32, i32
  }
  func.func @transform_12(%arg0: i32) -> (i32, i32) {
    %c0_i32 = arith.constant 0 : i32
    %c0_i32_0 = arith.constant 0 : i32
    %c0_i32_1 = arith.constant 0 : i32
    return %c0_i32, %c0_i32_0 : i32, i32
  }
  func.func @transform_13(%arg0: i32) -> (i32, i32) {
    %c0_i32 = arith.constant 0 : i32
    %c0_i32_0 = arith.constant 0 : i32
    %c0_i32_1 = arith.constant 0 : i32
    return %c0_i32, %c0_i32_0 : i32, i32
  }
  func.func @transform_14(%arg0: i32) -> (i32, i32) {
    %c0_i32 = arith.constant 0 : i32
    %c0_i32_0 = arith.constant 0 : i32
    %c0_i32_1 = arith.constant 0 : i32
    return %c0_i32, %c0_i32_0 : i32, i32
  }
  func.func @transform_15(%arg0: i32) -> (i32, i32) {
    %c0_i32 = arith.constant 0 : i32
    %c0_i32_0 = arith.constant 0 : i32
    %c0_i32_1 = arith.constant 0 : i32
    return %c0_i32, %c0_i32_0 : i32, i32
  }
  func.func @transform_16(%arg0: i32) -> (i32, i32) {
    %c0_i32 = arith.constant 0 : i32
    %c0_i32_0 = arith.constant 0 : i32
    %c0_i32_1 = arith.constant 0 : i32
    return %c0_i32, %c0_i32_0 : i32, i32
  }
  func.func @transform_17(%arg0: i32) -> (i32, i32) {
    %c0_i32 = arith.constant 0 : i32
    %c0_i32_0 = arith.constant 0 : i32
    %c0_i32_1 = arith.constant 0 : i32
    return %c0_i32, %c0_i32_0 : i32, i32
  }
  func.func @transform_18(%arg0: i32) -> (i32, i32) {
    %c0_i32 = arith.constant 0 : i32
    %c0_i32_0 = arith.constant 0 : i32
    %c0_i32_1 = arith.constant 0 : i32
    return %c0_i32, %c0_i32_0 : i32, i32
  }
  func.func @transform_19(%arg0: i32) -> (i32, i32) {
    %c0_i32 = arith.constant 0 : i32
    %c0_i32_0 = arith.constant 0 : i32
    %c0_i32_1 = arith.constant 0 : i32
    return %c0_i32, %c0_i32_0 : i32, i32
  }
  func.func @transform_20(%arg0: i32) -> (i32, i32) {
    %c0_i32 = arith.constant 0 : i32
    %c0_i32_0 = arith.constant 0 : i32
    %c0_i32_1 = arith.constant 0 : i32
    return %c0_i32, %c0_i32_0 : i32, i32
  }
  func.func @transform_21(%arg0: i32) -> (i32, i32) {
    %c0_i32 = arith.constant 0 : i32
    %c0_i32_0 = arith.constant 0 : i32
    %c0_i32_1 = arith.constant 0 : i32
    return %c0_i32, %c0_i32_0 : i32, i32
  }
  func.func @transform_22(%arg0: i32) -> (i32, i32) {
    %c0_i32 = arith.constant 0 : i32
    %c0_i32_0 = arith.constant 0 : i32
    %c0_i32_1 = arith.constant 0 : i32
    return %c0_i32, %c0_i32_0 : i32, i32
  }
  func.func @transform_23(%arg0: i32) -> (i32, i32) {
    %c0_i32 = arith.constant 0 : i32
    %c0_i32_0 = arith.constant 0 : i32
    %c0_i32_1 = arith.constant 0 : i32
    return %c0_i32, %c0_i32_0 : i32, i32
  }
  func.func @transform_24(%arg0: i32) -> (i32, i32) {
    %c0_i32 = arith.constant 0 : i32
    %c0_i32_0 = arith.constant 0 : i32
    %c0_i32_1 = arith.constant 0 : i32
    return %c0_i32, %c0_i32_0 : i32, i32
  }
  func.func @transform_25(%arg0: i32) -> (i32, i32) {
    %c0_i32 = arith.constant 0 : i32
    %c0_i32_0 = arith.constant 0 : i32
    %c0_i32_1 = arith.constant 0 : i32
    return %c0_i32, %c0_i32_0 : i32, i32
  }
  func.func @transform_26(%arg0: i32) -> (i32, i32) {
    %c0_i32 = arith.constant 0 : i32
    %c0_i32_0 = arith.constant 0 : i32
    %c0_i32_1 = arith.constant 0 : i32
    return %c0_i32, %c0_i32_0 : i32, i32
  }
  func.func @transform_27(%arg0: i32) -> (i32, i32) {
    %c0_i32 = arith.constant 0 : i32
    %c0_i32_0 = arith.constant 0 : i32
    %c0_i32_1 = arith.constant 0 : i32
    return %c0_i32, %c0_i32_0 : i32, i32
  }
  func.func @transform_28(%arg0: i32) -> (i32, i32) {
    %c0_i32 = arith.constant 0 : i32
    %c0_i32_0 = arith.constant 0 : i32
    %c0_i32_1 = arith.constant 0 : i32
    return %c0_i32, %c0_i32_0 : i32, i32
  }
  func.func @transform_29(%arg0: i32) -> (i32, i32) {
    %c0_i32 = arith.constant 0 : i32
    %c0_i32_0 = arith.constant 0 : i32
    %c0_i32_1 = arith.constant 0 : i32
    return %c0_i32, %c0_i32_0 : i32, i32
  }
  func.func @transform_30(%arg0: i32) -> (i32, i32) {
    %c0_i32 = arith.constant 0 : i32
    %c0_i32_0 = arith.constant 0 : i32
    %c0_i32_1 = arith.constant 0 : i32
    return %c0_i32, %c0_i32_0 : i32, i32
  }
}

</mosaic_0001>

<bundles_post_ra>
// kernel: squeeze.7
= control target key start
LH: loop header
LB: loop body
LE: loop exit
PB: predicated region body
PF: predicated region fallthrough
CT: control target
= control target key end

     0   :  { %s80_s0 = inlined_call_operand.vmem [shape: f32[32], index: 0, kind: input, shape index: {}]   ;;  %s81_s1 = inlined_call_operand.hbm [shape: f32[2,16], index: 1, kind: output, shape index: {}]  }
   0x1   :  { %v5_v0 = vld [vmem:[%s80_s0] sm:$0x1] }
   0x2   :  { %2 = vsyncpa [#allocation1], 0  ;;  %6 = vst [vmem:[#allocation3] sm:$0x1] %v5_v0  ;;  %vm8_vm0 = vcmask 130048   ;;  %s62_s0 = smov 112  }
   0x3   :  { %s63_s8 = smov [#allocation0]   ;;  %s27_s1 = sshll.u32 %s81_s1, 4  ;;  %s28_s1 = int_to_ptr.hbm [resolvable:$true] %s27_s1 }
   0x4   :  { %s25_s9 = sshll.u32 %s63_s8, 4  ;;  %s26_s9 = int_to_ptr.vmem [resolvable:$true] %s25_s9 }
   0x9   :  { %v10_v1 = vld [vmem:[#allocation3] sm:$0x1]  }
   0xa   :  { %v7_v2 = vld [vmem:[#allocation3] sm:$0x1]   ;;  %11 = vrot.lane.b32.xlu0 %v10_v1, %s62_s0 }
   0xb   :  { %9 = vst.msk [vmem:[#allocation2] sm:$0x1] %vm8_vm0, %v7_v2  }
  0x7c   :  { %v12_v3 = vpop.permute.xlu0 %11  }
  0x7d   :  { %15 = vst.msk [vmem:[#allocation2 + $0x1] sm:$0x1] %vm8_vm0, %v12_v3  }
  0x84   :  { %v18_v4 = vld [vmem:[#allocation2] sm:$0x3] }
  0x85   :  { %21 = vst [vmem:[#allocation0] sm:$0x3] %v18_v4 }
  0x86   :  { %30 = dma.vmem_to_hbm [thread:$0]  %s26_s9, 32, %s28_s1, [#allocation1]  }
  0x87   :  { %60 = dma.done.wait [#allocation1], 32  }
  0x88   :  { %61 = vsyncadd [#allocation1], 4294967264 }
  0x89   :  { %33 = vsyncpa [#allocation1], 1 }

// kernel: forward.1
= control target key start
LH: loop header
LB: loop body
LE: loop exit
PB: predicated region body
PF: predicated region fallthrough
CT: control target
= control target key end

     0   :  { %s2510_s6 = smov 1   ;;  %s2511_s10 = smov 2   ;;  %s4267_s0 = inlined_call_operand.smem [shape: u32[31], index: -1, kind: input, shape index: {}] }
   0x1   :  { %s2562_s5 = sld [smem:[%s4267_s0]]   ;;  %s2512_s14 = smov 3  }
   0x2   :  { %s2567_s9 = sld [smem:[%s4267_s0 + %s2510_s6]]   ;;  %s2513_s18 = smov 4  }
   0x3   :  { %s2572_s13 = sld [smem:[%s4267_s0 + %s2511_s10]]   ;;  %s2514_s22 = smov 5  }
   0x4   :  { %s2577_s17 = sld [smem:[%s4267_s0 + %s2512_s14]]   ;;  %s2515_s26 = smov 6  }
   0x5   :  { %s2582_s21 = sld [smem:[%s4267_s0 + %s2513_s18]]   ;;  %s2516_s30 = smov 7  }
   0x6   :  { %s2587_s25 = sld [smem:[%s4267_s0 + %s2514_s22]]   ;;  %s2517_s4 = smov 8  }
   0x7   :  { %s2592_s29 = sld [smem:[%s4267_s0 + %s2515_s26]]   ;;  %s2518_s10 = smov 9  }
   0x8   :  { %s2597_s3 = sld [smem:[%s4267_s0 + %s2516_s30]]   ;;  %s2519_s15 = smov 10  }
   0x9   :  { %s2602_s8 = sld [smem:[%s4267_s0 + %s2517_s4]]   ;;  %s2520_s20 = smov 11  }
   0xa   :  { %4299 = sst [smem:[#allocation6_spill]] %s2577_s17  ;;  %s2521_s26 = smov 12  }
   0xb   :  { %s2607_s14 = sld [smem:[%s4267_s0 + %s2518_s10]]   ;;  %s2522_s1 = smov 13  }
   0xc   :  { %4300 = sst [smem:[#allocation7_spill]] %s2587_s25  ;;  %s2523_s7 = smov 14  }
   0xd   :  { %s2612_s19 = sld [smem:[%s4267_s0 + %s2519_s15]]   ;;  %s2524_s15 = smov 15  }
   0xe   :  { %4301 = sst [smem:[#allocation8_spill]] %s2597_s3  ;;  %s2525_s22 = smov 16  }
   0xf   :  { %4302 = sst [smem:[#allocation9_spill]] %s2602_s8  ;;  %s2526_s28 = smov 17  }
  0x10   :  { %s2617_s24 = sld [smem:[%s4267_s0 + %s2520_s20]]   ;;  %s2531_s10 = smov 22  }
  0x11   :  { %4303 = sst [smem:[#allocation10_spill]] %s2607_s14  ;;  %s2532_s16 = smov 23  }
  0x12   :  { %s2622_s30 = sld [smem:[%s4267_s0 + %s2521_s26]]   ;;  %s2533_s23 = smov 24  }
  0x13   :  { %4304 = sst [smem:[#allocation11_spill]] %s2612_s19 }
  0x14   :  { %s2627_s6 = sld [smem:[%s4267_s0 + %s2522_s1]]   ;;  %s2530_s1 = smov 21  }
  0x15   :  { %s2632_s12 = sld [smem:[%s4267_s0 + %s2523_s7]]   ;;  %s2527_s7 = smov 18  }
  0x16   :  { %4305 = sst [smem:[#allocation12_spill]] %s2617_s24 }
  0x17   :  { %s2637_s20 = sld [smem:[%s4267_s0 + %s2524_s15]]   ;;  %s2528_s15 = smov 19  }
  0x18   :  { %4306 = sst [smem:[#allocation13_spill]] %s2622_s30 }
  0x19   :  { %s2642_s27 = sld [smem:[%s4267_s0 + %s2525_s22]]   ;;  %s2529_s22 = smov 20  }
  0x1a   :  { %s2647_s4 = sld [smem:[%s4267_s0 + %s2526_s28]]   ;;  %s2538_s28 = smov 29  }
  0x1b   :  { %s2652_s17 = sld [smem:[%s4267_s0 + %s2527_s7]]  }
  0x1c   :  { %s2657_s14 = sld [smem:[%s4267_s0 + %s2528_s15]]  }
  0x1d   :  { %s2268_s19 = sld [smem:[%s4267_s0 + %s2529_s22]]  }
  0x1e   :  { %s2665_s24 = sld [smem:[%s4267_s0 + %s2530_s1]]   ;;  %s2534_s1 = smov 25  }
  0x1f   :  { %s2670_s8 = sld [smem:[%s4267_s0 + %s2531_s10]]   ;;  %s2535_s10 = smov 26  }
  0x20   :  { %s2675_s3 = sld [smem:[%s4267_s0 + %s2532_s16]]   ;;  %s2536_s16 = smov 27  }
  0x21   :  { %s2680_s30 = sld [smem:[%s4267_s0 + %s2533_s23]]   ;;  %s2537_s23 = smov 28  }
  0x22   :  { %4307 = sst [smem:[#allocation14_spill]] %s2657_s14 }
  0x23   :  { %s2685_s25 = sld [smem:[%s4267_s0 + %s2534_s1]]   ;;  %v67_v0 = vstv %s2268_s19  ;;  %s2539_s19 = smov 30  }
  0x24   :  { %s2690_s14 = sld [smem:[%s4267_s0 + %s2535_s10]]   ;;  %68 = vst [vmem:[#allocation2] sm:$0x1] %v67_v0 }
  0x25   :  { %s2695_s22 = sld [smem:[%s4267_s0 + %s2536_s16]]  }
  0x26   :  { %s2700_s1 = sld [smem:[%s4267_s0 + %s2537_s23]]  }
  0x27   :  { %4308 = sst [smem:[#allocation15_spill]] %s2680_s30 }
  0x28   :  { %s2705_s10 = sld [smem:[%s4267_s0 + %s2538_s28]]  }
  0x29   :  { %4309 = sst [smem:[#allocation16_spill]] %s2685_s25 }
  0x2a   :  { %s2710_s15 = sld [smem:[%s4267_s0 + %s2539_s19]]  }
  0x2b   :  { %69 = vsyncpa [#allocation4], 0  ;;  %s75_s16 = sshll.u32 %s2562_s5, 4  ;;  %s2500_s23 = scalar_lea.vmem %s2562_s5, 1  ;;  %s76_s16 = int_to_ptr.vmem [resolvable:$true] %s75_s16 }
  0x2c   :  { %s2496_s30 = sshra.s32 %s76_s16, 4  ;;  %s2497_s30 = int_to_ptr.vmem [resolvable:$true] %s2496_s30 }
  0x2d   :  { %s2498_s18 = scalar_lea.vmem %s2497_s30, 1  ;;  %p2501_p1 = scmp.lt.s32.totalorder %s2497_s30, %s2562_s5 }
  0x2e   :  { %p2499_p0 = scmp.ne.s32.totalorder %s2497_s30, %s2498_s18  ;;  %p2502_p2 = scmp.lt.s32.totalorder %s2500_s23, %s2498_s18 }
  0x30   :  { %p2503_p3 = por %p2502_p2, %p2501_p1 }
  0x32   :  { %p2504_p4 = pnand %p2503_p3, %p2499_p0 }
  0x34   :  { %2507 = shalt.err (!%p2504_p4)
}
  0x35   :  { %s2540_s25 = smov [#allocation3]  }
  0x36   :  { %78 = dma.vmem_to_smem %s76_s16, 16, %s2540_s25, [#allocation4]  }
  0x37   :  { %2508 = dma.done.wait [#allocation4], 16  }
  0x38   :  { %2509 = vsyncadd [#allocation4], 4294967280 }
  0x39   :  { %135 = sfence }
  0x3a   :  { %v160_v1 = vld [vmem:[%s2627_s6 + $0x78] sm:$0xff]  ;;  %v159_v2 = vld [vmem:[%s2627_s6 + $0x70] sm:$0xff]  ;;  %v158_v3 = vld [vmem:[%s2627_s6 + $0x68] sm:$0xff]  ;;  %vm4269_vm0 = vcmask 523264   ;;  %vm4274_vm1 = vcmask 261120   ;;  %s2792_s0 = sld [smem:[#allocation3 + $0x1]] }
  0x3b   :  { %186 = vmatpush.msra.mxu0 %v160_v1  ;;  %v157_v4 = vld [vmem:[%s2627_s6 + $0x60] sm:$0xff]  ;;  %v168_v5 = vld [vmem:[%s2627_s6 + $0xb8] sm:$0xff]  ;;  %v167_v7 = vld [vmem:[%s2627_s6 + $0xb0] sm:$0xff]  ;;  %s1067_s5 = sld [smem:[#allocation3]]  ;;  %s2545_s26 = smov 31  }
  0x3c   :  { %v156_v6 = vld [vmem:[%s2627_s6 + $0x58] sm:$0xff]  ;;  %2359 = vmatpush.msra.mxu1 %v168_v5  ;;  %v166_v8 = vld [vmem:[%s2627_s6 + $0xa8] sm:$0xff]  ;;  %v155_v9 = vld [vmem:[%s2627_s6 + $0x50] sm:$0xff]  ;;  %s4390_s7 = sld [smem:[#allocation8_spill]] }
  0x3d   :  { %187 = vmatpush.msra.mxu0 %v159_v2  ;;  %v154_v10 = vld [vmem:[%s2627_s6 + $0x48] sm:$0xff]  ;;  %v165_v11 = vld [vmem:[%s2627_s6 + $0xa0] sm:$0xff]  ;;  %v164_v12 = vld [vmem:[%s2627_s6 + $0x98] sm:$0xff]  ;;  %s4396_s11 = sld [smem:[#allocation9_spill]] }
  0x3e   :  { %2360 = vmatpush.msra.mxu1 %v167_v7  ;;  %v153_v13 = vld [vmem:[%s2627_s6 + $0x40] sm:$0xff]  ;;  %v163_v14 = vld [vmem:[%s2627_s6 + $0x90] sm:$0xff]  ;;  %v152_v15 = vld [vmem:[%s2627_s6 + $0x38] sm:$0xff]  ;;  %s4478_s16 = sld [smem:[#allocation11_spill]] }
  0x3f   :  { %188 = vmatpush.msra.mxu0 %v158_v3  ;;  %v162_v16 = vld [vmem:[%s2627_s6 + $0x88] sm:$0xff]  ;;  %v151_v17 = vld [vmem:[%s2627_s6 + $0x30] sm:$0xff]  ;;  %v161_v18 = vld [vmem:[%s2627_s6 + $0x80] sm:$0xff]  ;;  %s4484_s30 = sld [smem:[#allocation10_spill]] }
  0x40   :  { %2361 = vmatpush.msra.mxu1 %v166_v8  ;;  %v150_v19 = vld [vmem:[%s2627_s6 + $0x28] sm:$0xff]  ;;  %v149_v21 = vld [vmem:[%s2627_s6 + $0x20] sm:$0xff]  ;;  %v148_v22 = vld [vmem:[%s2627_s6 + $0x18] sm:$0xff] }
  0x41   :  { %189 = vmatpush.msra.mxu0 %v157_v4  ;;  %v142_v20 = vld [vmem:[%s2567_s9 + $0x28] sm:$0xff]  ;;  %v147_v23 = vld [vmem:[%s2627_s6 + $0x10] sm:$0xff]  ;;  %v144_v25 = vld [vmem:[%s2567_s9 + $0x38] sm:$0xff] }
  0x42   :  { %2362 = vmatpush.msra.mxu1 %v165_v11  ;;  %v146_v24 = vld [vmem:[%s2627_s6 + $0x8] sm:$0xff]  ;;  %v145_v26 = vld [vmem:[%s2627_s6] sm:$0xff]  ;;  %v139_v28 = vld [vmem:[%s2567_s9 + $0x10] sm:$0xff]  ;;  %s2541_s6 = smov 1  }
  0x43   :  { %190 = vmatpush.msra.mxu0 %v156_v6  ;;  %v137_v27 = vld [vmem:[%s2567_s9] sm:$0xff]  ;;  %v272_v29 = vld [vmem:[%s2665_s24 + $0x78] sm:$0xff]  ;;  %v271_v30 = vld [vmem:[%s2665_s24 + $0x70] sm:$0xff] }
  0x44   :  { %2363 = vmatpush.msra.mxu1 %v164_v12  ;;  %297 = vmatpush.msra.mxu2 %v272_v29  ;;  %v270_v31 = vld [vmem:[%s2665_s24 + $0x68] sm:$0xff]  ;;  %v280_v32 = vld [vmem:[%s2665_s24 + $0xb8] sm:$0xff]  ;;  %v269_v33 = vld [vmem:[%s2665_s24 + $0x60] sm:$0xff] }
  0x45   :  { %191 = vmatpush.msra.mxu0 %v155_v9  ;;  %334 = vmatpush.msra.mxu3 %v280_v32  ;;  %v279_v34 = vld [vmem:[%s2665_s24 + $0xb0] sm:$0xff]  ;;  %v141_v35 = vld [vmem:[%s2567_s9 + $0x20] sm:$0xff]  ;;  %v278_v36 = vld [vmem:[%s2665_s24 + $0xa8] sm:$0xff] }
  0x46   :  { %2364 = vmatpush.msra.mxu1 %v163_v14  ;;  %298 = vmatpush.msra.mxu2 %v271_v30  ;;  %v268_v37 = vld [vmem:[%s2665_s24 + $0x58] sm:$0xff]  ;;  %v277_v38 = vld [vmem:[%s2665_s24 + $0xa0] sm:$0xff]  ;;  %v267_v39 = vld [vmem:[%s2665_s24 + $0x50] sm:$0xff] }
  0x47   :  { %192 = vmatpush.msra.mxu0 %v154_v10  ;;  %335 = vmatpush.msra.mxu3 %v279_v34  ;;  %v276_v40 = vld [vmem:[%s2665_s24 + $0x98] sm:$0xff]  ;;  %v266_v41 = vld [vmem:[%s2665_s24 + $0x48] sm:$0xff]  ;;  %v275_v42 = vld [vmem:[%s2665_s24 + $0x90] sm:$0xff] }
  0x48   :  { %2365 = vmatpush.msra.mxu1 %v162_v16  ;;  %299 = vmatpush.msra.mxu2 %v270_v31  ;;  %v265_v43 = vld [vmem:[%s2665_s24 + $0x40] sm:$0xff]  ;;  %v143_v44 = vld [vmem:[%s2567_s9 + $0x30] sm:$0xff]  ;;  %v264_v45 = vld [vmem:[%s2665_s24 + $0x38] sm:$0xff] }
  0x49   :  { %193 = vmatpush.msra.mxu0 %v153_v13  ;;  %336 = vmatpush.msra.mxu3 %v278_v36  ;;  %v263_v46 = vld [vmem:[%s2665_s24 + $0x30] sm:$0xff]  ;;  %v262_v47 = vld [vmem:[%s2665_s24 + $0x28] sm:$0xff]  ;;  %v261_v48 = vld [vmem:[%s2665_s24 + $0x20] sm:$0xff] }
  0x4a   :  { %2366 = vmatpush.msra.mxu1 %v161_v18  ;;  %300 = vmatpush.msra.mxu2 %v269_v33  ;;  %v138_v49 = vld [vmem:[%s2567_s9 + $0x8] sm:$0xff]  ;;  %v260_v50 = vld [vmem:[%s2665_s24 + $0x18] sm:$0xff]  ;;  %v259_v51 = vld [vmem:[%s2665_s24 + $0x10] sm:$0xff] }
  0x4b   :  { %194 = vmatpush.msra.mxu0 %v152_v15  ;;  %2281 = vmatmul.msk.f32.vlgmr.msra.gmra.mxu1 %vm4269_vm0, %v142_v20  ;;  %v258_v52 = vld [vmem:[%s2665_s24 + $0x8] sm:$0xff]  ;;  %v140_v53 = vld [vmem:[%s2567_s9 + $0x18] sm:$0xff]  ;;  %v257_v54 = vld [vmem:[%s2665_s24] sm:$0xff]  ;;  %s1081_s9 = ssub.s32 32, %s2792_s0 }
  0x4c   :  { %301 = vmatpush.msra.mxu2 %v268_v37  ;;  %337 = vmatpush.msra.mxu3 %v277_v38  ;;  %v274_v55 = vld [vmem:[%s2665_s24 + $0x88] sm:$0xff]  ;;  %v249_v56 = vld [vmem:[%s2572_s13] sm:$0xff]  ;;  %v251_v59 = vld [vmem:[%s2572_s13 + $0x10] sm:$0xff] }
  0x4d   :  { %195 = vmatpush.msra.mxu0 %v151_v17  ;;  %v273_v57 = vld [vmem:[%s2665_s24 + $0x80] sm:$0xff]  ;;  %v250_v58 = vld [vmem:[%s2572_s13 + $0x8] sm:$0xff]  ;;  %v252_v60 = vld [vmem:[%s2572_s13 + $0x18] sm:$0xff]  ;;  %s1096_s24 = ssub.s32 27, %s1067_s5 }
  0x4e   :  { %302 = vmatpush.msra.mxu2 %v267_v39  ;;  %338 = vmatpush.msra.mxu3 %v276_v40  ;;  %v253_v61 = vld [vmem:[%s2572_s13 + $0x20] sm:$0xff]  ;;  %v254_v62 = vld [vmem:[%s2572_s13 + $0x28] sm:$0xff]  ;;  %v917_v63 = vld [vmem:[%s2637_s20 + $0x18] sm:$0xff] }
  0x4f   :  { %196 = vmatpush.msra.mxu0 %v150_v19  ;;  %v255_v0 = vld [vmem:[%s2572_s13 + $0x30] sm:$0xff]  ;;  %v256_v1 = vld [vmem:[%s2572_s13 + $0x38] sm:$0xff]  ;;  %v915_v3 = vld [vmem:[%s2637_s20 + $0x8] sm:$0xff]  ;;  %s1080_s13 = ssub.s32 32, %s1067_s5 }
  0x50   :  { %303 = vmatpush.msra.mxu2 %v266_v41  ;;  %339 = vmatpush.msra.mxu3 %v275_v42  ;;  %v916_v2 = vld [vmem:[%s2637_s20 + $0x10] sm:$0xff]  ;;  %v2806_v17 = vld [vmem:[%s2582_s21 + $0x18] sm:$0xff]  ;;  %v2937_v37 = vld [vmem:[%s2582_s21] sm:$0xff] }
  0x51   :  { %197 = vmatpush.msra.mxu0 %v149_v21  ;;  %1263 = vrot.lane.b32.xlu1 %v2806_v17, %s2541_s6  ;;  %v1090_v21 = vstv %s1081_s9  ;;  %v2442_v39 = vld [vmem:[%s2670_s8] ss:$0 sm:$0xff]  ;;  %v970_v41 = vld [vmem:[%s2647_s4 + $0x18] sm:$0xff]  ;;  %s4379_s8 = sld [smem:[#allocation7_spill]] }
  0x52   :  { %304 = vmatpush.msra.mxu2 %v265_v43  ;;  %340 = vmatpush.msra.mxu3 %v274_v55  ;;  %v2968_v42 = vld [vmem:[%s2582_s21 + $0x8] sm:$0xff] }
  0x53   :  { %198 = vmatpush.msra.mxu0 %v148_v22  ;;  %2282 = vmatmul.msk.f32.gmra.mxu1 %vm4269_vm0, %v144_v25  ;;  %v2543_v22 = vmov 0  }
  0x54   :  { %305 = vmatpush.msra.mxu2 %v264_v45  ;;  %341 = vmatpush.msra.mxu3 %v273_v57 }
  0x55   :  { %199 = vmatpush.msra.mxu0 %v147_v23  ;;  %2283 = vmatmul.msk.f32.vlgmr.msra.gmra.mxu3 %vm4269_vm0, %v250_v58  ;;  %v2823_v23 = vstv %s1096_s24 }
  0x56   :  { %306 = vmatpush.msra.mxu2 %v263_v46  ;;  %946 = vmatpush.msrb.mxu3 %v917_v63  ;;  %v3030_v63 = vld [vmem:[%s2642_s27] ss:$0 sm:$0xff]  ;;  %s2339_s27 = sld [smem:[#allocation3 + $0x2]] }
  0x57   :  { %200 = vmatpush.msra.mxu0 %v146_v24  ;;  %2439 = vset.pattern.permute.xlu1 %v2543_v22  ;;  %v2825_v24 = vstv %s1080_s13 }
  0x58   :  { %307 = vmatpush.msra.mxu2 %v262_v47  ;;  %947 = vmatpush.msrb.mxu3 %v916_v2 }
  0x59   :  { %201 = vmatpush.msra.mxu0 %v145_v26  ;;  %2440 = vset.pattern.permute.xlu0 %v2543_v22 }
  0x5a   :  { %202 = vmatmul.f32.vlgmr.msra.gmra.mxu0 %v137_v27  ;;  %308 = vmatpush.msra.mxu2 %v261_v48 }
  0x5b   :  { %223 = vmatpush.msrb.mxu0 %v168_v5  ;;  %948 = vmatpush.msrb.mxu3 %v915_v3  ;;  %v914_v5 = vld [vmem:[%s2637_s20] sm:$0xff]  ;;  %s2542_s20 = smov 97  }
  0x5c   :  { %309 = vmatpush.msra.mxu2 %v260_v50  ;;  %s1693_s28 = ssub.s32 27, %s2339_s27 }
  0x5d   :  { %224 = vmatpush.msrb.mxu0 %v167_v7  ;;  %2284 = vmatmul.msk.f32.gmra.mxu3 %vm4269_vm0, %v252_v60  ;;  %v969_v60 = vld [vmem:[%s2647_s4 + $0x10] sm:$0xff] }
  0x5e   :  { %310 = vmatpush.msra.mxu2 %v259_v51  ;;  %949 = vmatpush.msrb.mxu3 %v914_v5 }
  0x5f   :  { %225 = vmatpush.msrb.mxu0 %v166_v8  ;;  %v2441_v8 = vld [vmem:[%s2632_s12] ss:$0 sm:$0xff]  ;;  %s1128_s12 = ssub.s32 27, %s2792_s0 }
  0x60   :  { %311 = vmatpush.msra.mxu2 %v258_v52  ;;  %v2836_v29 = vstv %s1128_s12 }
  0x61   :  { %226 = vmatpush.msrb.mxu0 %v165_v11 }
  0x62   :  { %205 = vmatmul.f32.gmra.mxu0 %v139_v28  ;;  %312 = vmatpush.msra.mxu2 %v257_v54 }
  0x63   :  { %227 = vmatpush.msrb.mxu0 %v164_v12  ;;  %313 = vmatmul.f32.vlgmr.msra.gmra.mxu2 %v249_v56 }
  0x65   :  { %228 = vmatpush.msrb.mxu0 %v163_v14  ;;  %2285 = vmatmul.msk.f32.gmra.mxu3 %vm4269_vm0, %v254_v62  ;;  %v967_v62 = vld [vmem:[%s2647_s4] sm:$0xff] }
  0x67   :  { %229 = vmatpush.msrb.mxu0 %v162_v16  ;;  %v2803_v16 = vld [vmem:[%s2582_s21 + $0x10] sm:$0xff] }
  0x68   :  { %1261 = vrot.lane.b32.xlu0 %v2803_v16, %s2541_s6  ;;  %1253 = vrot.lane.b32.xlu2 %v2803_v16, %s2542_s20  ;;  %vm1145_vm12 = vcmp.eq.s32.totalorder %v2803_v16, 1  ;;  %vm1084_vm13 = vcmp.eq.s32.totalorder %v2803_v16, 0  ;;  %v1208_v28 = vrot.slane %v2803_v16, 1 }
  0x69   :  { %230 = vmatpush.msrb.mxu0 %v161_v18  ;;  %v1073_v18 = vlaneseq }
  0x6a   :  { %208 = vmatmul.f32.gmra.mxu0 %v141_v35 }
  0x6b   :  { %316 = vmatmul.f32.gmra.mxu2 %v251_v59  ;;  %v2815_v19 = vshrl.u32 %v1073_v18, 7  ;;  %v2817_v20 = vand.u32 127, %v1073_v18  ;;  %999 = vmatpush.msra.mxu0 %v970_v41 }
  0x6d   :  { %2286 = vmatmul.msk.f32.gmra.mxu3 %vm4269_vm0, %v256_v1  ;;  %v2829_v26 = vadd.s32 16, %v2815_v19  ;;  %vm2832_vm2 = vcmp.lt.s32.totalorder %v2817_v20, %v1090_v21  ;;  %vm4271_vm5 = vcmp.lt.s32.totalorder %v2817_v20, 5  ;;  %vm1130_vm8 = vcmp.ge.s32.totalorder %v2817_v20, %v2836_v29  ;;  %1000 = vmatpush.msra.mxu0 %v969_v60 }
  0x6e   :  { %v2853_v31 = vadd.s32 24, %v2815_v19  ;;  %v2949_v38 = vadd.s32 8, %v2815_v19  ;;  %v1162_v21 = vrot.slane %v2968_v42, 7  ;;  %v1210_v29 = vrot.slane %v2806_v17, 1 }
  0x6f   :  { %vm1100_vm3 = vcmp.ge.s32.totalorder %v2829_v26, %v2823_v23  ;;  %vm1105_vm4 = vcmp.lt.s32.totalorder %v2829_v26, %v2825_v24 }
  0x70   :  { %vm1109_vm6 = vmand %vm1100_vm3, %vm1105_vm4  ;;  %1255 = vrot.lane.b32.xlu2 %v2806_v17, %s2542_s20  ;;  %vm1101_vm3 = vcmp.ge.s32.totalorder %v2853_v31, %v2823_v23 }
  0x71   :  { %vm1113_vm7 = vmand %vm1109_vm6, %vm2832_vm2  ;;  %vm1106_vm6 = vcmp.lt.s32.totalorder %v2853_v31, %v2825_v24 }
  0x72   :  { %211 = vmatmul.f32.gmra.mxu0 %v143_v44  ;;  %vm1122_vm9 = vmand %vm1105_vm4, %vm4271_vm5 }
  0x73   :  { %319 = vmatmul.f32.gmra.mxu2 %v253_v61  ;;  %vm1126_vm10 = vmor %vm1113_vm7, %vm1122_vm9  ;;  %v968_v61 = vld [vmem:[%s2647_s4 + $0x8] sm:$0xff]  ;;  %s2340_s4 = sld [smem:[#allocation3 + $0x3]] }
  0x74   :  { %vm1133_vm11 = vmand %vm1105_vm4, %vm1130_vm8  ;;  %1001 = vmatpush.msra.mxu0 %v968_v61 }
  0x75   :  { %vm1137_vm14 = vmand %vm1133_vm11, %vm2832_vm2 }
  0x76   :  { %vm1141_vm15 = vmor %vm1126_vm10, %vm1137_vm14  ;;  %vm1146_vm14 = vcmp.eq.s32.totalorder %v2806_v17, 1  ;;  %1002 = vmatpush.msra.mxu0 %v967_v62 }
  0x77   :  { %vm1149_vm7 = vmand %vm1145_vm12, %vm1141_vm15  ;;  %vm1085_vm15 = vcmp.eq.s32.totalorder %v2806_v17, 0 }
  0x78   :  { %vm1153_vm9 = vmor %vm1084_vm13, %vm1149_vm7 }
  0x79   :  { %v2872_v35 = vsel %vm1153_vm9, 1, %v2543_v22  ;;  %vm1110_vm4 = vmand %vm1101_vm3, %vm1106_vm6  ;;  %s1682_s2 = ssub.s32 32, %s2340_s4  ;;  %s1724_s19 = ssub.s32 27, %s2340_s4 }
  0x7a   :  { %2279 = vmatmul.msk.f32.vlgmr.msrb.gmra.mxu0 %vm4269_vm0, %v138_v49  ;;  %1274 = vrot.lane.b32.xlu0 %v2872_v35, %s2542_s20  ;;  %vm1114_vm10 = vmand %vm1110_vm4, %vm2832_vm2  ;;  %v1216_v18 = vrot.slane %v2872_v35, 1 }
  0x7b   :  { %322 = vmatmul.f32.gmra.mxu2 %v255_v0  ;;  %1282 = vrot.lane.b32.xlu1 %v2872_v35, %s2541_s6  ;;  %vm1123_vm11 = vmand %vm1106_vm6, %vm4271_vm5 }
  0x7c   :  { %vm1127_vm12 = vmor %vm1114_vm10, %vm1123_vm11  ;;  %vm1098_vm10 = vcmp.ge.s32.totalorder %v2815_v19, %v2823_v23  ;;  %vm1103_vm11 = vcmp.lt.s32.totalorder %v2815_v19, %v2825_v24 }
  0x7d   :  { %vm1134_vm13 = vmand %vm1106_vm6, %vm1130_vm8  ;;  %vm4270_vm6 = vcmp.lt.s32.totalorder %v2815_v19, 5 }
  0x7e   :  { %vm1138_vm3 = vmand %vm1134_vm13, %vm2832_vm2 }
  0x7f   :  { %vm1142_vm7 = vmor %vm1127_vm12, %vm1138_vm3 }
  0x80   :  { %vm1150_vm9 = vmand %vm1146_vm14, %vm1142_vm7 }
  0x81   :  { %vm1154_vm4 = vmor %vm1085_vm15, %vm1150_vm9 }
  0x82   :  { %2280 = vmatmul.msk.f32.gmra.mxu0 %vm4269_vm0, %v140_v53  ;;  %v2903_v36 = vsel %vm1154_vm4, 1, %v2543_v22  ;;  %vm1092_vm12 = vmand %vm4270_vm6, %vm2832_vm2  ;;  %vm1143_vm4 = vcmp.eq.s32.totalorder %v2937_v37, 1 }
  0x83   :  { %1276 = vrot.lane.b32.xlu0 %v2903_v36, %s2542_s20  ;;  %1284 = vrot.lane.b32.xlu1 %v2903_v36, %s2541_s6  ;;  %vm1107_vm13 = vmand %vm1098_vm10, %vm1103_vm11  ;;  %vm1082_vm10 = vcmp.eq.s32.totalorder %v2937_v37, 0 }
  0x84   :  { %vm1111_vm14 = vmand %vm1107_vm13, %vm2832_vm2 }
  0x85   :  { %vm1115_vm15 = vmor %vm1092_vm12, %vm1111_vm14 }
  0x86   :  { %vm1120_vm3 = vmand %vm1103_vm11, %vm4271_vm5 }
  0x87   :  { %vm1124_vm7 = vmor %vm1115_vm15, %vm1120_vm3  ;;  %vm1099_vm15 = vcmp.ge.s32.totalorder %v2949_v38, %v2823_v23  ;;  %vm1104_vm3 = vcmp.lt.s32.totalorder %v2949_v38, %v2825_v24  ;;  %v1164_v23 = vrot.slane %v2803_v16, 7 }
  0x88   :  { %vm1131_vm9 = vmand %vm1103_vm11, %vm1130_vm8 }
  0x89   :  { %vm1135_vm13 = vmand %vm1131_vm9, %vm2832_vm2 }
  0x8a   :  { %vm1139_vm12 = vmor %vm1124_vm7, %vm1135_vm13 }
  0x8b   :  { %1348 = vrot.lane.b32.xlu1 %v2872_v35, %s2545_s26  ;;  %vm1147_vm14 = vmand %vm1143_vm4, %vm1139_vm12  ;;  %vm1144_vm12 = vcmp.eq.s32.totalorder %v2968_v42, 1 }
  0x8c   :  { %vm1151_vm11 = vmor %vm1082_vm10, %vm1147_vm14  ;;  %vm1083_vm14 = vcmp.eq.s32.totalorder %v2968_v42, 0 }
  0x8d   :  { %v2957_v40 = vsel %vm1151_vm11, 1, %v2543_v22  ;;  %vm1108_vm9 = vmand %vm1099_vm15, %vm1104_vm3 }
  0x8e   :  { %vm1112_vm7 = vmand %vm1108_vm9, %vm2832_vm2  ;;  %v1213_v41 = vrot.slane %v2957_v40, 1 }
  0x8f   :  { %vm1121_vm4 = vmand %vm1104_vm3, %vm4271_vm5 }
  0x90   :  { %vm1125_vm10 = vmor %vm1112_vm7, %vm1121_vm4 }
  0x91   :  { %vm1132_vm13 = vmand %vm1104_vm3, %vm1130_vm8  ;;  %vm4277_vm8 = vcmp.ge.s32.totalorder %v2817_v20, 1  ;;  %vm4276_vm3 = vcmp.eq.s32.totalorder %v2872_v35, 0 }
  0x92   :  { %vm1136_vm15 = vmand %vm1132_vm13, %vm2832_vm2  ;;  %vm4278_vm2 = vcmask 7168  }
  0x93   :  { %vm1140_vm11 = vmor %vm1125_vm10, %vm1136_vm15  ;;  %vm4273_vm15 = vcmask 1046528  }
  0x94   :  { %vm1148_vm9 = vmand %vm1144_vm12, %vm1140_vm11  ;;  %vm4272_vm12 = vcmask 1040384  }
  0x95   :  { %vm1152_vm7 = vmor %vm1083_vm14, %vm1148_vm9 }
  0x96   :  { %v2990_v47 = vsel %vm1152_vm7, 1, %v2543_v22  ;;  %vm1293_vm4 = vmand %vm4277_vm8, %vm4276_vm3 }
  0xc2   :  { %v1254_v2 = vpop.permute.xlu2 %1253 }
  0xc3   :  { %v3032_v1 = vpop.permute.xlu1 %1263 }
  0xc8   :  { %v238_v7 = vpop.f32.mrf.mxu1 }
  0xd0   :  { %v241_v13 = vpop.f32.mrf.mxu1 }
  0xd7   :  { %v203_v4 = vpop.f32.mrf.mxu0 }
  0xd8   :  { %v204_v25 = vadd.f32 %v2441_v8, %v203_v4  ;;  %v343_v45 = vpop.f32.mrf.mxu3 }
  0xda   :  { %v1262_v0 = vpop.permute.xlu0 %1261 }
  0xdb   :  { %v1268_v3 = vsel %vm4278_vm2, %v1254_v2, %v1262_v0  ;;  %v4320_v2 = vmov 0 }
  0xdc   :  { %vm1305_vm10 = vcmp.ne.s32.totalorder %v2803_v16, %v1268_v3 }
  0xdf   :  { %v206_v6 = vpop.f32.mrf.mxu0 }
  0xe0   :  { %v207_v32 = vadd.f32 %v2441_v8, %v206_v6  ;;  %v346_v50 = vpop.f32.mrf.mxu3 }
  0xe6   :  { %v314_v43 = vpop.f32.mrf.mxu2 }
  0xe7   :  { %v209_v9 = vpop.f32.mrf.mxu0  ;;  %v315_v44 = vadd.f32 %v2442_v39, %v314_v43 }
  0xe8   :  { %v210_v10 = vadd.f32 %v2441_v8, %v209_v9  ;;  %v349_v54 = vpop.f32.mrf.mxu3 }
  0xe9   :  { %v344_v46 = vadd.f32 %v343_v45, %v315_v44  ;;  %v1211_v45 = vsel %vm4273_vm15, %v1208_v28, %v1210_v29 }
  0xea   :  { %v2794_v11 = vadd.f32 %v238_v7, %v210_v10  ;;  %v3044_v10 = vpop.permute.xlu2 %1255  ;;  %vm1239_vm0 = vcmp.ne.s32.totalorder %v2803_v16, %v1211_v45  ;;  %v1161_v45 = vrot.slane %v2937_v37, 7 }
  0xeb   :  { %355 = vst.msk [vmem:[%s2700_s1] sm:$0xff] %vm4274_vm1, %v344_v46  ;;  %v1159_v46 = vrot.slane %v2806_v17, 7 }
  0xec   :  { %247 = vst.msk [vmem:[%s2695_s22 + $0x10] sm:$0xff] %vm4274_vm1, %v2794_v11  ;;  %v1275_v7 = vpop.permute.xlu0 %1274 }
  0xee   :  { %v317_v48 = vpop.f32.mrf.mxu2 }
  0xef   :  { %v212_v12 = vpop.f32.mrf.mxu0  ;;  %v318_v49 = vadd.f32 %v2442_v39, %v317_v48 }
  0xf0   :  { %v213_v14 = vadd.f32 %v2441_v8, %v212_v12  ;;  %v352_v58 = vpop.f32.mrf.mxu3  ;;  %v1283_v8 = vpop.permute.xlu1 %1282  ;;  %v1172_v12 = vrot.slane %v2872_v35, 7 }
  0xf1   :  { %v347_v51 = vadd.f32 %v346_v50, %v318_v49  ;;  %v1288_v9 = vsel %vm4278_vm2, %v1275_v7, %v1283_v8  ;;  %v1205_v49 = vrot.slane %v2937_v37, 1 }
  0xf2   :  { %v2800_v15 = vadd.f32 %v241_v13, %v213_v14  ;;  %vm1297_vm13 = vcmp.eq.s32.totalorder %v1288_v9, 0 }
  0xf3   :  { %356 = vst.msk [vmem:[%s2700_s1 + $0x8] sm:$0xff] %vm4274_vm1, %v347_v51  ;;  %vm1301_vm14 = vmand %vm1293_vm4, %vm1297_vm13  ;;  %vm4279_vm13 = vcmp.eq.s32.totalorder %v2903_v36, 0 }
  0xf4   :  { %248 = vst.msk [vmem:[%s2695_s22 + $0x18] sm:$0xff] %vm4274_vm1, %v2800_v15  ;;  %vm3054_vm11 = vmand %vm1301_vm14, %vm1305_vm10  ;;  %vm4275_vm14 = vcmp.lt.s32.totalorder %v2853_v31, 31 }
  0xf6   :  { %v320_v52 = vpop.f32.mrf.mxu2 }
  0xf7   :  { %v232_v27 = vpop.f32.mrf.mxu0  ;;  %v321_v53 = vadd.f32 %v2442_v39, %v320_v52 }
  0xf8   :  { %v233_v30 = vadd.f32 %v232_v27, %v204_v25 }
  0xf9   :  { %v350_v55 = vadd.f32 %v349_v54, %v321_v53  ;;  %v1166_v54 = vsel %vm4272_vm12, %v1164_v23, %v1159_v46 }
  0xfa   :  { %245 = vst.msk [vmem:[%s2695_s22] sm:$0xff] %vm4274_vm1, %v233_v30  ;;  %2303 = vmatmul.msk.f32.vlgmr.msrb.gmra.mxu3 %vm4274_vm1, %v233_v30 }
  0xfb   :  { %357 = vst.msk [vmem:[%s2700_s1 + $0x10] sm:$0xff] %vm4274_vm1, %v350_v55  ;;  %v1212_v55 = vsel %vm4273_vm15, %v1210_v29, %v1205_v49 }
  0xfe   :  { %v323_v56 = vpop.f32.mrf.mxu2 }
  0xff   :  { %v235_v33 = vpop.f32.mrf.mxu0  ;;  %v324_v57 = vadd.f32 %v2442_v39, %v323_v56  ;;  %v1285_v39 = vpop.permute.xlu1 %1284  ;;  %v1206_v56 = vrot.slane %v2968_v42, 1 }
 0x100   :  { %v236_v34 = vadd.f32 %v235_v33, %v207_v32  ;;  %v1277_v32 = vpop.permute.xlu0 %1276  ;;  %v1168_v33 = vrot.slane %v2903_v36, 7 }
 0x101   :  { %v353_v59 = vadd.f32 %v352_v58, %v324_v57  ;;  %v4350_v58 = vmov 0 }
 0x102   :  { %246 = vst.msk [vmem:[%s2695_s22 + $0x8] sm:$0xff] %vm4274_vm1, %v236_v34  ;;  %2304 = vmatmul.msk.f32.gmra.mxu3 %vm4274_vm1, %v236_v34  ;;  %s2544_s22 = smov 127   ;;  %v1165_v34 = vsel %vm4272_vm12, %v1162_v21, %v1164_v23  ;;  %v1174_v50 = vsel %vm4272_vm12, %v1172_v12, %v1168_v33 }
 0x103   :  { %1340 = vrot.lane.b32.xlu2 %v2872_v35, %s2544_s22  ;;  %1342 = vrot.lane.b32.xlu0 %v2903_v36, %s2544_s22  ;;  %358 = vst.msk [vmem:[%s2700_s1 + $0x18] sm:$0xff] %vm4274_vm1, %v353_v59  ;;  %vm1198_vm4 = vcmp.ne.s32.totalorder %v2803_v16, %v1165_v34  ;;  %vm1191_vm5 = vcmp.eq.s32.totalorder %v1174_v50, 0  ;;  %s1681_s1 = ssub.s32 32, %s2339_s27 }
 0x104   :  { %1321 = vrot.lane.b32.xlu1 %v2806_v17, %s2544_s22 }
 0x107   :  { %v1349_v61 = vpop.permute.xlu1 %1348 }
 0x10a   :  { %2305 = vmatmul.msk.f32.gmra.mxu3 %vm4274_vm1, %v2794_v11  ;;  %v1170_v11 = vrot.slane %v2990_v47, 7 }
 0x10b   :  { %1350 = vrot.lane.b32.xlu2 %v2903_v36, %s2545_s26  ;;  %1319 = vrot.lane.b32.xlu0 %v2803_v16, %s2544_s22 }
 0x10c   :  { %1270 = vrot.lane.b32.xlu1 %v2957_v40, %s2542_s20  ;;  %v1173_v27 = vsel %vm4272_vm12, %v1170_v11, %v1172_v12 }
 0x10d   :  { %vm1190_vm9 = vcmp.eq.s32.totalorder %v1173_v27, 0 }
 0x10e   :  { %vm1194_vm10 = vmand %vm4276_vm3, %vm1190_vm9 }
 0x10f   :  { %vm3092_vm6 = vmand %vm1194_vm10, %vm1198_vm4 }
 0x110   :  { %vm3111_vm4 = vmand %vm4277_vm8, %vm4279_vm13 }
 0x112   :  { %2306 = vmatmul.msk.f32.gmra.mxu3 %vm4274_vm1, %v2800_v15  ;;  %v1218_v15 = vrot.slane %v2903_v36, 1 }
 0x113   :  { %1327 = vrot.lane.b32.xlu2 %v2803_v16, %s2545_s26  ;;  %1329 = vrot.lane.b32.xlu0 %v2806_v17, %s2545_s26 }
 0x114   :  { %1280 = vrot.lane.b32.xlu1 %v2990_v47, %s2541_s6  ;;  %v1219_v30 = vsel %vm4273_vm15, %v1216_v18, %v1218_v15  ;;  %v1220_v51 = vsel %vm4273_vm15, %v1218_v15, %v1213_v41  ;;  %vm4282_vm15 = vcmask 252928  }
 0x115   :  { %vm1231_vm7 = vcmp.eq.s32.totalorder %v1219_v30, 0  ;;  %vm1232_vm10 = vcmp.eq.s32.totalorder %v1220_v51, 0  ;;  %v1214_v51 = vrot.slane %v2990_v47, 1 }
 0x116   :  { %vm1235_vm9 = vmand %vm4276_vm3, %vm1231_vm7  ;;  %vm1240_vm3 = vcmp.ne.s32.totalorder %v2806_v17, %v1212_v55 }
 0x117   :  { %vm1228_vm7 = vmand %vm4275_vm14, %vm4279_vm13 }
 0x118   :  { %vm3115_vm12 = vmand %vm1235_vm9, %vm1239_vm0  ;;  %vm4283_vm9 = vcmp.lt.s32.totalorder %v2817_v20, 31 }
 0x119   :  { %vm1195_vm14 = vmand %vm4279_vm13, %vm1191_vm5  ;;  %vm4322_vm5 = vcmask 7168   ;;  %vm4326_vm13 = vcmask 261120  }
 0x11a   :  { %vm1236_vm8 = vmand %vm1228_vm7, %vm1232_vm10  ;;  %v1289_v3 = vsel %vm4322_vm5, %v1277_v32, %v1285_v39  ;;  %vm4325_vm10 = vcmp.eq.s32.totalorder %v2872_v35, 0  ;;  %v4346_v35 = vmov 0 }
 0x11b   :  { %1278 = vrot.lane.b32.xlu0 %v2957_v40, %s2541_s6  ;;  %1272 = vrot.lane.b32.xlu2 %v2990_v47, %s2542_s20  ;;  %vm1247_vm0 = vmor %vm3092_vm6, %vm3115_vm12 }
 0x11c   :  { %1257 = vrot.lane.b32.xlu1 %v2937_v37, %s2541_s6  ;;  %vm3135_vm7 = vmand %vm1236_vm8, %vm1240_vm3  ;;  %vm1298_vm3 = vcmp.eq.s32.totalorder %v1289_v3, 0  ;;  %v2444_v3 = vld [vmem:[%s2652_s17] ss:$0 sm:$0xff]  ;;  %s4375_s17 = sld [smem:[#allocation14_spill]] }
 0x11d   :  { %vm1359_vm6 = vmand %vm4283_vm9, %vm4325_vm10  ;;  %vm4330_vm10 = vcmp.eq.s32.totalorder %v2903_v36, 0 }
 0x11e   :  { %vm4329_vm8 = vmmov %vm4322_vm5 }
 0x123   :  { %1251 = vrot.lane.b32.xlu0 %v2968_v42, %s2542_s20  ;;  %1249 = vrot.lane.b32.xlu2 %v2937_v37, %s2542_s20 }
 0x124   :  { %1338 = vrot.lane.b32.xlu1 %v2990_v47, %s2544_s22 }
 0x12b   :  { %1336 = vrot.lane.b32.xlu0 %v2957_v40, %s2544_s22  ;;  %1259 = vrot.lane.b32.xlu2 %v2968_v42, %s2541_s6 }
 0x12c   :  { %1315 = vrot.lane.b32.xlu1 %v2937_v37, %s2544_s22 }
 0x133   :  { %1346 = vrot.lane.b32.xlu0 %v2990_v47, %s2545_s26  ;;  %1344 = vrot.lane.b32.xlu2 %v2957_v40, %s2545_s26 }
 0x134   :  { %1325 = vrot.lane.b32.xlu1 %v2968_v42, %s2545_s26 }
 0x13b   :  { %1323 = vrot.lane.b32.xlu0 %v2937_v37, %s2545_s26  ;;  %1317 = vrot.lane.b32.xlu2 %v2968_v42, %s2544_s22 }
 0x15d   :  { %v1341_v43 = vpop.permute.xlu2 %1340 }
 0x15e   :  { %v1354_v0 = vsel %vm4282_vm15, %v1341_v43, %v1349_v61 }
 0x15f   :  { %vm1363_vm12 = vcmp.eq.s32.totalorder %v1354_v0, 0 }
 0x165   :  { %v1351_v59 = vpop.permute.xlu2 %1350 }
 0x16d   :  { %v1328_v9 = vpop.permute.xlu2 %1327 }
 0x175   :  { %v1343_v57 = vpop.permute.xlu0 %1342  ;;  %v1273_v27 = vpop.permute.xlu2 %1272 }
 0x176   :  { %v1355_v8 = vsel %vm4282_vm15, %v1343_v57, %v1351_v59  ;;  %v4353_v59 = vmov 0 }
 0x17d   :  { %v951_v4 = vpop.f32.mrf.mxu3  ;;  %v1320_v7 = vpop.permute.xlu0 %1319 }
 0x17e   :  { %v952_v5 = vadd.f32 %v3030_v63, %v951_v4  ;;  %v1334_v12 = vsel %vm4282_vm15, %v1320_v7, %v1328_v9  ;;  %v1250_v32 = vpop.permute.xlu2 %1249 }
 0x17f   :  { %vm1371_vm5 = vcmp.ne.s32.totalorder %v2803_v16, %v1334_v12 }
 0x180   :  { %v963_v6 = vmax.f32 %v952_v5, 0.0  ;;  %v4323_v5 = vmov 0 }
 0x181   :  { %v4324_v5 = vsel %vm3135_vm7, 4294967295, %v4323_v5 }
 0x182   :  { %2307 = vmatmul.msk.f32.vlgmr.msra.gmra.mxu0 %vm4274_vm1, %v963_v6  ;;  %v1269_v6 = vsel %vm4329_vm8, %v3044_v10, %v3032_v1  ;;  %vm1360_vm8 = vmand %vm4283_vm9, %vm4330_vm10  ;;  %v1322_v1 = vpop.permute.xlu1 %1321  ;;  %vm4335_vm10 = vcmask 252928  }
 0x185   :  { %v954_v13 = vpop.f32.mrf.mxu3  ;;  %v1330_v10 = vpop.permute.xlu0 %1329 }
 0x186   :  { %v955_v14 = vadd.f32 %v3030_v63, %v954_v13  ;;  %v1335_v13 = vsel %vm4335_vm10, %v1322_v1, %v1330_v10 }
 0x188   :  { %v964_v25 = vmax.f32 %v955_v14, 0.0  ;;  %v2546_v14 = vmov 0.0  }
 0x18a   :  { %2308 = vmatmul.msk.f32.gmra.mxu0 %vm4274_vm1, %v964_v25  ;;  %v1271_v25 = vpop.permute.xlu1 %1270 }
 0x18d   :  { %v957_v44 = vpop.f32.mrf.mxu3  ;;  %v1279_v29 = vpop.permute.xlu0 %1278 }
 0x18e   :  { %v958_v48 = vadd.f32 %v3030_v63, %v957_v44  ;;  %v1169_v44 = vrot.slane %v2957_v40, 7 }
 0x190   :  { %v965_v52 = vmax.f32 %v958_v48, 0.0  ;;  %v1260_v48 = vpop.permute.xlu2 %1259 }
 0x192   :  { %2309 = vmatmul.msk.f32.gmra.mxu0 %vm4274_vm1, %v965_v52  ;;  %vm1199_vm1 = vcmp.ne.s32.totalorder %v2806_v17, %v1166_v54  ;;  %v1281_v30 = vpop.permute.xlu1 %1280 }
 0x193   :  { %vm3130_vm2 = vmand %vm1195_vm14, %vm1199_vm1 }
 0x194   :  { %v4321_v2 = vsel %vm3130_vm2, 4294967295, %v4320_v2  ;;  %vm3146_vm1 = vmor %vm1247_vm0, %vm3054_vm11  ;;  %vm1306_vm11 = vcmp.ne.s32.totalorder %v2806_v17, %v1269_v6  ;;  %v4364_v6 = vmov 0 }
 0x195   :  { %v960_v60 = vpop.f32.mrf.mxu3  ;;  %vm1302_vm0 = vmand %vm3111_vm4, %vm1298_vm3  ;;  %vm4332_vm15 = vnez %v4321_v2  ;;  %vm4333_vm4 = vnez %v4324_v5  ;;  %v1252_v34 = vpop.permute.xlu0 %1251 }
 0x196   :  { %v961_v62 = vadd.f32 %v3030_v63, %v960_v60  ;;  %v4327_v63 = vmov 0  ;;  %vm1310_vm7 = vmand %vm1302_vm0, %vm1306_vm11  ;;  %vm4338_vm0 = vcmask 1046528  }
 0x197   :  { %v4328_v63 = vsel %vm3146_vm1, 4294967295, %v4327_v63  ;;  %vm1364_vm1 = vcmp.eq.s32.totalorder %v1355_v8, 0  ;;  %vm4334_vm3 = vmor %vm4332_vm15, %vm4333_vm4  ;;  %vm4284_vm15 = vcmp.ge.s32.totalorder %v2815_v19, 1  ;;  %v1215_v36 = vsel %vm4338_vm0, %v1213_v41, %v1214_v51 }
 0x198   :  { %v966_v4 = vmax.f32 %v961_v62, 0.0  ;;  %vm1368_vm2 = vmand %vm1360_vm8, %vm1364_vm1  ;;  %vm4286_vm8 = vcmp.eq.s32.totalorder %v2990_v47, 0  ;;  %v3264_v62 = vld [vmem:[%s2592_s29 + $0x8] sm:$0xff] }
 0x199   :  { %vm1314_vm9 = vmor %vm4334_vm3, %vm1310_vm7  ;;  %1434 = vmatpush.bf16.msra.mxu3 %v3264_v62 }
 0x19a   :  { %2310 = vmatmul.msk.f32.gmra.mxu0 %vm4326_vm13, %v966_v4  ;;  %vm1367_vm13 = vmand %vm1359_vm6, %vm1363_vm12  ;;  %vm4331_vm6 = vnez %v4328_v63  ;;  %v1258_v39 = vpop.permute.xlu1 %1257 }
 0x19b   :  { %vm1375_vm14 = vmand %vm1367_vm13, %vm1371_vm5  ;;  %vm1372_vm5 = vcmp.ne.s32.totalorder %v2806_v17, %v1335_v13 }
 0x19c   :  { %vm1379_vm12 = vmor %vm4331_vm6, %vm1375_vm14 }
 0x19d   :  { %v3177_v15 = vsel %vm1379_vm12, 1.0, %v2546_v14  ;;  %vm1376_vm1 = vmand %vm1368_vm2, %vm1372_vm5  ;;  %v1337_v50 = vpop.permute.xlu0 %1336  ;;  %vm4285_vm2 = vcmp.eq.s32.totalorder %v2957_v40, 0  ;;  %vm1229_vm5 = vcmp.eq.s32.totalorder %v1215_v36, 0 }
 0x19e   :  { %vm1380_vm13 = vmor %vm1314_vm9, %vm1376_vm1  ;;  %vm4336_vm9 = vcmask 1040384   ;;  %vm4342_vm1 = vcmp.ge.s32.totalorder %v2817_v20, 1 }
 0x19f   :  { %v3180_v23 = vsel %vm1380_vm13, 1.0, %v2546_v14  ;;  %v1175_v52 = vsel %vm4336_vm9, %v1168_v33, %v1169_v44  ;;  %vm4337_vm7 = vmmov %vm4336_vm9 }
 0x1a0   :  { %v1390_v24 = vpack.c.bf16 %v3180_v23, %v3177_v15  ;;  %v1167_v55 = vsel %vm4337_vm7, %v1159_v46, %v1161_v45  ;;  %vm1184_vm14 = vmand %vm4284_vm15, %vm4285_vm2  ;;  %vm1188_vm11 = vcmp.eq.s32.totalorder %v1175_v52, 0  ;;  %v3349_v23 = vstv %s1693_s28 }
 0x1a1   :  { %vm4339_vm6 = vmmov %vm4337_vm7  ;;  %vm1196_vm12 = vcmp.ne.s32.totalorder %v2937_v37, %v1167_v55  ;;  %v1687_v52 = vstv %s1682_s2  ;;  %v3365_v55 = vld [vmem:[%s2582_s21 + $0x38] sm:$0xff] }
 0x1a2   :  { %v1339_v53 = vpop.permute.xlu1 %1338  ;;  %v1171_v17 = vsel %vm4339_vm6, %v1169_v44, %v1170_v11  ;;  %vm1192_vm4 = vmand %vm1184_vm14, %vm1188_vm11  ;;  %v3338_v44 = vld [vmem:[%s4379_s8] sm:$0xf] }
 0x1a3   :  { %vm4340_vm3 = vmmov %vm4338_vm0  ;;  %vm1189_vm7 = vcmp.eq.s32.totalorder %v1171_v17, 0  ;;  %v3393_v17 = vld [vmem:[%s2582_s21 + $0x30] sm:$0xff] }
 0x1a4   :  { %v1217_v33 = vsel %vm4340_vm3, %v1214_v51, %v1216_v18  ;;  %vm4341_vm10 = vmmov %vm4338_vm0 }
 0x1a5   :  { %v1207_v46 = vsel %vm4341_vm10, %v1205_v49, %v1206_v56  ;;  %vm3222_vm13 = vmand %vm4342_vm1, %vm4286_vm8  ;;  %v1345_v49 = vpop.permute.xlu2 %1344  ;;  %v1347_v57 = vpop.permute.xlu0 %1346  ;;  %vm4352_vm10 = vcmask 7168  }
 0x1a6   :  { %vm4345_vm9 = vmmov %vm4339_vm6  ;;  %v1267_v61 = vsel %vm4352_vm10, %v1252_v34, %v1260_v48 }
 0x1a7   :  { %v1163_v11 = vsel %vm4345_vm9, %v1161_v45, %v1162_v21  ;;  %vm3229_vm14 = vmand %vm1192_vm4, %vm1196_vm12  ;;  %vm1237_vm12 = vcmp.ne.s32.totalorder %v2937_v37, %v1207_v46  ;;  %v3343_v45 = vld [vmem:[%s2592_s29] sm:$0xff]  ;;  %s4388_s29 = sld [smem:[#allocation13_spill]] }
 0x1a8   :  { %v4347_v35 = vsel %vm3229_vm14, 4294967295, %v4346_v35  ;;  %vm4348_vm11 = vmmov %vm4338_vm0  ;;  %vm1230_vm0 = vcmp.eq.s32.totalorder %v1217_v33, 0  ;;  %1435 = vmatpush.bf16.msra.mxu3 %v3343_v45 }
 0x1a9   :  { %v1209_v18 = vsel %vm4348_vm11, %v1206_v56, %v1208_v28  ;;  %vm4349_vm6 = vmmov %vm4342_vm1  ;;  %v1287_v28 = vsel %vm4352_vm10, %v1273_v27, %v1281_v30  ;;  %vm1197_vm1 = vcmp.ne.s32.totalorder %v2968_v42, %v1163_v11 }
 0x1aa   :  { %vm3240_vm3 = vmand %vm4349_vm6, %vm4285_vm2  ;;  %v1316_v16 = vpop.permute.xlu1 %1315  ;;  %vm1238_vm11 = vcmp.ne.s32.totalorder %v2968_v42, %v1209_v18 }
 0x1ab   :  { %v4351_v58 = vsel %vm3240_vm3, 4294967295, %v4350_v58  ;;  %vm1233_vm4 = vmand %vm4285_vm2, %vm1229_vm5  ;;  %vm1296_vm5 = vcmp.eq.s32.totalorder %v1287_v28, 0 }
 0x1ac   :  { %vm1193_vm9 = vmand %vm4286_vm8, %vm1189_vm7 }
 0x1ad   :  { %vm1234_vm6 = vmand %vm4286_vm8, %vm1230_vm0  ;;  %v1324_v7 = vpop.permute.xlu0 %1323  ;;  %v1318_v12 = vpop.permute.xlu2 %1317  ;;  %v3385_v56 = vld [vmem:[%s4388_s29] sm:$0x3] }
 0x1ae   :  { %vm3254_vm15 = vmand %vm1233_vm4, %vm1237_vm12  ;;  %vm1304_vm4 = vcmp.ne.s32.totalorder %v2968_v42, %v1267_v61  ;;  %v1582_v33 = vperm.slane %v3385_v56, 0 }
 0x1af   :  { %v4354_v59 = vsel %vm3254_vm15, 4294967295, %v4353_v59  ;;  %vm3258_vm2 = vmand %vm1193_vm9, %vm1197_vm1 }
 0x1b0   :  { %vm4357_vm3 = vmmov %vm4352_vm10  ;;  %vm4363_vm10 = vcmp.lt.s32.totalorder %v2817_v20, 31 }
 0x1b1   :  { %v1286_v0 = vsel %vm4357_vm3, %v1271_v25, %v1279_v29  ;;  %vm3267_vm7 = vmand %vm1234_vm6, %vm1238_vm11  ;;  %vm4361_vm11 = vcmask 252928   ;;  %vm4362_vm6 = vcmp.eq.s32.totalorder %v2957_v40, 0  ;;  %v4371_v25 = vmov 0 }
 0x1b2   :  { %vm1300_vm12 = vmand %vm3222_vm13, %vm1296_vm5  ;;  %vm1295_vm1 = vcmp.eq.s32.totalorder %v1286_v0, 0  ;;  %v1352_v63 = vsel %vm4361_vm11, %v1337_v50, %v1345_v49  ;;  %v1326_v1 = vpop.permute.xlu1 %1325 }
 0x1b3   :  { %vm4360_vm9 = vmmov %vm4357_vm3  ;;  %vm1361_vm8 = vcmp.eq.s32.totalorder %v1352_v63, 0 }
 0x1b4   :  { %v1266_v4 = vsel %vm4360_vm9, %v1250_v32, %v1258_v39  ;;  %vm3290_vm0 = vmand %vm4363_vm10, %vm4362_vm6  ;;  %vm4367_vm9 = vnez %v4351_v58  ;;  %vm4368_vm6 = vcmp.eq.s32.totalorder %v2990_v47, 0  ;;  %v1020_v32 = vld [vmem:[%s4375_s17] sm:$0x1]  ;;  %s4498_s17 = sld [smem:[#allocation15_spill]] }
 0x1b5   :  { %v4365_v6 = vsel %vm3290_vm0, 4294967295, %v4364_v6  ;;  %vm1308_vm13 = vmand %vm1300_vm12, %vm1304_vm4 }
 0x1b6   :  { %vm4366_vm5 = vmmov %vm4361_vm11  ;;  %vm1303_vm11 = vcmp.ne.s32.totalorder %v2937_v37, %v1266_v4 }
 0x1b7   :  { %v1353_v9 = vsel %vm4366_vm5, %v1339_v53, %v1347_v57  ;;  %vm1299_vm3 = vmand %vm4367_vm9, %vm1295_vm1  ;;  %v1333_v27 = vsel %vm4366_vm5, %v1318_v12, %v1326_v1  ;;  %vm4373_vm9 = vcmask 261120   ;;  %v3357_v53 = vstv %s1724_s19  ;;  %v3436_v57 = vld [vmem:[%s4390_s7] sm:$0x3] }
 0x1b8   :  { %vm1358_vm15 = vmand %vm4363_vm10, %vm4368_vm6  ;;  %vm1362_vm1 = vcmp.eq.s32.totalorder %v1353_v9, 0  ;;  %vm4374_vm6 = vnez %v4365_v6 }
 0x1b9   :  { %vm4369_vm14 = vmmov %vm4366_vm5 }
 0x1ba   :  { %v1332_v13 = vsel %vm4369_vm14, %v1316_v16, %v1324_v7  ;;  %vm4370_vm12 = vmor %vm3258_vm2, %vm3267_vm7  ;;  %vm1370_vm7 = vcmp.ne.s32.totalorder %v2968_v42, %v1333_v27  ;;  %v1800_v27 = vrot.slane %v3365_v55, 1 }
 0x1bb   :  { %vm3308_vm4 = vmor %vm4370_vm12, %vm1308_vm13  ;;  %vm1369_vm14 = vcmp.ne.s32.totalorder %v2937_v37, %v1332_v13  ;;  %vm4376_vm13 = vnez %v4347_v35  ;;  %vm4377_vm12 = vnez %v4354_v59 }
 0x1bc   :  { %v4372_v25 = vsel %vm3308_vm4, 4294967295, %v4371_v25  ;;  %vm1307_vm0 = vmand %vm1299_vm3, %vm1303_vm11 }
 0x1bd   :  { %vm1365_vm10 = vmand %vm4374_vm6, %vm1361_vm8 }
 0x1be   :  { %vm1366_vm2 = vmand %vm1358_vm15, %vm1362_vm1  ;;  %vm4381_vm15 = vnez %v4372_v25  ;;  %v1798_v25 = vrot.slane %v3393_v17, 1 }
 0x1bf   :  { %vm4378_vm5 = vmor %vm4376_vm13, %vm4377_vm12 }
 0x1c0   :  { %vm1311_vm4 = vmor %vm4378_vm5, %vm1307_vm0 }
 0x1c1   :  { %vm1373_vm3 = vmand %vm1365_vm10, %vm1369_vm14  ;;  %vm1698_vm14 = vcmp.ge.s32.totalorder %v2853_v31, %v3349_v23 }
 0x1c2   :  { %vm1374_vm8 = vmand %vm1366_vm2, %vm1370_vm7  ;;  %vm3360_vm7 = vcmp.lt.s32.totalorder %v2817_v20, %v1687_v52  ;;  %v4414_v52 = vmov 0 }
 0x1c3   :  { %vm1377_vm11 = vmor %vm1311_vm4, %vm1373_vm3  ;;  %vm4389_vm3 = vcmp.lt.s32.totalorder %v2817_v20, 5 }
 0x1c4   :  { %vm4380_vm6 = vmmov %vm4373_vm9  ;;  %v2317_v34 = vsel %vm1377_vm11, 1.0, %v2546_v14 }
 0x1c5   :  { %vm1378_vm1 = vmor %vm4381_vm15, %vm1374_vm8  ;;  %vm1742_vm15 = vcmp.eq.s32.totalorder %v3365_v55, 1 }
 0x1c6   :  { %vm4382_vm12 = vmmov %vm4380_vm6  ;;  %v2318_v39 = vsel %vm1378_vm1, 1.0, %v2546_v14  ;;  %vm1686_vm1 = vcmp.eq.s32.totalorder %v3365_v55, 0 }
 0x1c7   :  { %vm4383_vm0 = vmmov %vm4380_vm6 }
 0x1c8   :  { %vm4384_vm4 = vmmov %vm4383_vm0 }
 0x1c9   :  { %vm4385_vm10 = vmmov %vm4383_vm0 }
 0x1ff   :  { %v3184_v43 = vpop.f32.mrf.mxu0 }
 0x200   :  { %v1005_v30 = vadd.f32 %v2444_v3, %v3184_v43  ;;  %v1389_v43 = vpack.c.bf16 %v2318_v39, %v2317_v34 }
 0x202   :  { %v1016_v42 = vmax.f32 %v1005_v30, 0.0 }
 0x207   :  { %v3194_v54 = vpop.f32.mrf.mxu0 }
 0x208   :  { %v1008_v47 = vadd.f32 %v2444_v3, %v3194_v54 }
 0x20a   :  { %v1017_v37 = vmax.f32 %v1008_v47, 0.0 }
 0x20f   :  { %v1010_v21 = vpop.f32.mrf.mxu0 }
 0x210   :  { %v1011_v10 = vadd.f32 %v2444_v3, %v1010_v21  ;;  %v3472_v21 = vld [vmem:[%s2582_s21 + $0x20] sm:$0xff] }
 0x211   :  { %v1795_v39 = vrot.slane %v3472_v21, 1 }
 0x212   :  { %v1018_v29 = vmax.f32 %v1011_v10, 0.0 }
 0x217   :  { %v1013_v5 = vpop.f32.mrf.mxu0 }
 0x218   :  { %v1014_v8 = vadd.f32 %v2444_v3, %v1013_v5 }
 0x21a   :  { %v1019_v40 = vmax.f32 %v1014_v8, 0.0  ;;  %v1759_v8 = vrot.slane %v3393_v17, 7 }
 0x21c   :  { %2311 = vmatpush.xpose.msk.msrb.mxu2 %vm4373_vm9, %v1019_v40 }
 0x220   :  { %2312 = vmatpush.xpose.msk.msrb.mxu2 %vm4373_vm9, %v1018_v29  ;;  %vm1726_vm9 = vcmp.ge.s32.totalorder %v2817_v20, %v3357_v53 }
 0x224   :  { %2313 = vmatpush.xpose.msk.msrb.mxu2 %vm4380_vm6, %v1017_v37 }
 0x228   :  { %2314 = vmatpush.xpose.msk.msrb.mxu2 %vm4382_vm12, %v1016_v42 }
 0x22b   :  { %2315 = vmatmul.msk.f32.vlgmr.msrb.gmra.mxu2 %vm4383_vm0, %v1020_v32  ;;  %v1755_v32 = vrot.slane %v3365_v55, 7 }
 0x22c   :  { %1401 = vmatpush.bf16.msra.mxu2 %v1390_v24  ;;  %v3351_v24 = vstv %s1681_s1 }
 0x22d   :  { %vm1703_vm2 = vcmp.lt.s32.totalorder %v2853_v31, %v3351_v24 }
 0x22e   :  { %vm1707_vm13 = vmand %vm1698_vm14, %vm1703_vm2  ;;  %vm1702_vm14 = vcmp.lt.s32.totalorder %v2829_v26, %v3351_v24 }
 0x22f   :  { %vm1711_vm5 = vmand %vm1707_vm13, %vm3360_vm7 }
 0x230   :  { %1402 = vmatpush.bf16.msra.mxu2 %v1389_v43  ;;  %vm1719_vm8 = vmand %vm1703_vm2, %vm4389_vm3 }
 0x231   :  { %vm1723_vm11 = vmor %vm1711_vm5, %vm1719_vm8 }
 0x232   :  { %vm1730_vm6 = vmand %vm1703_vm2, %vm1726_vm9 }
 0x233   :  { %2321 = vmatmul.msk.bf16.vlgmr.msra.gmra.mxu2 %vm4384_vm4, %v3338_v44  ;;  %vm1734_vm12 = vmand %vm1730_vm6, %vm3360_vm7 }
 0x234   :  { %vm1738_vm0 = vmor %vm1723_vm11, %vm1734_vm12 }
 0x235   :  { %vm1746_vm4 = vmand %vm1742_vm15, %vm1738_vm0  ;;  %vm1741_vm15 = vcmp.eq.s32.totalorder %v3393_v17, 1  ;;  %vm1583_vm0 = vcmp.eq.s32.totalorder %v2815_v19, %v1582_v33 }
 0x236   :  { %vm1750_vm13 = vmor %vm1686_vm1, %vm1746_vm4  ;;  %vm1685_vm1 = vcmp.eq.s32.totalorder %v3393_v17, 0 }
 0x237   :  { %v3388_v36 = vsel %vm1750_vm13, 1, %v2543_v22  ;;  %vm1718_vm8 = vmand %vm1702_vm14, %vm4389_vm3 }
 0x238   :  { %1861 = vrot.lane.b32.xlu0 %v3388_v36, %s2542_s20  ;;  %vm1729_vm6 = vmand %vm1702_vm14, %vm1726_vm9  ;;  %v1808_v1 = vrot.slane %v3388_v36, 1  ;;  %v1763_v30 = vrot.slane %v3388_v36, 7 }
 0x239   :  { %vm1733_vm12 = vmand %vm1729_vm6, %vm3360_vm7 }
 0x240   :  { %1839 = vrot.lane.b32.xlu0 %v3393_v17, %s2542_s20 }
 0x248   :  { %1849 = vrot.lane.b32.xlu0 %v3365_v55, %s2541_s6 }
 0x2aa   :  { %v1862_v0 = vpop.permute.xlu0 %1861 }
 0x2ae   :  { %v3346_v48 = vpop.f32.mrf.mxu2 }
 0x2b2   :  { %v1840_v3 = vpop.permute.xlu0 %1839 }
 0x2b6   :  { %v1404_v50 = vpop.f32.mrf.mxu2 }
 0x2b7   :  { %v1408_v51 = vpack.c.bf16 %v1404_v50, %v1404_v50 }
 0x2b9   :  { %2330 = vmatmul.msk.bf16.vlgmr.msra.gmra.mxu3 %vm4385_vm10, %v1408_v51  ;;  %vm1697_vm10 = vcmp.ge.s32.totalorder %v2829_v26, %v3349_v23  ;;  %v2336_v26 = vsel %vm1583_vm0, 1.0, %v2546_v14  ;;  %v4407_v51 = vmov 0 }
 0x2ba   :  { %vm1706_vm2 = vmand %vm1697_vm10, %vm1702_vm14  ;;  %vm1695_vm14 = vcmp.ge.s32.totalorder %v2815_v19, %v3349_v23  ;;  %v1586_v41 = vpack.c.bf16 %v2336_v26, %v2336_v26  ;;  %v1850_v40 = vpop.permute.xlu0 %1849  ;;  %v4418_v26 = vmov 0 }
 0x2bb   :  { %vm1710_vm5 = vmand %vm1706_vm2, %vm3360_vm7  ;;  %vm1700_vm2 = vcmp.lt.s32.totalorder %v2815_v19, %v3351_v24 }
 0x2bc   :  { %vm1722_vm11 = vmor %vm1710_vm5, %vm1718_vm8  ;;  %vm4289_vm5 = vcmask 1043456   ;;  %vm4391_vm8 = vcmp.lt.s32.totalorder %v2815_v19, 5 }
 0x2bd   :  { %vm1737_vm4 = vmor %vm1722_vm11, %vm1733_vm12  ;;  %v1590_v18 = vsel %vm4289_vm5, %v1586_v41, 0  ;;  %vm4394_vm12 = vcmp.lt.s32.totalorder %v2817_v20, 5 }
 0x2be   :  { %v1406_v15 = vpop.f32.mrf.mxu2  ;;  %vm1745_vm10 = vmand %vm1741_vm15, %vm1737_vm4  ;;  %vm4290_vm15 = vcmask 64512  }
 0x2bf   :  { %vm1749_vm13 = vmor %vm1685_vm1, %vm1745_vm10  ;;  %vm1696_vm10 = vcmp.ge.s32.totalorder %v2949_v38, %v3349_v23 }
 0x2c0   :  { %v3412_v46 = vsel %vm1749_vm13, 1, %v2543_v22  ;;  %vm1704_vm3 = vmand %vm1695_vm14, %vm1700_vm2  ;;  %vm1701_vm13 = vcmp.lt.s32.totalorder %v2949_v38, %v3351_v24  ;;  %v3490_v38 = vld [vmem:[%s2582_s21 + $0x28] sm:$0xff]  ;;  %v4412_v24 = vmov 0  ;;  %s4432_s21 = sld [smem:[#allocation12_spill]] }
 0x2c1   :  { %1867 = vrot.lane.b32.xlu1 %v3412_v46, %s2541_s6  ;;  %1859 = vrot.lane.b32.xlu2 %v3412_v46, %s2542_s20  ;;  %vm1689_vm11 = vmand %vm4391_vm8, %vm3360_vm7  ;;  %v1767_v63 = vrot.slane %v3412_v46, 7  ;;  %v1757_v7 = vrot.slane %v3490_v38, 7  ;;  %v1806_v12 = vrot.slane %v3412_v46, 1 }
 0x2c2   :  { %vm1708_vm6 = vmand %vm1704_vm3, %vm3360_vm7  ;;  %1931 = vrot.lane.b32.xlu0 %v3412_v46, %s2545_s26 }
 0x2c3   :  { %vm3442_vm1 = vmor %vm1689_vm11, %vm1708_vm6  ;;  %vm1739_vm11 = vcmp.eq.s32.totalorder %v3472_v21, 1 }
 0x2c4   :  { %vm1716_vm0 = vmand %vm1700_vm2, %vm4394_vm12 }
 0x2c5   :  { %vm1727_vm4 = vmand %vm1700_vm2, %vm1726_vm9 }
 0x2c6   :  { %vm1720_vm14 = vmor %vm3442_vm1, %vm1716_vm0 }
 0x2c7   :  { %vm1731_vm3 = vmand %vm1727_vm4, %vm3360_vm7  ;;  %vm1683_vm4 = vcmp.eq.s32.totalorder %v3472_v21, 0 }
 0x2c8   :  { %vm1705_vm2 = vmand %vm1696_vm10, %vm1701_vm13 }
 0x2c9   :  { %1841 = vrot.lane.b32.xlu1 %v3365_v55, %s2542_s20  ;;  %1869 = vrot.lane.b32.xlu2 %v3388_v36, %s2541_s6  ;;  %vm1735_vm8 = vmor %vm1720_vm14, %vm1731_vm3 }
 0x2ca   :  { %vm1709_vm6 = vmand %vm1705_vm2, %vm3360_vm7  ;;  %1905 = vrot.lane.b32.xlu0 %v3365_v55, %s2544_s22  ;;  %vm1684_vm2 = vcmp.eq.s32.totalorder %v3490_v38, 0 }
 0x2cb   :  { %vm4395_vm1 = vmmov %vm4394_vm12 }
 0x2cc   :  { %vm1717_vm12 = vmand %vm1701_vm13, %vm4395_vm1  ;;  %vm4399_vm1 = vcmask 7168  }
 0x2cd   :  { %vm1728_vm0 = vmand %vm1701_vm13, %vm1726_vm9  ;;  %vm1740_vm13 = vcmp.eq.s32.totalorder %v3490_v38, 1 }
 0x2ce   :  { %vm1721_vm10 = vmor %vm1709_vm6, %vm1717_vm12  ;;  %vm4291_vm6 = vcmp.eq.s32.totalorder %v3412_v46, 0  ;;  %vm1774_vm12 = vcmp.eq.s32.totalorder %v3388_v36, 0 }
 0x2cf   :  { %vm1732_vm14 = vmand %vm1728_vm0, %vm3360_vm7 }
 0x2d0   :  { %vm1736_vm9 = vmor %vm1721_vm10, %vm1732_vm14  ;;  %vm4402_vm14 = vcmp.ge.s32.totalorder %v2817_v20, 1 }
 0x2d1   :  { %1923 = vrot.lane.b32.xlu1 %v3412_v46, %s2544_s22  ;;  %1847 = vrot.lane.b32.xlu2 %v3393_v17, %s2541_s6  ;;  %vm4400_vm0 = vmmov %vm4399_vm1 }
 0x2d9   :  { %1933 = vrot.lane.b32.xlu1 %v3388_v36, %s2545_s26  ;;  %1925 = vrot.lane.b32.xlu2 %v3388_v36, %s2544_s22 }
 0x2e1   :  { %1911 = vrot.lane.b32.xlu1 %v3393_v17, %s2545_s26  ;;  %1903 = vrot.lane.b32.xlu2 %v3393_v17, %s2544_s22 }
 0x2e9   :  { %1913 = vrot.lane.b32.xlu2 %v3365_v55, %s2545_s26 }
 0x31b   :  { %v1860_v61 = vpop.permute.xlu2 %1859 }
 0x323   :  { %v1870_v2 = vpop.permute.xlu2 %1869 }
 0x324   :  { %v1874_v13 = vsel %vm4400_vm0, %v1862_v0, %v1870_v2 }
 0x32b   :  { %v1848_v6 = vpop.permute.xlu2 %1847 }
 0x333   :  { %v1868_v4 = vpop.permute.xlu1 %1867  ;;  %v1926_v50 = vpop.permute.xlu2 %1925 }
 0x334   :  { %v1873_v10 = vsel %vm4399_vm1, %v1860_v61, %v1868_v4  ;;  %v1932_v54 = vpop.permute.xlu0 %1931 }
 0x33b   :  { %v1842_v47 = vpop.permute.xlu1 %1841 }
 0x33c   :  { %v1437_v11 = vpop.f32.mrf.mxu3  ;;  %v1906_v58 = vpop.permute.xlu0 %1905 }
 0x33d   :  { %v1442_v35 = vpack.c.bf16 %v1437_v11, %v1437_v11 }
 0x33f   :  { %v1449_v49 = vsel %vm4289_vm5, %v1442_v35, 0  ;;  %vm1743_vm5 = vmand %vm1739_vm11, %vm1735_vm8  ;;  %vm4398_vm11 = vcmask 1040384  }
 0x340   :  { %1458 = vmatpush.bf16.msrb.mxu2 %v1449_v49  ;;  %vm1747_vm3 = vmor %vm1683_vm4, %vm1743_vm5  ;;  %vm4397_vm5 = vcmask 1043456   ;;  %v4426_v49 = vmov 0 }
 0x341   :  { %v3499_v28 = vsel %vm1747_vm3, 1, %v2543_v22  ;;  %vm1744_vm8 = vmand %vm1740_vm13, %vm1736_vm9  ;;  %vm1881_vm9 = vcmp.eq.s32.totalorder %v1873_v10, 0  ;;  %vm4403_vm13 = vcmask 1046528  }
 0x342   :  { %1855 = vrot.lane.b32.xlu0 %v3499_v28, %s2542_s20  ;;  %vm1748_vm7 = vmor %vm1684_vm2, %vm1744_vm8  ;;  %1863 = vrot.lane.b32.xlu2 %v3499_v28, %s2541_s6  ;;  %v1803_v37 = vrot.slane %v3499_v28, 1  ;;  %v1809_v42 = vsel %vm4403_vm13, %v1806_v12, %v1808_v1 }
 0x343   :  { %2331 = vmatmul.msk.bf16.vlgmr.msrb.gmra.mxu2 %vm4290_vm15, %v3436_v57  ;;  %v3509_v59 = vsel %vm1748_vm7, 1, %v2543_v22  ;;  %v1465_v22 = vld [vmem:[%s4396_s11] sm:$0xf]  ;;  %vm4401_vm4 = vmmov %vm4398_vm11  ;;  %s2550_s11 = smov 48  }
 0x344   :  { %1599 = vmatpush.bf16.msra.mxu2 %v1590_v18  ;;  %v1439_v16 = vpop.f32.mrf.mxu3  ;;  %1857 = vrot.lane.b32.xlu1 %v3509_v59, %s2542_s20  ;;  %v3525_v60 = vsel %vm4397_vm5, %v1465_v22, 0  ;;  %v1765_v5 = vrot.slane %v3509_v59, 7  ;;  %v1760_v29 = vsel %vm4401_vm4, %v1757_v7, %v1759_v8  ;;  %vm1877_vm3 = vmand %vm4402_vm14, %vm4291_vm6  ;;  %vm1882_vm5 = vcmp.eq.s32.totalorder %v1874_v13, 0 }
 0x345   :  { %1479 = vmatpush.bf16.msrb.mxu0 %v3525_v60  ;;  %vm4404_vm2 = vmmov %vm4402_vm14  ;;  %vm1789_vm1 = vcmp.ne.s32.totalorder %v3393_v17, %v1760_v29 }
 0x346   :  { %v1768_v9 = vsel %vm4398_vm11, %v1765_v5, %v1767_v63  ;;  %vm1878_vm8 = vmand %vm4404_vm2, %vm1774_vm12 }
 0x347   :  { %vm1781_vm10 = vcmp.eq.s32.totalorder %v1768_v9, 0  ;;  %vm4405_vm7 = vmmov %vm4401_vm4 }
 0x348   :  { %v1769_v34 = vsel %vm4405_vm7, %v1767_v63, %v1763_v30  ;;  %vm1785_vm11 = vmand %vm4291_vm6, %vm1781_vm10 }
 0x349   :  { %vm4406_vm0 = vmmov %vm4403_vm13  ;;  %vm1817_vm13 = vcmp.eq.s32.totalorder %v1809_v42, 0  ;;  %vm1782_vm10 = vcmp.eq.s32.totalorder %v1769_v34, 0  ;;  %v1764_v34 = vrot.slane %v3499_v28, 7 }
 0x34a   :  { %1865 = vrot.lane.b32.xlu0 %v3509_v59, %s2541_s6  ;;  %1837 = vrot.lane.b32.xlu2 %v3490_v38, %s2542_s20  ;;  %v1810_v43 = vsel %vm4406_vm0, %v1808_v1, %v1803_v37  ;;  %vm3590_vm4 = vmand %vm1877_vm3, %vm1881_vm9 }
 0x34b   :  { %v4408_v51 = vsel %vm3590_vm4, 4294967295, %v4407_v51  ;;  %vm4409_vm14 = vmmov %vm4406_vm0 }
 0x34c   :  { %1835 = vrot.lane.b32.xlu1 %v3472_v21, %s2542_s20  ;;  %v1801_v15 = vsel %vm4409_vm14, %v1798_v25, %v1800_v27  ;;  %vm4410_vm2 = vmmov %vm4405_vm7  ;;  %vm4411_vm7 = vcmp.lt.s32.totalorder %v2853_v31, 31  ;;  %v1924_v31 = vpop.permute.xlu1 %1923  ;;  %s4496_s20 = sld [smem:[#allocation6_spill]] }
 0x34d   :  { %v1761_v23 = vsel %vm4410_vm2, %v1759_v8, %v1755_v32  ;;  %vm1814_vm0 = vmand %vm4411_vm7, %vm1774_vm12  ;;  %vm1825_vm4 = vcmp.ne.s32.totalorder %v3393_v17, %v1801_v15 }
 0x34e   :  { %vm3608_vm3 = vmand %vm1785_vm11, %vm1789_vm1  ;;  %vm1790_vm11 = vcmp.ne.s32.totalorder %v3365_v55, %v1761_v23 }
 0x34f   :  { %v4415_v52 = vsel %vm3608_vm3, 4294967295, %v4414_v52  ;;  %vm4416_vm9 = vmmov %vm4409_vm14  ;;  %vm1818_vm14 = vcmp.eq.s32.totalorder %v1810_v43, 0 }
 0x350   :  { %v1802_v53 = vsel %vm4416_vm9, %v1800_v27, %v1795_v39  ;;  %vm1821_vm2 = vmand %vm4291_vm6, %vm1817_vm13 }
 0x351   :  { %vm1822_vm1 = vmand %vm1814_vm0, %vm1818_vm14  ;;  %vm1826_vm7 = vcmp.ne.s32.totalorder %v3365_v55, %v1802_v53 }
 0x352   :  { %1843 = vrot.lane.b32.xlu0 %v3472_v21, %s2541_s6  ;;  %1919 = vrot.lane.b32.xlu2 %v3499_v28, %s2544_s22 }
 0x353   :  { %2337 = vmatmul.msk.bf16.vlgmr.msra.gmra.mxu2 %vm4290_vm15, %v1442_v35  ;;  %vm3604_vm15 = vmand %vm1878_vm8, %vm1882_vm5  ;;  %vm4417_vm8 = vcmask 7168   ;;  %v1904_v35 = vpop.permute.xlu2 %1903 }
 0x354   :  { %1845 = vrot.lane.b32.xlu1 %v3490_v38, %s2541_s6  ;;  %v4413_v24 = vsel %vm3604_vm15, 4294967295, %v4412_v24  ;;  %v1853_v33 = vsel %vm4417_vm8, %v1840_v3, %v1848_v6  ;;  %vm1786_vm5 = vmand %vm1774_vm12, %vm1782_vm10  ;;  %vm4425_vm10 = vnez %v4408_v51  ;;  %v1934_v22 = vpop.permute.xlu1 %1933  ;;  %v3668_v6 = vld [vmem:[%s4432_s21] sm:$0x3]  ;;  %s4518_s21 = sld [smem:[#allocation16_spill]] }
 0x355   :  { %vm3623_vm15 = vmand %vm1821_vm2, %vm1825_vm4  ;;  %vm1889_vm9 = vcmp.ne.s32.totalorder %v3393_v17, %v1853_v33  ;;  %vm4428_vm2 = vcmask 252928   ;;  %vm4433_vm4 = vcmp.eq.s32.totalorder %v3412_v46, 0  ;;  %v1605_v1 = vperm.slane %v3668_v6, 0 }
 0x356   :  { %v4419_v26 = vsel %vm3623_vm15, 4294967295, %v4418_v26  ;;  %vm3628_vm13 = vmand %vm1786_vm5, %vm1790_vm11  ;;  %v1937_v16 = vsel %vm4428_vm2, %v1924_v31, %v1932_v54  ;;  %vm4429_vm5 = vcmp.lt.s32.totalorder %v2817_v20, 31 }
 0x357   :  { %vm4422_vm6 = vmmov %vm4417_vm8 }
 0x358   :  { %v1854_v11 = vsel %vm4422_vm6, %v1842_v47, %v1850_v40  ;;  %vm3633_vm8 = vmand %vm1822_vm1, %vm1826_vm7  ;;  %vm4431_vm7 = vnez %v4413_v24 }
 0x359   :  { %vm3643_vm0 = vmand %vm4425_vm10, %vm1889_vm9  ;;  %vm1890_vm14 = vcmp.ne.s32.totalorder %v3365_v55, %v1854_v11 }
 0x35a   :  { %1921 = vrot.lane.b32.xlu0 %v3509_v59, %s2544_s22  ;;  %1929 = vrot.lane.b32.xlu2 %v3509_v59, %s2545_s26  ;;  %v4427_v49 = vsel %vm3643_vm0, 4294967295, %v4426_v49  ;;  %vm1834_vm6 = vmor %vm3628_vm13, %vm3633_vm8  ;;  %vm1945_vm8 = vcmp.eq.s32.totalorder %v1937_v16, 0  ;;  %v4456_v16 = vmov 0 }
 0x35b   :  { %vm1942_vm11 = vmand %vm4429_vm5, %vm1774_vm12  ;;  %v1914_v2 = vpop.permute.xlu2 %1913 }
 0x35c   :  { %1927 = vrot.lane.b32.xlu1 %v3499_v28, %s2545_s26  ;;  %vm4430_vm1 = vmmov %vm4428_vm2  ;;  %v1912_v8 = vpop.permute.xlu1 %1911 }
 0x35d   :  { %v1938_v61 = vsel %vm4430_vm1, %v1926_v50, %v1934_v22  ;;  %vm1894_vm9 = vmand %vm4431_vm7, %vm1890_vm14  ;;  %v1756_v50 = vrot.slane %v3472_v21, 7 }
 0x35e   :  { %vm1946_vm10 = vcmp.eq.s32.totalorder %v1938_v61, 0  ;;  %vm4434_vm15 = vmmov %vm4429_vm5 }
 0x35f   :  { %vm1941_vm13 = vmand %vm4434_vm15, %vm4433_vm4  ;;  %vm4437_vm15 = vnez %v4427_v49  ;;  %vm4438_vm4 = vnez %v4415_v52  ;;  %v1804_v52 = vrot.slane %v3509_v59, 1 }
 0x360   :  { %vm1950_vm2 = vmand %vm1942_vm11, %vm1946_vm10  ;;  %vm4439_vm11 = vnez %v4419_v26 }
 0x361   :  { %vm1898_vm3 = vmor %vm1834_vm6, %vm1894_vm9 }
 0x362   :  { %1899 = vrot.lane.b32.xlu0 %v3472_v21, %s2544_s22  ;;  %1907 = vrot.lane.b32.xlu2 %v3472_v21, %s2545_s26  ;;  %vm4435_vm0 = vmmov %vm4430_vm1  ;;  %vm4436_vm1 = vcmask 64512  }
 0x363   :  { %v1918_v4 = vsel %vm4435_vm0, %v1906_v58, %v1914_v2  ;;  %vm1949_vm12 = vmand %vm1941_vm13, %vm1945_vm8  ;;  %v1917_v9 = vsel %vm4435_vm0, %v1904_v35, %v1912_v8  ;;  %vm1606_vm8 = vcmp.eq.s32.totalorder %v2815_v19, %v1605_v1 }
 0x364   :  { %1901 = vrot.lane.b32.xlu1 %v3490_v38, %s2544_s22  ;;  %vm1954_vm5 = vcmp.ne.s32.totalorder %v3365_v55, %v1918_v4  ;;  %vm4440_vm6 = vmor %vm4438_vm4, %vm4439_vm11  ;;  %vm1953_vm10 = vcmp.ne.s32.totalorder %v3393_v17, %v1917_v9  ;;  %v2338_v43 = vsel %vm1606_vm8, 1.0, %v2546_v14  ;;  %vm4444_vm4 = vcmask 7168  }
 0x365   :  { %vm1958_vm14 = vmand %vm1950_vm2, %vm1954_vm5  ;;  %vm4294_vm2 = vcmask 130048   ;;  %vm4441_vm5 = vcmask 1040384   ;;  %vm1772_vm11 = vcmp.eq.s32.totalorder %v3509_v59, 0 }
 0x366   :  { %vm1962_vm7 = vmor %vm1898_vm3, %vm1958_vm14  ;;  %v1770_v23 = vsel %vm4441_vm5, %v1763_v30, %v1764_v34  ;;  %vm4443_vm14 = vcmp.ge.s32.totalorder %v2815_v19, 1  ;;  %v1796_v30 = vrot.slane %v3490_v38, 1 }
 0x367   :  { %vm1897_vm9 = vmor %vm4440_vm6, %vm4437_vm15  ;;  %v2348_v10 = vsel %vm1962_vm7, 1.0, %v2546_v14  ;;  %vm1779_vm15 = vcmp.eq.s32.totalorder %v1770_v23, 0  ;;  %vm4445_vm6 = vcmask 1046528  }
 0x368   :  { %vm1957_vm13 = vmand %vm1949_vm12, %vm1953_vm10  ;;  %vm4295_vm12 = vcmp.eq.s32.totalorder %v3499_v28, 0  ;;  %v1805_v55 = vsel %vm4445_vm6, %v1803_v37, %v1804_v52 }
 0x369   :  { %vm1961_vm3 = vmor %vm1897_vm9, %vm1957_vm13  ;;  %vm4447_vm13 = vcmp.ge.s32.totalorder %v2817_v20, 1 }
 0x36a   :  { %1909 = vrot.lane.b32.xlu0 %v3490_v38, %s2545_s26  ;;  %v2347_v27 = vsel %vm1961_vm3, 1.0, %v2546_v14  ;;  %vm1775_vm7 = vmand %vm4443_vm14, %vm4295_vm12 }
 0x36b   :  { %v1972_v47 = vpack.c.bf16 %v2348_v10, %v2347_v27  ;;  %vm1783_vm9 = vmand %vm1775_vm7, %vm1779_vm15  ;;  %vm1815_vm15 = vcmp.eq.s32.totalorder %v1805_v55, 0 }
 0x36c   :  { %vm1875_vm3 = vmand %vm4447_vm13, %vm4295_vm12 }
 0x36d   :  { %1979 = vmatpush.bf16.msra.mxu0 %v1972_v47 }
 0x39c   :  { %v1864_v13 = vpop.permute.xlu2 %1863 }
 0x3a4   :  { %v1838_v15 = vpop.permute.xlu2 %1837 }
 0x3ac   :  { %v1920_v49 = vpop.permute.xlu2 %1919 }
 0x3b4   :  { %v1856_v63 = vpop.permute.xlu0 %1855  ;;  %v1930_v8 = vpop.permute.xlu2 %1929 }
 0x3b5   :  { %v1871_v36 = vsel %vm4444_vm4, %v1856_v63, %v1864_v13  ;;  %v4464_v63 = vmov 0 }
 0x3b6   :  { %v1858_v42 = vpop.permute.xlu1 %1857  ;;  %vm1879_vm8 = vcmp.eq.s32.totalorder %v1871_v36, 0 }
 0x3bc   :  { %v1866_v29 = vpop.permute.xlu0 %1865 }
 0x3be   :  { %v1836_v26 = vpop.permute.xlu1 %1835 }
 0x3c4   :  { %v1844_v54 = vpop.permute.xlu0 %1843 }
 0x3c6   :  { %v1460_v0 = vpop.f32.mrf.mxu2 }
 0x3c7   :  { %v1464_v3 = vpack.c.bf16 %v1460_v0, %v1460_v0  ;;  %v1846_v0 = vpop.permute.xlu1 %1845 }
 0x3c9   :  { %2332 = vmatmul.msk.bf16.vlgmr.msrb.gmra.mxu0 %vm4436_vm1, %v1464_v3  ;;  %vm4442_vm1 = vmmov %vm4441_vm5  ;;  %v4462_v3 = vmov 0 }
 0x3ca   :  { %v1762_v31 = vsel %vm4442_vm1, %v1755_v32, %v1756_v50  ;;  %vm4446_vm10 = vmmov %vm4442_vm1 }
 0x3cb   :  { %vm1787_vm0 = vcmp.ne.s32.totalorder %v3472_v21, %v1762_v31  ;;  %v1766_v32 = vsel %vm4446_vm10, %v1764_v34, %v1765_v5  ;;  %vm4448_vm5 = vmmov %vm4445_vm6 }
 0x3cc   :  { %v1807_v11 = vsel %vm4448_vm5, %v1804_v52, %v1806_v12  ;;  %vm4449_vm1 = vmmov %vm4447_vm13  ;;  %v1922_v22 = vpop.permute.xlu0 %1921 }
 0x3cd   :  { %vm3720_vm14 = vmand %vm4449_vm1, %vm1772_vm11  ;;  %vm1816_vm1 = vcmp.eq.s32.totalorder %v1807_v11, 0 }
 0x3ce   :  { %v1462_v40 = vpop.f32.mrf.mxu2  ;;  %vm4452_vm7 = vmmov %vm4448_vm5 }
 0x3cf   :  { %v1797_v5 = vsel %vm4452_vm7, %v1795_v39, %v1796_v30  ;;  %vm3727_vm4 = vmand %vm1783_vm9, %vm1787_vm0  ;;  %v1799_v39 = vsel %vm4448_vm5, %v1796_v30, %v1798_v25  ;;  %vm4458_vm7 = vcmask 7168   ;;  %v1928_v13 = vpop.permute.xlu1 %1927 }
 0x3d0   :  { %vm4455_vm6 = vmmov %vm4446_vm10  ;;  %vm1780_vm10 = vcmp.eq.s32.totalorder %v1766_v32, 0  ;;  %vm1823_vm0 = vcmp.ne.s32.totalorder %v3472_v21, %v1797_v5 }
 0x3d1   :  { %v1758_v12 = vsel %vm4455_vm6, %v1756_v50, %v1757_v7  ;;  %vm3734_vm13 = vmand %vm1875_vm3, %vm1879_vm8  ;;  %v1872_v7 = vsel %vm4458_vm7, %v1858_v42, %v1866_v29  ;;  %vm4296_vm6 = vcmask 122880   ;;  %v2445_v50 = vld [vmem:[%s4478_s16] ss:$0 sm:$0xff] }
 0x3d2   :  { %v4457_v16 = vsel %vm3734_vm13, 4294967295, %v4456_v16  ;;  %vm1819_vm9 = vmand %vm4295_vm12, %vm1815_vm15  ;;  %vm1788_vm8 = vcmp.ne.s32.totalorder %v3490_v38, %v1758_v12 }
 0x3d3   :  { %vm1784_vm3 = vmand %vm1772_vm11, %vm1780_vm10 }
 0x3d4   :  { %vm1820_vm5 = vmand %vm1772_vm11, %vm1816_vm1  ;;  %v1900_v10 = vpop.permute.xlu0 %1899 }
 0x3d5   :  { %vm3753_vm15 = vmand %vm1819_vm9, %vm1823_vm0  ;;  %vm4468_vm0 = vcmask 7168  }
 0x3d6   :  { %v1601_v51 = vpop.f32.mrf.mxu2  ;;  %vm4461_vm12 = vmmov %vm4458_vm7  ;;  %vm1880_vm7 = vcmp.eq.s32.totalorder %v1872_v7, 0  ;;  %v1852_v1 = vsel %vm4468_vm0, %v1838_v15, %v1846_v0 }
 0x3d7   :  { %v1609_v24 = vmul.f32 %v2338_v43, %v1601_v51  ;;  %v1851_v2 = vsel %vm4461_vm12, %v1836_v26, %v1844_v54  ;;  %vm3758_vm13 = vmand %vm1784_vm3, %vm1788_vm8  ;;  %vm4469_vm3 = vnez %v4457_v16  ;;  %v1902_v59 = vpop.permute.xlu1 %1901  ;;  %v2446_v54 = vld [vmem:[%s4484_s30] ss:$0 sm:$0xff] }
 0x3d8   :  { %v4463_v3 = vsel %vm3758_vm13, 4294967295, %v4462_v3  ;;  %vm1831_vm1 = vmor %vm3727_vm4, %vm3753_vm15  ;;  %vm1887_vm12 = vcmp.ne.s32.totalorder %v3472_v21, %v1851_v2  ;;  %vm4470_vm4 = vcmask 252928  }
 0x3d9   :  { %v1611_v53 = vsel %vm4294_vm2, %v1609_v24, 0.0  ;;  %vm1824_vm2 = vcmp.ne.s32.totalorder %v3490_v38, %v1799_v39  ;;  %vm3775_vm9 = vmand %vm3720_vm14, %vm1880_vm7  ;;  %v1936_v40 = vsel %vm4470_vm4, %v1922_v22, %v1930_v8  ;;  %vm4472_vm14 = vcmp.lt.s32.totalorder %v2817_v20, 31 }
 0x3da   :  { %v1612_v33 = vrot.slane %v1611_v53, 4  ;;  %vm3764_vm10 = vmand %vm1820_vm5, %vm1824_vm2  ;;  %vm4471_vm5 = vcmp.eq.s32.totalorder %v3499_v28, 0  ;;  %v1908_v28 = vpop.permute.xlu2 %1907 }
 0x3db   :  { %v4465_v63 = vsel %vm3764_vm10, 4294967295, %v4464_v63  ;;  %vm1891_vm8 = vmand %vm4469_vm3, %vm1887_vm12  ;;  %vm1944_vm12 = vcmp.eq.s32.totalorder %v1936_v40, 0  ;;  %v2141_v40 = vperm.slane %v3668_v6, 1 }
 0x3dc   :  { %v1613_v41 = vadd.f32 %v1612_v33, %v1611_v53  ;;  %vm1939_vm15 = vmand %vm4472_vm14, %vm4471_vm5  ;;  %v1910_v20 = vpop.permute.xlu0 %1909 }
 0x3dd   :  { %vm4473_vm7 = vmmov %vm4470_vm4 }
 0x3de   :  { %v1614_v35 = vrot.slane %v1613_v41, 2  ;;  %v1603_v37 = vpop.f32.mrf.mxu2  ;;  %v1935_v27 = vsel %vm4473_vm7, %v1920_v49, %v1928_v13  ;;  %vm4474_vm0 = vmmov %vm4472_vm14 }
 0x3df   :  { %vm1940_vm2 = vmand %vm4474_vm0, %vm1772_vm11  ;;  %vm1943_vm10 = vcmp.eq.s32.totalorder %v1935_v27, 0  ;;  %v2118_v37 = vperm.slane %v3385_v56, 1  ;;  %v2547_v56 = vmov 16.0  }
 0x3e0   :  { %v1615_v58 = vadd.f32 %v1614_v35, %v1613_v41  ;;  %vm3797_vm13 = vmor %vm1831_vm1, %vm1891_vm8  ;;  %vm4479_vm1 = vnez %v4463_v3  ;;  %2450 = vrcp.f32 %v2547_v56 }
 0x3e1   :  { %vm1947_vm3 = vmand %vm1939_vm15, %vm1943_vm10  ;;  %vm4480_vm10 = vnez %v4465_v63 }
 0x3e2   :  { %v1616_v61 = vrot.slane %v1615_v58, 1  ;;  %vm4477_vm5 = vmmov %vm4473_vm7 }
 0x3e3   :  { %v1915_v29 = vsel %vm4477_vm5, %v1900_v10, %v1908_v28  ;;  %vm1948_vm14 = vmand %vm1940_vm2, %vm1944_vm12 }
 0x3e4   :  { %v3751_v17 = vadd.f32 %v1616_v61, %v1615_v58  ;;  %vm1951_vm7 = vcmp.ne.s32.totalorder %v3472_v21, %v1915_v29  ;;  %vm4481_vm8 = vmor %vm4479_vm1, %vm4480_vm10  ;;  %vm2119_vm1 = vcmp.eq.s32.totalorder %v2815_v19, %v2118_v37  ;;  %vm4487_vm10 = vcmask 1043456  }
 0x3e5   :  { %vm1955_vm0 = vmand %vm1947_vm3, %vm1951_vm7  ;;  %vm1486_vm3 = vcmp.eq.s32.totalorder %v2815_v19, %v2445_v50  ;;  %vm1513_vm7 = vcmp.eq.s32.totalorder %v2815_v19, %v2446_v54  ;;  %v2354_v18 = vsel %vm2119_vm1, 1.0, %v2546_v14 }
 0x3e6   :  { %v1618_v4 = vsel %vm4296_vm6, %v3751_v17, 0.0  ;;  %vm1888_vm6 = vcmp.ne.s32.totalorder %v3490_v38, %v1852_v1  ;;  %vm1959_vm11 = vmor %vm3797_vm13, %vm1955_vm0  ;;  %vm4483_vm13 = vcmask 261120   ;;  %v2333_v51 = vsel %vm1486_vm3, 1.0, %v2546_v14  ;;  %v2451_v39 = vpop.eup %2450 }
 0x3e7   :  { %1619 = vadd.xlane.f32.xlu0 %v1618_v4  ;;  %vm1892_vm4 = vmand %vm3775_vm9, %vm1888_vm6  ;;  %v2345_v21 = vsel %vm1959_vm11, 1.0, %v2546_v14  ;;  %v1489_v15 = vpack.c.bf16 %v2333_v51, %v2333_v51  ;;  %v3829_v31 = vsel %vm1513_vm7, 1.0, %v2546_v14  ;;  %vm1517_vm0 = vcmask 125952  }
 0x3e8   :  { %vm1896_vm15 = vmor %vm4481_vm8, %vm1892_vm4  ;;  %vm1495_vm4 = vcmask 1041408   ;;  %vm4486_vm11 = vcmask 122880   ;;  %v2122_v5 = vpack.c.bf16 %v2354_v18, %v2354_v18  ;;  %v1537_v22 = vmul.f32 16.0, %v2451_v39 }
 0x3e9   :  { %vm4482_vm6 = vmmov %vm4477_vm5  ;;  %vm1491_vm5 = vcmask 31744   ;;  %vm4493_vm3 = vcmask 130048  }
 0x3ea   :  { %v1916_v42 = vsel %vm4482_vm6, %v1902_v59, %v1910_v20  ;;  %v2126_v12 = vsel %vm4487_vm10, %v2122_v5, 0  ;;  %vm4488_vm8 = vmmov %vm4487_vm10  ;;  %v1538_v61 = vsub.f32 1.0, %v1537_v22 }
 0x3eb   :  { %vm1952_vm9 = vcmp.ne.s32.totalorder %v3490_v38, %v1916_v42  ;;  %v1497_v38 = vsel %vm1495_vm4, %v1489_v15, 0  ;;  %vm4494_vm4 = vmmov %vm4486_vm11 }
 0x3ec   :  { %vm1956_vm2 = vmand %vm1948_vm14, %vm1952_vm9  ;;  %1506 = vmatpush.bf16.msrb.mxu3 %v1497_v38  ;;  %v1539_v2 = vmul.f32 %v2451_v39, %v1538_v61  ;;  %vm1541_vm9 = vweird.f32 %v2451_v39 }
 0x3ed   :  { %vm1960_vm12 = vmor %vm1896_vm15, %vm1956_vm2  ;;  %vm4489_vm15 = vcmask 64512  }
 0x3ee   :  { %v2346_v34 = vsel %vm1960_vm12, 1.0, %v2546_v14  ;;  %vm4485_vm14 = vmmov %vm4483_vm13  ;;  %v1540_v63 = vadd.f32 %v2451_v39, %v1539_v2  ;;  %vm2142_vm12 = vcmp.eq.s32.totalorder %v2815_v19, %v2141_v40  ;;  %v380_v2 = vld [vmem:[%s2675_s3 + $0x28] sm:$0xff] }
 0x3ef   :  { %v1971_v43 = vpack.c.bf16 %v2346_v34, %v2345_v21  ;;  %vm4490_vm6 = vmmov %vm4489_vm15  ;;  %v2356_v20 = vsel %vm2142_vm12, 1.0, %v2546_v14  ;;  %444 = vmatpush.msrb.mxu1 %v380_v2 }
 0x3f0   :  { %1996 = vmatpush.bf16.msra.mxu3 %v3264_v62  ;;  %v1542_v1 = vsel %vm1541_vm9, %v2451_v39, %v1540_v63  ;;  %vm4491_vm2 = vmmov %vm4490_vm6  ;;  %v378_v63 = vld [vmem:[%s2675_s3 + $0x18] sm:$0xff] }
 0x3f1   :  { %1980 = vmatpush.bf16.msra.mxu0 %v1971_v43  ;;  %vm4495_vm1 = vmmov %vm4494_vm4 }
 0x3f2   :  { %vm4497_vm10 = vmmov %vm4495_vm1 }
 0x3f3   :  { %vm4499_vm9 = vmmov %vm4495_vm1 }
 0x3f4   :  { %2349 = vmatmul.msk.bf16.vlgmr.msra.gmra.mxu0 %vm4483_vm13, %v3338_v44  ;;  %1997 = vmatpush.bf16.msra.mxu3 %v3343_v45  ;;  %vm4492_vm13 = vmmov %vm4486_vm11 }
 0x3f5   :  { %2031 = vmatpush.bf16.msrb.mxu0 %v3525_v60 }
 0x446   :  { %v1481_v23 = vpop.f32.mrf.mxu0 }
 0x447   :  { %v1490_v60 = vpack.c.bf16 %v1481_v23, %v1481_v23  ;;  %v2548_v23 = vmov 15.0  }
 0x448   :  { %2452 = vrcp.f32 %v2548_v23 }
 0x449   :  { %2334 = vmatmul.msk.bf16.vlgmr.msrb.gmra.mxu3 %vm1491_vm5, %v1490_v60 }
 0x44a   :  { %2048 = vmatpush.bf16.msrb.mxu3 %v1497_v38 }
 0x44e   :  { %v1483_v44 = vpop.f32.mrf.mxu0  ;;  %v2453_v60 = vpop.eup %2452 }
 0x44f   :  { %v1559_v14 = vmul.f32 15.0, %v2453_v60 }
 0x451   :  { %v1560_v44 = vsub.f32 1.0, %v1559_v14 }
 0x453   :  { %v1561_v54 = vmul.f32 %v2453_v60, %v1560_v44 }
 0x471   :  { %v1982_v24 = vpop.f32.mrf.mxu0 }
 0x472   :  { %v1986_v52 = vpack.c.bf16 %v1982_v24, %v1982_v24 }
 0x474   :  { %2350 = vmatmul.msk.bf16.vlgmr.msra.gmra.mxu3 %vm4485_vm14, %v1986_v52  ;;  %vm1563_vm14 = vweird.f32 %v2453_v60 }
 0x479   :  { %v1984_v53 = vpop.f32.mrf.mxu0 }
 0x4cc   :  { %v1508_v62 = vpop.f32.mrf.mxu3 }
 0x4cd   :  { %v1516_v45 = vmul.f32 %v3829_v31, %v1508_v62 }
 0x4cf   :  { %v1518_v33 = vsel %vm1517_vm0, %v1516_v45, 0.0 }
 0x4d0   :  { %v1519_v36 = vrot.slane %v1518_v33, 4 }
 0x4d2   :  { %v1520_v30 = vadd.f32 %v1519_v36, %v1518_v33  ;;  %v1562_v33 = vadd.f32 %v2453_v60, %v1561_v54  ;;  %v367_v54 = vld [vmem:[%s4496_s20 + $0x40] sm:$0xff] }
 0x4d4   :  { %v1521_v26 = vrot.slane %v1520_v30, 2  ;;  %v1510_v55 = vpop.f32.mrf.mxu3 }
 0x4d6   :  { %v1522_v41 = vadd.f32 %v1521_v26, %v1520_v30  ;;  %v1564_v26 = vsel %vm1563_vm14, %v2453_v60, %v1562_v33  ;;  %v370_v33 = vld [vmem:[%s4496_s20 + $0x58] sm:$0xff] }
 0x4d8   :  { %v1523_v32 = vrot.slane %v1522_v41, 1 }
 0x4da   :  { %v1524_v11 = vadd.f32 %v1523_v32, %v1522_v41 }
 0x4dc   :  { %v1526_v35 = vsel %vm4486_vm11, %v1524_v11, 0.0 }
 0x4dd   :  { %1527 = vadd.xlane.f32.xlu1 %v1526_v35 }
 0x4f7   :  { %v1999_v49 = vpop.f32.mrf.mxu3 }
 0x4f8   :  { %v2003_v46 = vpack.c.bf16 %v1999_v49, %v1999_v49 }
 0x4fa   :  { %v2005_v58 = vsel %vm4488_vm8, %v2003_v46, 0 }
 0x4fb   :  { %2014 = vmatpush.bf16.msrb.mxu2 %v2005_v58 }
 0x4fe   :  { %2351 = vmatmul.msk.bf16.vlgmr.msrb.gmra.mxu2 %vm4489_vm15, %v3436_v57 }
 0x4ff   :  { %2135 = vmatpush.bf16.msra.mxu2 %v2126_v12  ;;  %v2001_v16 = vpop.f32.mrf.mxu3 }
 0x50e   :  { %2355 = vmatmul.msk.bf16.vlgmr.msra.gmra.mxu2 %vm4490_vm6, %v2003_v46 }
 0x550   :  { %v1528_v7 = vpop.xlane.xlu1 %1527 }
 0x551   :  { %v1529_v0 = vrot.slane %v1528_v7, 4 }
 0x553   :  { %v1530_v25 = vadd.f32 %v1529_v0, %v1528_v7 }
 0x555   :  { %v1531_v3 = vrot.slane %v1530_v25, 2 }
 0x557   :  { %v1532_v4 = vadd.f32 %v1531_v3, %v1530_v25  ;;  %v379_v3 = vld [vmem:[%s2675_s3 + $0x20] sm:$0xff] }
 0x558   :  { %445 = vmatpush.msrb.mxu1 %v379_v3 }
 0x559   :  { %v1533_v8 = vrot.slane %v1532_v4, 1 }
 0x55a   :  { %446 = vmatpush.msrb.mxu1 %v378_v63 }
 0x55b   :  { %v1534_v9 = vadd.f32 %v1533_v8, %v1532_v4 }
 0x55d   :  { %2367 = vpush %v1534_v9 }
 0x55e   :  { %2369 = vpush %v1542_v1 }
 0x581   :  { %v2016_v57 = vpop.f32.mrf.mxu2 }
 0x582   :  { %v2020_v10 = vpack.c.bf16 %v2016_v57, %v2016_v57 }
 0x584   :  { %2352 = vmatmul.msk.bf16.vlgmr.msrb.gmra.mxu0 %vm4491_vm2, %v2020_v10  ;;  %vm4500_vm2 = vcmask 261120  }
 0x585   :  { %vm4501_vm12 = vmmov %vm4500_vm2 }
 0x586   :  { %vm4505_vm14 = vmmov %vm4500_vm2 }
 0x589   :  { %v2018_v27 = vpop.f32.mrf.mxu2 }
 0x58e   :  { %s2368_s18 = spop %2367 }
 0x58f   :  { %s3843_s23 = spop %2369 }
 0x590   :  { %s1544_s25 = smul.f32 %s3843_s23, %s2368_s18 }
 0x591   :  { %v2137_v59 = vpop.f32.mrf.mxu2 }
 0x592   :  { %v1545_v13 = vstv %s1544_s25  ;;  %v2145_v42 = vmul.f32 %v2356_v20, %v2137_v59  ;;  %v376_v59 = vld [vmem:[%s2675_s3 + $0x8] sm:$0xff] }
 0x593   :  { %v3847_v47 = vsub.f32 %v1524_v11, %v1545_v13  ;;  %v1620_v11 = vpop.xlane.xlu0 %1619 }
 0x594   :  { %v2146_v21 = vsel %vm4493_vm3, %v2145_v42, 0.0  ;;  %v1621_v35 = vrot.slane %v1620_v11, 4  ;;  %v375_v42 = vld [vmem:[%s2675_s3] sm:$0xff]  ;;  %vm4503_vm3 = vmmov %vm4500_vm2 }
 0x595   :  { %v1547_v28 = vmul.f32 %v3847_v47, %v3847_v47  ;;  %v2147_v34 = vrot.slane %v2146_v21, 4 }
 0x596   :  { %v1622_v18 = vadd.f32 %v1621_v35, %v1620_v11 }
 0x597   :  { %v1548_v29 = vsel %vm4492_vm13, %v1547_v28, 0.0  ;;  %v2148_v6 = vadd.f32 %v2147_v34, %v2146_v21  ;;  %v359_v21 = vld [vmem:[%s4496_s20] sm:$0xff]  ;;  %v360_v34 = vld [vmem:[%s4496_s20 + $0x8] sm:$0xff]  ;;  %vm4502_vm13 = vmmov %vm4500_vm2 }
 0x598   :  { %1549 = vadd.xlane.f32.xlu2 %v1548_v29  ;;  %v1623_v5 = vrot.slane %v1622_v18, 2 }
 0x599   :  { %v2149_v43 = vrot.slane %v2148_v6, 2  ;;  %v2139_v50 = vpop.f32.mrf.mxu2 }
 0x59a   :  { %v1624_v58 = vadd.f32 %v1623_v5, %v1622_v18  ;;  %v363_v50 = vld [vmem:[%s4496_s20 + $0x20] sm:$0xff]  ;;  %v373_v18 = vld [vmem:[%s4496_s20 + $0x70] sm:$0xff] }
 0x59b   :  { %v2150_v51 = vadd.f32 %v2149_v43, %v2148_v6  ;;  %v361_v6 = vld [vmem:[%s4496_s20 + $0x10] sm:$0xff]  ;;  %v362_v43 = vld [vmem:[%s4496_s20 + $0x18] sm:$0xff] }
 0x59c   :  { %v1625_v39 = vrot.slane %v1624_v58, 1 }
 0x59d   :  { %v2151_v15 = vrot.slane %v2150_v51, 1 }
 0x59e   :  { %v1626_v7 = vadd.f32 %v1625_v39, %v1624_v58 }
 0x59f   :  { %v3855_v38 = vadd.f32 %v2151_v15, %v2150_v51 }
 0x5a1   :  { %v2153_v19 = vsel %vm4494_vm4, %v3855_v38, 0.0  ;;  %vm4504_vm4 = vmmov %vm4500_vm2 }
 0x5a2   :  { %2154 = vadd.xlane.f32.xlu0 %v2153_v19  ;;  %v364_v19 = vld [vmem:[%s4496_s20 + $0x28] sm:$0xff] }
 0x601   :  { %v2033_v55 = vpop.f32.mrf.mxu0 }
 0x602   :  { %v2037_v41 = vpack.c.bf16 %v2033_v55, %v2033_v55 }
 0x604   :  { %2353 = vmatmul.msk.bf16.vlgmr.msrb.gmra.mxu3 %vm1491_vm5, %v2037_v41  ;;  %v372_v41 = vld [vmem:[%s4496_s20 + $0x68] sm:$0xff] }
 0x609   :  { %v2035_v32 = vpop.f32.mrf.mxu0 }
 0x60b   :  { %v1550_v24 = vpop.xlane.xlu2 %1549 }
 0x60c   :  { %v1551_v52 = vrot.slane %v1550_v24, 4 }
 0x60e   :  { %v1552_v53 = vadd.f32 %v1551_v52, %v1550_v24  ;;  %v365_v24 = vld [vmem:[%s4496_s20 + $0x30] sm:$0xff] }
 0x610   :  { %v1553_v62 = vrot.slane %v1552_v53, 2 }
 0x612   :  { %v1554_v45 = vadd.f32 %v1553_v62, %v1552_v53  ;;  %v366_v53 = vld [vmem:[%s4496_s20 + $0x38] sm:$0xff]  ;;  %v368_v62 = vld [vmem:[%s4496_s20 + $0x48] sm:$0xff] }
 0x614   :  { %v1555_v36 = vrot.slane %v1554_v45, 1 }
 0x616   :  { %v1556_v30 = vadd.f32 %v1555_v36, %v1554_v45  ;;  %v369_v45 = vld [vmem:[%s4496_s20 + $0x50] sm:$0xff]  ;;  %v371_v36 = vld [vmem:[%s4496_s20 + $0x60] sm:$0xff] }
 0x618   :  { %2371 = vpush %v1556_v30 }
 0x619   :  { %2373 = vpush %v1564_v26 }
 0x649   :  { %s2372_s0 = spop %2371 }
 0x64a   :  { %s3860_s5 = spop %2373 }
 0x64b   :  { %s1566_s9 = smul.f32 %s3860_s5, %s2372_s0  ;;  %s2553_s0 = smov 80  }
 0x64d   :  { %s1567_s13 = sadd.f32 1e-06, %s1566_s9 }
 0x64f   :  { %v1568_v37 = vstv %s1567_s13 }
 0x650   :  { %2454 = vrsqrt.f32 %v1568_v37  ;;  %vm1575_vm7 = vweird.f32 %v1568_v37 }
 0x656   :  { %v2455_v49 = vpop.eup %2454 }
 0x657   :  { %v1570_v46 = vmul.f32 %v2455_v49, %v1568_v37  ;;  %vm1576_vm5 = vweird.f32 %v2455_v49 }
 0x658   :  { %vm1577_vm11 = vmor %vm1575_vm7, %vm1576_vm5 }
 0x659   :  { %v1571_v12 = vmul.f32 %v2455_v49, %v1570_v46  ;;  %vm4506_vm5 = vmmov %vm4500_vm2 }
 0x65a   :  { %vm4507_vm7 = vmmov %vm4500_vm2 }
 0x65b   :  { %v1572_v16 = vmul.f32 0.5, %v1571_v12 }
 0x65d   :  { %v1573_v56 = vsub.f32 1.5, %v1572_v16 }
 0x65f   :  { %v1574_v22 = vmul.f32 %v2455_v49, %v1573_v56  ;;  %v374_v56 = vld [vmem:[%s4496_s20 + $0x78] sm:$0xff] }
 0x661   :  { %v1578_v61 = vsel %vm1577_vm11, %v2455_v49, %v1574_v22  ;;  %vm4508_vm11 = vmmov %vm4500_vm2 }
 0x662   :  { %2375 = vpush %v1578_v61 }
 0x663   :  { %2377 = vpush %v1626_v7 }
 0x687   :  { %v2050_v9 = vpop.f32.mrf.mxu3 }
 0x688   :  { %v2054_v1 = vmul.f32 %v3829_v31, %v2050_v9  ;;  %v377_v31 = vld [vmem:[%s2675_s3 + $0x10] sm:$0xff] }
 0x689   :  { %447 = vmatpush.msrb.mxu1 %v377_v31 }
 0x68b   :  { %448 = vmatpush.msrb.mxu1 %v376_v59 }
 0x68d   :  { %449 = vmatpush.msrb.mxu1 %v375_v42 }
 0x68f   :  { %v2052_v13 = vpop.f32.mrf.mxu3 }
 0x693   :  { %s3863_s24 = spop %2375 }
 0x694   :  { %s2378_s6 = spop %2377 }
 0x695   :  { %s1636_s12 = smul.f32 %s2378_s6, %s3843_s23 }
 0x697   :  { %v1637_v0 = vstv %s1636_s12 }
 0x698   :  { %v3867_v25 = vsub.f32 %v3751_v17, %v1637_v0  ;;  %v2055_v17 = vsel %vm1517_vm0, %v2054_v1, 0.0  ;;  %vm385_vm0 = vcmask 392192   ;;  %v3928_v1 = vld [vmem:[%s4498_s17] ss:$0 sm:$0xff] }
 0x699   :  { %v2056_v57 = vrot.slane %v2055_v17, 4  ;;  %2287 = vmatmul.msk.f32.vlgmr.msrb.gmra.mxu1 %vm385_vm0, %v359_v21 }
 0x69a   :  { %v1639_v4 = vmul.f32 %v3867_v25, %v3867_v25 }
 0x69b   :  { %v2057_v10 = vadd.f32 %v2056_v57, %v2055_v17 }
 0x69c   :  { %v1640_v8 = vsel %vm4495_vm1, %v1639_v4, 0.0  ;;  %vm4509_vm1 = vmmov %vm4500_vm2 }
 0x69d   :  { %1641 = vadd.xlane.f32.xlu2 %v1640_v8  ;;  %v2058_v40 = vrot.slane %v2057_v10, 2 }
 0x69f   :  { %v2059_v27 = vadd.f32 %v2058_v40, %v2057_v10 }
 0x6a1   :  { %v2060_v28 = vrot.slane %v2059_v27, 1  ;;  %2288 = vmatmul.msk.f32.gmra.mxu1 %vm385_vm0, %v360_v34 }
 0x6a3   :  { %v3877_v29 = vadd.f32 %v2060_v28, %v2059_v27 }
 0x6a5   :  { %v2062_v20 = vsel %vm4497_vm10, %v3877_v29, 0.0  ;;  %vm4510_vm10 = vmmov %vm4509_vm1 }
 0x6a6   :  { %2063 = vadd.xlane.f32.xlu1 %v2062_v20 }
 0x6a9   :  { %2289 = vmatmul.msk.f32.gmra.mxu1 %vm385_vm0, %v361_v6 }
 0x6b1   :  { %2290 = vmatmul.msk.f32.gmra.mxu1 %vm385_vm0, %v362_v43 }
 0x6b9   :  { %2291 = vmatmul.msk.f32.gmra.mxu1 %vm385_vm0, %v363_v50 }
 0x6c1   :  { %2292 = vmatmul.msk.f32.gmra.mxu1 %vm385_vm0, %v364_v19 }
 0x6c9   :  { %2293 = vmatmul.msk.f32.gmra.mxu1 %vm385_vm0, %v365_v24 }
 0x6d1   :  { %2294 = vmatmul.msk.f32.gmra.mxu1 %vm385_vm0, %v366_v53 }
 0x6d9   :  { %2295 = vmatmul.msk.f32.gmra.mxu1 %vm385_vm0, %v367_v54 }
 0x6e1   :  { %2296 = vmatmul.msk.f32.gmra.mxu1 %vm385_vm0, %v368_v62 }
 0x6e9   :  { %2297 = vmatmul.msk.f32.gmra.mxu1 %vm385_vm0, %v369_v45 }
 0x6f1   :  { %2298 = vmatmul.msk.f32.gmra.mxu1 %vm385_vm0, %v370_v33 }
 0x6f9   :  { %2299 = vmatmul.msk.f32.gmra.mxu1 %vm385_vm0, %v371_v36 }
 0x701   :  { %2300 = vmatmul.msk.f32.gmra.mxu1 %vm385_vm0, %v372_v41 }
 0x709   :  { %2301 = vmatmul.msk.f32.gmra.mxu1 %vm385_vm0, %v373_v18 }
 0x710   :  { %v1642_v51 = vpop.xlane.xlu2 %1641 }
 0x711   :  { %v1643_v15 = vrot.slane %v1642_v51, 4  ;;  %2302 = vmatmul.msk.f32.gmra.mxu1 %vm385_vm0, %v374_v56 }
 0x713   :  { %v1644_v23 = vadd.f32 %v1643_v15, %v1642_v51 }
 0x715   :  { %v1645_v60 = vrot.slane %v1644_v23, 2 }
 0x716   :  { %v451_v61 = vpop.f32.mrf.mxu1 }
 0x717   :  { %v1646_v14 = vadd.f32 %v1645_v60, %v1644_v23  ;;  %v452_v10 = vadd.f32 %v3928_v1, %v451_v61 }
 0x719   :  { %v1647_v44 = vrot.slane %v1646_v14, 1  ;;  %v2064_v30 = vpop.xlane.xlu1 %2063  ;;  %v499_v13 = vsel %vm4500_vm2, %v452_v10, 0.0  ;;  %vm4514_vm2 = vmmov %vm4509_vm1 }
 0x71a   :  { %v2065_v26 = vrot.slane %v2064_v30, 4 }
 0x71b   :  { %v1648_v52 = vadd.f32 %v1647_v44, %v1646_v14 }
 0x71c   :  { %v2066_v32 = vadd.f32 %v2065_v26, %v2064_v30  ;;  %v2549_v26 = vmov 32.0  }
 0x71d   :  { %2379 = vpush %v1648_v52 }
 0x71e   :  { %v2067_v11 = vrot.slane %v2066_v32, 2  ;;  %v454_v7 = vpop.f32.mrf.mxu1 }
 0x71f   :  { %v3943_v20 = vadd.f32 %v3928_v1, %v454_v7 }
 0x720   :  { %v2068_v49 = vadd.f32 %v2067_v11, %v2066_v32 }
 0x721   :  { %v502_v42 = vsel %vm4502_vm13, %v3943_v20, 0.0  ;;  %vm4516_vm13 = vmmov %vm4509_vm1 }
 0x722   :  { %v2069_v58 = vrot.slane %v2068_v49, 1  ;;  %503 = vadd.xlane.f32.xlu0 %v502_v42 }
 0x724   :  { %v2070_v22 = vadd.f32 %v2069_v58, %v2068_v49 }
 0x726   :  { %v3917_v0 = vpop.f32.mrf.mxu1 }
 0x72e   :  { %v460_v2 = vpop.f32.mrf.mxu1 }
 0x72f   :  { %v3936_v27 = vadd.f32 %v3928_v1, %v460_v2 }
 0x736   :  { %v463_v3 = vpop.f32.mrf.mxu1 }
 0x737   :  { %v3953_v34 = vadd.f32 %v3928_v1, %v463_v3 }
 0x739   :  { %v511_v50 = vsel %vm4504_vm4, %v3953_v34, 0.0 }
 0x73a   :  { %512 = vadd.xlane.f32.xlu0 %v511_v50 }
 0x73e   :  { %v3919_v4 = vpop.f32.mrf.mxu1 }
 0x746   :  { %v469_v8 = vpop.f32.mrf.mxu1 }
 0x747   :  { %v3946_v31 = vadd.f32 %v3928_v1, %v469_v8 }
 0x749   :  { %v517_v21 = vsel %vm4503_vm3, %v3946_v31, 0.0 }
 0x74e   :  { %s2380_s3 = spop %2379  ;;  %v472_v40 = vpop.f32.mrf.mxu1 }
 0x74f   :  { %s1658_s22 = smul.f32 %s2380_s3, %s3860_s5  ;;  %v3963_v15 = vadd.f32 %v3928_v1, %v472_v40 }
 0x751   :  { %s1659_s26 = sadd.f32 1e-06, %s1658_s22  ;;  %v520_v23 = vsel %vm4506_vm5, %v3963_v15, 0.0  ;;  %vm4517_vm5 = vcmask 122880  }
 0x752   :  { %521 = vadd.xlane.f32.xlu0 %v520_v23 }
 0x753   :  { %v1660_v55 = vstv %s1659_s26 }
 0x754   :  { %2456 = vrsqrt.f32 %v1660_v55  ;;  %vm1667_vm15 = vweird.f32 %v1660_v55 }
 0x755   :  { %2458 = vrcp.f32 %v2549_v26 }
 0x756   :  { %v3938_v28 = vpop.f32.mrf.mxu1 }
 0x75a   :  { %v2457_v35 = vpop.eup %2456 }
 0x75b   :  { %v1662_v37 = vmul.f32 %v2457_v35, %v1660_v55  ;;  %vm1668_vm8 = vweird.f32 %v2457_v35  ;;  %v2459_v55 = vpop.eup %2458 }
 0x75c   :  { %vm1669_vm6 = vmor %vm1667_vm15, %vm1668_vm8  ;;  %v548_v41 = vmul.f32 32.0, %v2459_v55  ;;  %vm552_vm8 = vweird.f32 %v2459_v55 }
 0x75d   :  { %v1663_v5 = vmul.f32 %v2457_v35, %v1662_v37  ;;  %vm4511_vm15 = vmmov %vm4509_vm1 }
 0x75e   :  { %v478_v59 = vpop.f32.mrf.mxu1  ;;  %v549_v32 = vsub.f32 1.0, %v548_v41 }
 0x75f   :  { %v1664_v46 = vmul.f32 0.5, %v1663_v5  ;;  %v3956_v6 = vadd.f32 %v3928_v1, %v478_v59 }
 0x760   :  { %v550_v11 = vmul.f32 %v2459_v55, %v549_v32 }
 0x761   :  { %v1665_v12 = vsub.f32 1.5, %v1664_v46  ;;  %v526_v51 = vsel %vm4505_vm14, %v3956_v6, 0.0 }
 0x762   :  { %v551_v18 = vadd.f32 %v2459_v55, %v550_v11 }
 0x763   :  { %v1666_v16 = vmul.f32 %v2457_v35, %v1665_v12 }
 0x764   :  { %v3988_v46 = vsel %vm552_vm8, %v2459_v55, %v551_v18 }
 0x765   :  { %v1670_v39 = vsel %vm1669_vm6, %v2457_v35, %v1666_v16  ;;  %vm4512_vm6 = vmmov %vm4509_vm1 }
 0x766   :  { %2381 = vpush %v1670_v39  ;;  %v481_v43 = vpop.f32.mrf.mxu1 }
 0x767   :  { %2383 = vpush %v2070_v22  ;;  %v3979_v45 = vadd.f32 %v3928_v1, %v481_v43 }
 0x769   :  { %v529_v33 = vsel %vm4509_vm1, %v3979_v45, 0.0 }
 0x76a   :  { %530 = vadd.xlane.f32.xlu0 %v529_v33 }
 0x76e   :  { %v3965_v19 = vpop.f32.mrf.mxu1 }
 0x776   :  { %v487_v60 = vpop.f32.mrf.mxu1 }
 0x777   :  { %v488_v14 = vadd.f32 %v3928_v1, %v487_v60 }
 0x779   :  { %v535_v44 = vsel %vm4507_vm7, %v488_v14, 0.0 }
 0x77e   :  { %v490_v24 = vpop.f32.mrf.mxu1 }
 0x77f   :  { %v3984_v36 = vadd.f32 %v3928_v1, %v490_v24 }
 0x781   :  { %v538_v30 = vsel %vm4510_vm10, %v3984_v36, 0.0  ;;  %vm4519_vm10 = vmmov %vm4514_vm2 }
 0x782   :  { %539 = vadd.xlane.f32.xlu0 %v538_v30 }
 0x786   :  { %v3971_v52 = vpop.f32.mrf.mxu1 }
 0x78e   :  { %v496_v53 = vpop.f32.mrf.mxu1 }
 0x78f   :  { %v3974_v54 = vadd.f32 %v3928_v1, %v496_v53 }
 0x791   :  { %v544_v62 = vsel %vm4508_vm11, %v3974_v54, 0.0 }
 0x797   :  { %s3921_s8 = spop %2381 }
 0x798   :  { %s2384_s27 = spop %2383 }
 0x799   :  { %s2080_s4 = smul.f32 %s2384_s27, %s3843_s23 }
 0x79b   :  { %v2081_v63 = vstv %s2080_s4 }
 0x79c   :  { %v3925_v9 = vsub.f32 %v3877_v29, %v2081_v63  ;;  %v508_v29 = vsel %vm4501_vm12, %v3936_v27, 0.0  ;;  %vm4515_vm12 = vmmov %vm4509_vm1 }
 0x79e   :  { %v2083_v17 = vmul.f32 %v3925_v9, %v3925_v9 }
 0x7a0   :  { %v2084_v57 = vsel %vm4499_vm9, %v2083_v17, 0.0  ;;  %vm4513_vm9 = vmmov %vm4509_vm1 }
 0x7a1   :  { %2085 = vadd.xlane.f32.xlu2 %v2084_v57 }
 0x7a9   :  { %500 = vadd.xlane.f32.xlu2 %v499_v13 }
 0x7b1   :  { %509 = vadd.xlane.f32.xlu2 %v508_v29 }
 0x7b9   :  { %518 = vadd.xlane.f32.xlu2 %v517_v21 }
 0x7c1   :  { %527 = vadd.xlane.f32.xlu2 %v526_v51 }
 0x7c9   :  { %536 = vadd.xlane.f32.xlu2 %v535_v44  ;;  %v2155_v44 = vpop.xlane.xlu0 %2154 }
 0x7d1   :  { %545 = vadd.xlane.f32.xlu2 %v544_v62 }
 0x814   :  { %v2086_v35 = vpop.xlane.xlu2 %2085 }
 0x815   :  { %v2087_v37 = vrot.slane %v2086_v35, 4 }
 0x817   :  { %v2088_v5 = vadd.f32 %v2087_v37, %v2086_v35 }
 0x819   :  { %v2089_v49 = vrot.slane %v2088_v5, 2 }
 0x81b   :  { %v2090_v12 = vadd.f32 %v2089_v49, %v2088_v5  ;;  %v4031_v49 = vpop.xlane.xlu0 %503 }
 0x81c   :  { %v501_v58 = vpop.xlane.xlu2 %500 }
 0x81d   :  { %v554_v16 = vmul.f32 %v3988_v46, %v501_v58  ;;  %v2091_v56 = vrot.slane %v2090_v12, 1 }
 0x81f   :  { %v3991_v39 = vsub.f32 %v452_v10, %v554_v16  ;;  %v2092_v22 = vadd.f32 %v2091_v56, %v2090_v12 }
 0x821   :  { %2385 = vpush %v2092_v22  ;;  %v586_v61 = vmul.f32 %v3991_v39, %v3991_v39 }
 0x823   :  { %v602_v7 = vsel %vm4511_vm15, %v586_v61, 0.0  ;;  %v4033_v16 = vpop.xlane.xlu0 %512 }
 0x824   :  { %603 = vadd.xlane.f32.xlu0 %v602_v7  ;;  %v510_v2 = vpop.xlane.xlu2 %509 }
 0x825   :  { %v557_v3 = vmul.f32 %v3988_v46, %v510_v2 }
 0x827   :  { %v3998_v63 = vsub.f32 %v3936_v27, %v557_v3 }
 0x829   :  { %v589_v8 = vmul.f32 %v3998_v63, %v3998_v63 }
 0x82b   :  { %v611_v17 = vsel %vm4512_vm6, %v589_v8, 0.0  ;;  %v4035_v56 = vpop.xlane.xlu0 %521 }
 0x82c   :  { %612 = vadd.xlane.f32.xlu0 %v611_v17  ;;  %v519_v57 = vpop.xlane.xlu2 %518 }
 0x82d   :  { %v560_v10 = vmul.f32 %v3988_v46, %v519_v57 }
 0x82f   :  { %v4005_v40 = vsub.f32 %v3946_v31, %v560_v10 }
 0x831   :  { %v592_v13 = vmul.f32 %v4005_v40, %v4005_v40 }
 0x833   :  { %v620_v29 = vsel %vm4513_vm9, %v592_v13, 0.0  ;;  %v4037_v22 = vpop.xlane.xlu0 %530  ;;  %vm4520_vm9 = vmmov %vm4514_vm2 }
 0x834   :  { %621 = vadd.xlane.f32.xlu0 %v620_v29  ;;  %v528_v27 = vpop.xlane.xlu2 %527 }
 0x835   :  { %v563_v59 = vmul.f32 %v3988_v46, %v528_v27 }
 0x837   :  { %v4012_v42 = vsub.f32 %v3956_v6, %v563_v59  ;;  %v2156_v6 = vrot.slane %v2155_v44, 4 }
 0x839   :  { %v595_v21 = vmul.f32 %v4012_v42, %v4012_v42  ;;  %v2157_v53 = vadd.f32 %v2156_v6, %v2155_v44 }
 0x83b   :  { %v629_v43 = vsel %vm4514_vm2, %v595_v21, 0.0  ;;  %v2158_v30 = vrot.slane %v2157_v53, 2  ;;  %v4039_v61 = vpop.xlane.xlu0 %539 }
 0x83c   :  { %630 = vadd.xlane.f32.xlu0 %v629_v43  ;;  %v537_v31 = vpop.xlane.xlu2 %536 }
 0x83d   :  { %v566_v50 = vmul.f32 %v3988_v46, %v537_v31  ;;  %v2159_v11 = vadd.f32 %v2158_v30, %v2157_v53 }
 0x83f   :  { %v4018_v51 = vsub.f32 %v488_v14, %v566_v50  ;;  %v2160_v5 = vrot.slane %v2159_v11, 1 }
 0x841   :  { %v598_v23 = vmul.f32 %v4018_v51, %v4018_v51  ;;  %v2161_v58 = vadd.f32 %v2160_v5, %v2159_v11 }
 0x843   :  { %v638_v60 = vsel %vm4515_vm12, %v598_v23, 0.0 }
 0x844   :  { %639 = vadd.xlane.f32.xlu0 %v638_v60  ;;  %v546_v62 = vpop.xlane.xlu2 %545 }
 0x845   :  { %v569_v33 = vmul.f32 %v3988_v46, %v546_v62 }
 0x847   :  { %v4026_v14 = vsub.f32 %v3974_v54, %v569_v33  ;;  %v4057_v33 = vld [vmem:[%s4518_s21] ss:$0 sm:$0xff] }
 0x849   :  { %v601_v41 = vmul.f32 %v4026_v14, %v4026_v14 }
 0x84b   :  { %v647_v35 = vsel %vm4516_vm13, %v601_v41, 0.0  ;;  %v4066_v41 = vld [vmem:[%s2690_s14] ss:$0 sm:$0xff]  ;;  %s2551_s14 = smov 64  }
 0x84c   :  { %648 = vadd.xlane.f32.xlu0 %v647_v35 }
 0x852   :  { %s2386_s1 = spop %2385 }
 0x853   :  { %s2102_s28 = smul.f32 %s2386_s1, %s3860_s5 }
 0x855   :  { %s2103_s2 = sadd.f32 1e-06, %s2102_s28 }
 0x857   :  { %v2104_v24 = vstv %s2103_s2 }
 0x858   :  { %2460 = vrsqrt.f32 %v2104_v24  ;;  %vm2111_vm4 = vweird.f32 %v2104_v24 }
 0x85e   :  { %v2461_v26 = vpop.eup %2460 }
 0x85f   :  { %v2106_v55 = vmul.f32 %v2461_v26, %v2104_v24  ;;  %vm2112_vm3 = vweird.f32 %v2461_v26 }
 0x860   :  { %vm2113_vm14 = vmor %vm2111_vm4, %vm2112_vm3 }
 0x861   :  { %v2107_v32 = vmul.f32 %v2461_v26, %v2106_v55  ;;  %vm4521_vm3 = vmmov %vm4514_vm2 }
 0x863   :  { %v2108_v37 = vmul.f32 0.5, %v2107_v32 }
 0x865   :  { %v2109_v18 = vsub.f32 1.5, %v2108_v37 }
 0x867   :  { %v2110_v12 = vmul.f32 %v2461_v26, %v2109_v18 }
 0x869   :  { %v2114_v54 = vsel %vm2113_vm14, %v2461_v26, %v2110_v12  ;;  %vm4522_vm14 = vmmov %vm4514_vm2 }
 0x86a   :  { %2387 = vpush %v2114_v54 }
 0x86b   :  { %2389 = vpush %v2161_v58 }
 0x897   :  { %v604_v7 = vpop.xlane.xlu0 %603 }
 0x898   :  { %v650_v2 = vmul.f32 %v604_v7, %v3988_v46 }
 0x89a   :  { %v666_v3 = vadd.f32 1e-05, %v650_v2 }
 0x89b   :  { %s2388_s19 = spop %2387 }
 0x89c   :  { %2462 = vrsqrt.f32 %v666_v3  ;;  %v2116_v8 = vstv %s2388_s19  ;;  %s2390_s29 = spop %2389  ;;  %vm688_vm7 = vweird.f32 %v666_v3 }
 0x89d   :  { %v2117_v17 = vmul.f32 %v2116_v8, %v3925_v9  ;;  %s2171_s7 = smul.f32 %s2390_s29, %s3843_s23  ;;  %v4078_v8 = vadd.f32 %v3928_v1, %v3938_v28  ;;  %s2552_s23 = smov 32  }
 0x89f   :  { %v2172_v57 = vstv %s2171_s7  ;;  %2214 = vrot.lane.b32.xlu0 %v2117_v17, %s2550_s11  ;;  %v613_v10 = vpop.xlane.xlu0 %612 }
 0x8a0   :  { %v4045_v13 = vsub.f32 %v3855_v38, %v2172_v57  ;;  %v653_v29 = vmul.f32 %v613_v10, %v3988_v46  ;;  %v4053_v38 = vadd.f32 %v3928_v1, %v3917_v0  ;;  %v4063_v0 = vadd.f32 %v3928_v1, %v3919_v4 }
 0x8a2   :  { %v2463_v27 = vpop.eup %2462  ;;  %v2174_v59 = vmul.f32 %v4045_v13, %v4045_v13  ;;  %v669_v21 = vadd.f32 1e-05, %v653_v29  ;;  %v505_v30 = vsel %vm4519_vm10, %v4053_v38, 0.0  ;;  %v514_v4 = vsel %vm4520_vm9, %v4063_v0, 0.0  ;;  %vm4524_vm10 = vmmov %vm4514_vm2 }
 0x8a3   :  { %v683_v43 = vmul.f32 %v2463_v27, %v666_v3  ;;  %vm689_vm11 = vweird.f32 %v2463_v27 }
 0x8a4   :  { %v2175_v31 = vsel %vm4517_vm5, %v2174_v59, 0.0  ;;  %2464 = vrsqrt.f32 %v669_v21  ;;  %vm690_vm1 = vmor %vm688_vm7, %vm689_vm11  ;;  %vm718_vm8 = vweird.f32 %v669_v21 }
 0x8a5   :  { %v684_v9 = vmul.f32 %v2463_v27, %v683_v43  ;;  %2176 = vadd.xlane.f32.xlu1 %v2175_v31  ;;  %vm4523_vm11 = vmmov %vm4514_vm2 }
 0x8a7   :  { %v685_v50 = vmul.f32 0.5, %v684_v9  ;;  %v622_v23 = vpop.xlane.xlu0 %621  ;;  %v4089_v9 = vadd.f32 %v3928_v1, %v3965_v19 }
 0x8a8   :  { %v656_v60 = vmul.f32 %v622_v23, %v3988_v46 }
 0x8a9   :  { %v686_v44 = vsub.f32 1.5, %v685_v50 }
 0x8aa   :  { %v2465_v6 = vpop.eup %2464  ;;  %v672_v24 = vadd.f32 1e-05, %v656_v60 }
 0x8ab   :  { %v687_v53 = vmul.f32 %v2463_v27, %v686_v44  ;;  %v713_v62 = vmul.f32 %v2465_v6, %v669_v21  ;;  %vm719_vm15 = vweird.f32 %v2465_v6  ;;  %v523_v21 = vsel %vm4521_vm3, %v4078_v8, 0.0 }
 0x8ac   :  { %2466 = vrsqrt.f32 %v672_v24  ;;  %vm720_vm6 = vmor %vm718_vm8, %vm719_vm15  ;;  %vm748_vm12 = vweird.f32 %v672_v24 }
 0x8ad   :  { %v691_v26 = vsel %vm690_vm1, %v2463_v27, %v687_v53  ;;  %v714_v55 = vmul.f32 %v2465_v6, %v713_v62  ;;  %506 = vadd.xlane.f32.xlu1 %v505_v30  ;;  %v532_v30 = vsel %vm4523_vm11, %v4089_v9, 0.0  ;;  %vm4525_vm8 = vmmov %vm4514_vm2 }
 0x8ae   :  { %v842_v32 = vmul.f32 %v691_v26, %v3991_v39  ;;  %v4101_v26 = vadd.f32 %v3928_v1, %v3971_v52  ;;  %vm4526_vm15 = vmmov %vm4514_vm2 }
 0x8af   :  { %v715_v11 = vmul.f32 0.5, %v714_v55  ;;  %v631_v35 = vpop.xlane.xlu0 %630  ;;  %vm4530_vm11 = vmmov %vm4521_vm3 }
 0x8b0   :  { %v862_v37 = vmul.f32 %v4057_v33, %v842_v32  ;;  %v659_v18 = vmul.f32 %v631_v35, %v3988_v46  ;;  %v555_v32 = vmul.f32 %v3988_v46, %v4031_v49 }
 0x8b1   :  { %v716_v5 = vsub.f32 1.5, %v715_v11 }
 0x8b2   :  { %v2467_v12 = vpop.eup %2466  ;;  %v882_v54 = vadd.f32 %v4066_v41, %v862_v37  ;;  %v675_v58 = vadd.f32 1e-05, %v659_v18  ;;  %v541_v37 = vsel %vm4525_vm8, %v4101_v26, 0.0 }
 0x8b3   :  { %v717_v7 = vmul.f32 %v2465_v6, %v716_v5  ;;  %v743_v2 = vmul.f32 %v2467_v12, %v672_v24  ;;  %vm749_vm13 = vweird.f32 %v2467_v12 }
 0x8b4   :  { %898 = vst.msk [vmem:[%s2705_s10] sm:$0xff] %vm4514_vm2, %v882_v54  ;;  %2468 = vrsqrt.f32 %v675_v58  ;;  %vm750_vm4 = vmor %vm748_vm12, %vm749_vm13  ;;  %vm778_vm5 = vweird.f32 %v675_v58 }
 0x8b5   :  { %v721_v39 = vsel %vm720_vm6, %v2465_v6, %v717_v7  ;;  %515 = vadd.xlane.f32.xlu1 %v514_v4  ;;  %v744_v3 = vmul.f32 %v2467_v12, %v743_v2  ;;  %vm4527_vm12 = vmmov %vm4521_vm3 }
 0x8b6   :  { %v845_v17 = vmul.f32 %v721_v39, %v3998_v63  ;;  %vm4528_vm13 = vmmov %vm4521_vm3 }
 0x8b7   :  { %v745_v57 = vmul.f32 0.5, %v744_v3  ;;  %v640_v23 = vpop.xlane.xlu0 %639 }
 0x8b8   :  { %v865_v10 = vmul.f32 %v4057_v33, %v845_v17  ;;  %v662_v44 = vmul.f32 %v640_v23, %v3988_v46  ;;  %v561_v17 = vmul.f32 %v3988_v46, %v4035_v56 }
 0x8b9   :  { %v746_v29 = vsub.f32 1.5, %v745_v57 }
 0x8ba   :  { %v2469_v27 = vpop.eup %2468  ;;  %v885_v59 = vadd.f32 %v4066_v41, %v865_v10  ;;  %v678_v53 = vadd.f32 1e-05, %v662_v44 }
 0x8bb   :  { %v747_v43 = vmul.f32 %v2467_v12, %v746_v29  ;;  %v773_v31 = vmul.f32 %v2469_v27, %v675_v58  ;;  %vm779_vm7 = vweird.f32 %v2469_v27  ;;  %v4134_v29 = vsub.f32 %v3963_v15, %v561_v17 }
 0x8bc   :  { %901 = vst.msk [vmem:[%s2705_s10 + $0x18] sm:$0xff] %vm4522_vm14, %v885_v59  ;;  %vm780_vm1 = vmor %vm778_vm5, %vm779_vm7  ;;  %2470 = vrsqrt.f32 %v678_v53  ;;  %vm808_vm6 = vweird.f32 %v678_v53  ;;  %v564_v59 = vmul.f32 %v3988_v46, %v4037_v22 }
 0x8bd   :  { %524 = vadd.xlane.f32.xlu1 %v523_v21  ;;  %v751_v28 = vsel %vm750_vm4, %v2467_v12, %v747_v43  ;;  %v774_v63 = vmul.f32 %v2469_v27, %v773_v31  ;;  %v4111_v12 = vsub.f32 %v3943_v20, %v555_v32  ;;  %v593_v56 = vmul.f32 %v4134_v29, %v4134_v29  ;;  %vm4529_vm4 = vmmov %vm4521_vm3 }
 0x8be   :  { %v848_v50 = vmul.f32 %v751_v28, %v4005_v40  ;;  %v4142_v31 = vsub.f32 %v3979_v45, %v564_v59 }
 0x8bf   :  { %v775_v60 = vmul.f32 0.5, %v774_v63  ;;  %v587_v49 = vmul.f32 %v4111_v12, %v4111_v12  ;;  %v649_v39 = vpop.xlane.xlu0 %648  ;;  %v623_v28 = vsel %vm4529_vm4, %v593_v56, 0.0  ;;  %v567_v63 = vmul.f32 %v3988_v46, %v4039_v61 }
 0x8c0   :  { %v868_v6 = vmul.f32 %v4057_v33, %v848_v50  ;;  %v665_v3 = vmul.f32 %v649_v39, %v3988_v46  ;;  %v596_v22 = vmul.f32 %v4142_v31, %v4142_v31 }
 0x8c1   :  { %v776_v24 = vsub.f32 1.5, %v775_v60  ;;  %v605_v58 = vsel %vm4527_vm12, %v587_v49, 0.0  ;;  %v4150_v45 = vsub.f32 %v3984_v36, %v567_v63  ;;  %v1021_v36 = vld [vmem:[#allocation2] sm:$0x1] }
 0x8c2   :  { %v888_v62 = vadd.f32 %v4066_v41, %v868_v6  ;;  %v2471_v35 = vpop.eup %2470  ;;  %v681_v10 = vadd.f32 1e-05, %v665_v3  ;;  %v632_v44 = vsel %vm4530_vm11, %v596_v22, 0.0 }
 0x8c3   :  { %v777_v19 = vmul.f32 %v2469_v27, %v776_v24  ;;  %v803_v5 = vmul.f32 %v2471_v35, %v678_v53  ;;  %vm809_vm9 = vweird.f32 %v2471_v35  ;;  %v599_v24 = vmul.f32 %v4150_v45, %v4150_v45 }
 0x8c4   :  { %904 = vst.msk [vmem:[%s2705_s10 + $0x30] sm:$0xff] %vm4524_vm10, %v888_v62  ;;  %vm810_vm2 = vmor %vm808_vm6, %vm809_vm9  ;;  %2472 = vrsqrt.f32 %v681_v10  ;;  %vm838_vm14 = vweird.f32 %v681_v10 }
 0x8c5   :  { %533 = vadd.xlane.f32.xlu1 %v532_v30  ;;  %v781_v40 = vsel %vm780_vm1, %v2469_v27, %v777_v19  ;;  %v804_v1 = vmul.f32 %v2471_v35, %v803_v5  ;;  %vm4531_vm1 = vmmov %vm4521_vm3  ;;  %v1672_v30 = vstv %s3921_s8 }
 0x8c6   :  { %v851_v55 = vmul.f32 %v781_v40, %v4012_v42  ;;  %v558_v42 = vmul.f32 %v3988_v46, %v4033_v16  ;;  %v641_v62 = vsel %vm4531_vm1, %v599_v24, 0.0  ;;  %vm4532_vm10 = vmmov %vm4531_vm1  ;;  %v1673_v19 = vmul.f32 %v1672_v30, %v3867_v25 }
 0x8c7   :  { %v805_v52 = vmul.f32 0.5, %v804_v1  ;;  %vm4533_vm8 = vmmov %vm4531_vm1  ;;  %v1580_v24 = vstv %s3863_s24 }
 0x8c8   :  { %v871_v11 = vmul.f32 %v4057_v33, %v851_v55  ;;  %v4120_v20 = vsub.f32 %v3953_v34, %v558_v42  ;;  %vm4535_vm6 = vmmov %vm4531_vm1  ;;  %v1581_v30 = vmul.f32 %v1580_v24, %v3847_v47 }
 0x8c9   :  { %v806_v54 = vsub.f32 1.5, %v805_v52  ;;  %vm4536_vm9 = vmmov %vm4531_vm1 }
 0x8ca   :  { %v891_v18 = vadd.f32 %v4066_v41, %v871_v11  ;;  %v590_v57 = vmul.f32 %v4120_v20, %v4120_v20  ;;  %v2473_v27 = vpop.eup %2472 }
 0x8cb   :  { %v807_v4 = vmul.f32 %v2471_v35, %v806_v54  ;;  %v833_v21 = vmul.f32 %v2473_v27, %v681_v10  ;;  %vm839_vm5 = vweird.f32 %v2473_v27 }
 0x8cc   :  { %907 = vst.msk [vmem:[%s2705_s10 + $0x48] sm:$0xff] %vm4526_vm15, %v891_v18  ;;  %vm840_vm7 = vmor %vm838_vm14, %vm839_vm5 }
 0x8cd   :  { %542 = vadd.xlane.f32.xlu1 %v541_v37  ;;  %v811_v7 = vsel %vm810_vm2, %v2471_v35, %v807_v4  ;;  %v834_v43 = vmul.f32 %v2473_v27, %v833_v21  ;;  %vm4534_vm15 = vmmov %vm4531_vm1 }
 0x8ce   :  { %v854_v2 = vmul.f32 %v811_v7, %v4018_v51  ;;  %v614_v51 = vsel %vm4521_vm3, %v590_v57, 0.0  ;;  %vm4537_vm2 = vmmov %vm4531_vm1 }
 0x8cf   :  { %v835_v15 = vmul.f32 0.5, %v834_v43  ;;  %vm4538_vm5 = vmmov %vm4531_vm1 }
 0x8d0   :  { %v874_v16 = vmul.f32 %v4057_v33, %v854_v2 }
 0x8d1   :  { %v836_v50 = vsub.f32 1.5, %v835_v15 }
 0x8d2   :  { %v894_v34 = vadd.f32 %v4066_v41, %v874_v16 }
 0x8d3   :  { %v837_v23 = vmul.f32 %v2473_v27, %v836_v50 }
 0x8d4   :  { %910 = vst.msk [vmem:[%s2705_s10 + $0x60] sm:$0xff] %vm4528_vm13, %v894_v34 }
 0x8d5   :  { %606 = vadd.xlane.f32.xlu1 %v605_v58  ;;  %v841_v60 = vsel %vm840_vm7, %v2473_v27, %v837_v23 }
 0x8d6   :  { %v857_v6 = vmul.f32 %v841_v60, %v4026_v14 }
 0x8d8   :  { %v877_v61 = vmul.f32 %v4057_v33, %v857_v6 }
 0x8da   :  { %v897_v53 = vadd.f32 %v4066_v41, %v877_v61 }
 0x8dc   :  { %913 = vst.msk [vmem:[%s2705_s10 + $0x78] sm:$0xff] %vm4532_vm10, %v897_v53 }
 0x8dd   :  { %615 = vadd.xlane.f32.xlu1 %v614_v51 }
 0x8e5   :  { %624 = vadd.xlane.f32.xlu1 %v623_v28 }
 0x8ed   :  { %633 = vadd.xlane.f32.xlu1 %v632_v44 }
 0x8f5   :  { %642 = vadd.xlane.f32.xlu1 %v641_v62 }
 0x90e   :  { %1024 = vperm.xlu1 %2439, %v1021_v36  }
 0x916   :  { %2218 = vrot.lane.b32.xlu1 %v1673_v19, %s2551_s14 }
 0x918   :  { %v2177_v14 = vpop.xlane.xlu1 %2176 }
 0x919   :  { %v2178_v40 = vrot.slane %v2177_v14, 4 }
 0x91b   :  { %v2179_v55 = vadd.f32 %v2178_v40, %v2177_v14 }
 0x91d   :  { %v2180_v32 = vrot.slane %v2179_v55, 2 }
 0x91f   :  { %v2181_v11 = vadd.f32 %v2180_v32, %v2179_v55 }
 0x920   :  { %v507_v35 = vpop.xlane.xlu1 %506 }
 0x921   :  { %v556_v37 = vmul.f32 %v3988_v46, %v507_v35  ;;  %v2182_v18 = vrot.slane %v2181_v11, 1 }
 0x923   :  { %v4165_v5 = vsub.f32 %v4053_v38, %v556_v37  ;;  %v2183_v1 = vadd.f32 %v2182_v18, %v2181_v11 }
 0x925   :  { %2391 = vpush %v2183_v1  ;;  %v588_v52 = vmul.f32 %v4165_v5, %v4165_v5 }
 0x927   :  { %v608_v25 = vsel %vm4533_vm8, %v588_v52, 0.0 }
 0x928   :  { %609 = vadd.xlane.f32.xlu2 %v608_v25  ;;  %v516_v42 = vpop.xlane.xlu1 %515 }
 0x929   :  { %v559_v49 = vmul.f32 %v3988_v46, %v516_v42 }
 0x92b   :  { %v4172_v54 = vsub.f32 %v4063_v0, %v559_v49 }
 0x92d   :  { %v591_v4 = vmul.f32 %v4172_v54, %v4172_v54 }
 0x92f   :  { %v617_v38 = vsel %vm4534_vm15, %v591_v4, 0.0 }
 0x930   :  { %618 = vadd.xlane.f32.xlu2 %v617_v38  ;;  %v525_v58 = vpop.xlane.xlu1 %524 }
 0x931   :  { %v562_v7 = vmul.f32 %v3988_v46, %v525_v58 }
 0x933   :  { %v4179_v2 = vsub.f32 %v4078_v8, %v562_v7 }
 0x935   :  { %v594_v39 = vmul.f32 %v4179_v2, %v4179_v2 }
 0x937   :  { %v626_v3 = vsel %vm4535_vm6, %v594_v39, 0.0  ;;  %vm4539_vm6 = vmmov %vm4537_vm2 }
 0x938   :  { %627 = vadd.xlane.f32.xlu2 %v626_v3  ;;  %v534_v0 = vpop.xlane.xlu1 %533 }
 0x939   :  { %v565_v16 = vmul.f32 %v3988_v46, %v534_v0 }
 0x93b   :  { %v4186_v17 = vsub.f32 %v4089_v9, %v565_v16 }
 0x93d   :  { %v597_v57 = vmul.f32 %v4186_v17, %v4186_v17 }
 0x93f   :  { %v635_v10 = vsel %vm4536_vm9, %v597_v57, 0.0 }
 0x940   :  { %636 = vadd.xlane.f32.xlu2 %v635_v10  ;;  %v543_v8 = vpop.xlane.xlu1 %542 }
 0x941   :  { %v568_v34 = vmul.f32 %v3988_v46, %v543_v8 }
 0x943   :  { %v4193_v51 = vsub.f32 %v4101_v26, %v568_v34 }
 0x945   :  { %v600_v27 = vmul.f32 %v4193_v51, %v4193_v51 }
 0x947   :  { %v644_v59 = vsel %vm4537_vm2, %v600_v27, 0.0 }
 0x948   :  { %645 = vadd.xlane.f32.xlu2 %v644_v59  ;;  %v607_v9 = vpop.xlane.xlu1 %606 }
 0x949   :  { %v651_v56 = vmul.f32 %v607_v9, %v3988_v46 }
 0x94b   :  { %v667_v21 = vadd.f32 1e-05, %v651_v56 }
 0x94d   :  { %2474 = vrsqrt.f32 %v667_v21  ;;  %vm698_vm13 = vweird.f32 %v667_v21 }
 0x950   :  { %v616_v43 = vpop.xlane.xlu1 %615 }
 0x951   :  { %v654_v28 = vmul.f32 %v616_v43, %v3988_v46 }
 0x953   :  { %v2475_v15 = vpop.eup %2474  ;;  %v670_v63 = vadd.f32 1e-05, %v654_v28 }
 0x954   :  { %v693_v26 = vmul.f32 %v2475_v15, %v667_v21  ;;  %vm699_vm12 = vweird.f32 %v2475_v15 }
 0x955   :  { %2476 = vrsqrt.f32 %v670_v63  ;;  %vm700_vm3 = vmor %vm698_vm13, %vm699_vm12  ;;  %vm728_vm14 = vweird.f32 %v670_v63 }
 0x956   :  { %v694_v50 = vmul.f32 %v2475_v15, %v693_v26  ;;  %s2392_s16 = spop %2391  ;;  %vm4540_vm13 = vmmov %vm4538_vm5 }
 0x957   :  { %s2193_s30 = smul.f32 %s2392_s16, %s3860_s5 }
 0x958   :  { %v695_v22 = vmul.f32 0.5, %v694_v50  ;;  %v625_v23 = vpop.xlane.xlu1 %624 }
 0x959   :  { %s2194_s18 = sadd.f32 1e-06, %s2193_s30  ;;  %v657_v60 = vmul.f32 %v625_v23, %v3988_v46 }
 0x95a   :  { %v696_v44 = vsub.f32 1.5, %v695_v22 }
 0x95b   :  { %v2477_v6 = vpop.eup %2476  ;;  %v2195_v61 = vstv %s2194_s18  ;;  %v673_v53 = vadd.f32 1e-05, %v657_v60 }
 0x95c   :  { %v697_v62 = vmul.f32 %v2475_v15, %v696_v44  ;;  %v723_v36 = vmul.f32 %v2477_v6, %v670_v63  ;;  %2478 = vrsqrt.f32 %v2195_v61  ;;  %vm729_vm4 = vweird.f32 %v2477_v6 }
 0x95d   :  { %2480 = vrsqrt.f32 %v673_v53  ;;  %vm730_vm7 = vmor %vm728_vm14, %vm729_vm4  ;;  %vm2202_vm10 = vweird.f32 %v2195_v61  ;;  %vm758_vm8 = vweird.f32 %v673_v53 }
 0x95e   :  { %v701_v19 = vsel %vm700_vm3, %v2475_v15, %v697_v62  ;;  %v724_v14 = vmul.f32 %v2477_v6, %v723_v36 }
 0x95f   :  { %v843_v40 = vmul.f32 %v701_v19, %v4111_v12 }
 0x960   :  { %v725_v55 = vmul.f32 0.5, %v724_v14  ;;  %2210 = vrot.lane.b32.xlu2 %v1581_v30, %s2552_s23  ;;  %v634_v32 = vpop.xlane.xlu1 %633 }
 0x961   :  { %v863_v11 = vmul.f32 %v4057_v33, %v843_v40  ;;  %v660_v35 = vmul.f32 %v634_v32, %v3988_v46 }
 0x962   :  { %v2479_v37 = vpop.eup %2478  ;;  %v726_v18 = vsub.f32 1.5, %v725_v55 }
 0x963   :  { %v2481_v1 = vpop.eup %2480  ;;  %v883_v52 = vadd.f32 %v4066_v41, %v863_v11  ;;  %v2197_v47 = vmul.f32 %v2479_v37, %v2195_v61  ;;  %v676_v25 = vadd.f32 1e-05, %v660_v35  ;;  %vm2203_vm11 = vweird.f32 %v2479_v37 }
 0x964   :  { %v727_v42 = vmul.f32 %v2477_v6, %v726_v18  ;;  %v753_v12 = vmul.f32 %v2481_v1, %v673_v53  ;;  %vm759_vm1 = vweird.f32 %v2481_v1  ;;  %vm2204_vm15 = vmor %vm2202_vm10, %vm2203_vm11 }
 0x965   :  { %899 = vst.msk [vmem:[%s2705_s10 + $0x8] sm:$0xff] %vm4538_vm5, %v883_v52  ;;  %v2198_v49 = vmul.f32 %v2479_v37, %v2197_v47  ;;  %2482 = vrsqrt.f32 %v676_v25  ;;  %vm760_vm9 = vmor %vm758_vm8, %vm759_vm1  ;;  %vm788_vm12 = vweird.f32 %v676_v25 }
 0x966   :  { %v731_v4 = vsel %vm730_vm7, %v2477_v6, %v727_v42  ;;  %v754_v38 = vmul.f32 %v2481_v1, %v753_v12  ;;  %vm4541_vm11 = vmmov %vm4538_vm5 }
 0x967   :  { %v846_v58 = vmul.f32 %v731_v4, %v4120_v20  ;;  %v2199_v7 = vmul.f32 0.5, %v2198_v49 }
 0x968   :  { %v755_v39 = vmul.f32 0.5, %v754_v38  ;;  %v643_v3 = vpop.xlane.xlu1 %642 }
 0x969   :  { %v866_v0 = vmul.f32 %v4057_v33, %v846_v58  ;;  %v2200_v16 = vsub.f32 1.5, %v2199_v7  ;;  %v663_v57 = vmul.f32 %v643_v3, %v3988_v46 }
 0x96a   :  { %v756_v10 = vsub.f32 1.5, %v755_v39 }
 0x96b   :  { %v2483_v8 = vpop.eup %2482  ;;  %v886_v34 = vadd.f32 %v4066_v41, %v866_v0  ;;  %v679_v27 = vadd.f32 1e-05, %v663_v57  ;;  %v2201_v59 = vmul.f32 %v2479_v37, %v2200_v16 }
 0x96c   :  { %v757_v9 = vmul.f32 %v2481_v1, %v756_v10  ;;  %v783_v20 = vmul.f32 %v2483_v8, %v676_v25  ;;  %vm789_vm2 = vweird.f32 %v2483_v8 }
 0x96d   :  { %902 = vst.msk [vmem:[%s2705_s10 + $0x20] sm:$0xff] %vm4539_vm6, %v886_v34  ;;  %2484 = vrsqrt.f32 %v679_v27  ;;  %v2205_v56 = vsel %vm2204_vm15, %v2479_v37, %v2201_v59  ;;  %vm790_vm3 = vmor %vm788_vm12, %vm789_vm2  ;;  %vm818_vm4 = vweird.f32 %v679_v27 }
 0x96e   :  { %v761_v21 = vsel %vm760_vm9, %v2481_v1, %v757_v9  ;;  %v784_v43 = vmul.f32 %v2483_v8, %v783_v20  ;;  %2393 = vpush %v2205_v56  ;;  %vm4542_vm9 = vmmov %vm4538_vm5 }
 0x96f   :  { %v849_v28 = vmul.f32 %v761_v21, %v4134_v29 }
 0x970   :  { %v785_v15 = vmul.f32 0.5, %v784_v43 }
 0x971   :  { %v869_v63 = vmul.f32 %v4057_v33, %v849_v28 }
 0x972   :  { %v786_v26 = vsub.f32 1.5, %v785_v15 }
 0x973   :  { %v2485_v50 = vpop.eup %2484  ;;  %v889_v22 = vadd.f32 %v4066_v41, %v869_v63 }
 0x974   :  { %v787_v23 = vmul.f32 %v2483_v8, %v786_v26  ;;  %v813_v60 = vmul.f32 %v2485_v50, %v679_v27  ;;  %vm819_vm14 = vweird.f32 %v2485_v50 }
 0x975   :  { %905 = vst.msk [vmem:[%s2705_s10 + $0x38] sm:$0xff] %vm4540_vm13, %v889_v22  ;;  %vm820_vm7 = vmor %vm818_vm4, %vm819_vm14 }
 0x976   :  { %v791_v44 = vsel %vm790_vm3, %v2483_v8, %v787_v23  ;;  %v814_v6 = vmul.f32 %v2485_v50, %v813_v60  ;;  %vm4543_vm3 = vmmov %vm4538_vm5 }
 0x977   :  { %v852_v29 = vmul.f32 %v791_v44, %v4142_v31 }
 0x978   :  { %v815_v24 = vmul.f32 0.5, %v814_v6 }
 0x979   :  { %v872_v61 = vmul.f32 %v4057_v33, %v852_v29 }
 0x97a   :  { %v816_v53 = vsub.f32 1.5, %v815_v24 }
 0x97b   :  { %v892_v62 = vadd.f32 %v4066_v41, %v872_v61 }
 0x97c   :  { %v817_v36 = vmul.f32 %v2485_v50, %v816_v53 }
 0x97d   :  { %908 = vst.msk [vmem:[%s2705_s10 + $0x50] sm:$0xff] %vm4538_vm5, %v892_v62 }
 0x97e   :  { %v821_v30 = vsel %vm820_vm7, %v2485_v50, %v817_v36  ;;  %vm4544_vm7 = vmmov %vm4543_vm3 }
 0x97f   :  { %v855_v19 = vmul.f32 %v821_v30, %v4150_v45 }
 0x981   :  { %v875_v14 = vmul.f32 %v4057_v33, %v855_v19 }
 0x983   :  { %v895_v40 = vadd.f32 %v4066_v41, %v875_v14 }
 0x985   :  { %911 = vst.msk [vmem:[%s2705_s10 + $0x68] sm:$0xff] %vm4541_vm11, %v895_v40 }
 0x99b   :  { %v610_v31 = vpop.xlane.xlu2 %609 }
 0x99c   :  { %v652_v55 = vmul.f32 %v610_v31, %v3988_v46 }
 0x99e   :  { %v668_v32 = vadd.f32 1e-05, %v652_v55 }
 0x99f   :  { %s2394_s25 = spop %2393 }
 0x9a0   :  { %2486 = vrsqrt.f32 %v668_v32  ;;  %v2207_v11 = vstv %s2394_s25  ;;  %vm708_vm10 = vweird.f32 %v668_v32 }
 0x9a1   :  { %v2208_v35 = vmul.f32 %v2207_v11, %v4045_v13 }
 0x9a3   :  { %2222 = vrot.lane.b32.xlu0 %v2208_v35, %s2553_s0  ;;  %v619_v37 = vpop.xlane.xlu2 %618 }
 0x9a4   :  { %v655_v45 = vmul.f32 %v619_v37, %v3988_v46 }
 0x9a6   :  { %v2487_v18 = vpop.eup %2486  ;;  %v671_v1 = vadd.f32 1e-05, %v655_v45 }
 0x9a7   :  { %v703_v52 = vmul.f32 %v2487_v18, %v668_v32  ;;  %vm709_vm1 = vweird.f32 %v2487_v18 }
 0x9a8   :  { %2488 = vrsqrt.f32 %v671_v1  ;;  %vm710_vm8 = vmor %vm708_vm10, %vm709_vm1  ;;  %vm738_vm6 = vweird.f32 %v671_v1 }
 0x9a9   :  { %v704_v47 = vmul.f32 %v2487_v18, %v703_v52 }
 0x9ab   :  { %v705_v25 = vmul.f32 0.5, %v704_v47  ;;  %v628_v42 = vpop.xlane.xlu2 %627  ;;  %v2215_v47 = vpop.permute.xlu0 %2214 }
 0x9ac   :  { %v658_v12 = vmul.f32 %v628_v42, %v3988_v46 }
 0x9ad   :  { %v706_v49 = vsub.f32 1.5, %v705_v25 }
 0x9ae   :  { %v2489_v4 = vpop.eup %2488  ;;  %v674_v38 = vadd.f32 1e-05, %v658_v12 }
 0x9af   :  { %v707_v58 = vmul.f32 %v2487_v18, %v706_v49  ;;  %v733_v13 = vmul.f32 %v2489_v4, %v671_v1  ;;  %vm739_vm15 = vweird.f32 %v2489_v4 }
 0x9b0   :  { %2490 = vrsqrt.f32 %v674_v38  ;;  %vm740_vm2 = vmor %vm738_vm6, %vm739_vm15  ;;  %vm768_vm13 = vweird.f32 %v674_v38 }
 0x9b1   :  { %v711_v7 = vsel %vm710_vm8, %v2487_v18, %v707_v58  ;;  %v734_v39 = vmul.f32 %v2489_v4, %v733_v13  ;;  %vm4545_vm8 = vmmov %vm4543_vm3  ;;  %v1025_v18 = vpop.permute.xlu1 %1024 }
 0x9b2   :  { %v844_v3 = vmul.f32 %v711_v7, %v4165_v5  ;;  %vm4546_vm6 = vmmov %vm4543_vm3  ;;  %v1027_v1 = vperm.slane %v1025_v18, 0 }
 0x9b3   :  { %v735_v0 = vmul.f32 0.5, %v734_v39  ;;  %v637_v16 = vpop.xlane.xlu2 %636 }
 0x9b4   :  { %v864_v57 = vmul.f32 %v4057_v33, %v844_v3  ;;  %v661_v10 = vmul.f32 %v637_v16, %v3988_v46  ;;  %v1061_v25 = vadd.f32 %v3346_v48, %v1027_v1 }
 0x9b5   :  { %v736_v8 = vsub.f32 1.5, %v735_v0 }
 0x9b6   :  { %v2491_v34 = vpop.eup %2490  ;;  %v884_v27 = vadd.f32 %v4066_v41, %v864_v57  ;;  %v677_v59 = vadd.f32 1e-05, %v661_v10 }
 0x9b7   :  { %v737_v9 = vmul.f32 %v2489_v4, %v736_v8  ;;  %v763_v20 = vmul.f32 %v2491_v34, %v674_v38  ;;  %vm769_vm12 = vweird.f32 %v2491_v34 }
 0x9b8   :  { %900 = vst.msk [vmem:[%s2705_s10 + $0x10] sm:$0xff] %vm4542_vm9, %v884_v27  ;;  %2492 = vrsqrt.f32 %v677_v59  ;;  %vm770_vm4 = vmor %vm768_vm13, %vm769_vm12  ;;  %vm798_vm5 = vweird.f32 %v677_v59  ;;  %vm2230_vm12 = vcmask 778240   ;;  %vm4548_vm13 = vcmask 523264  }
 0x9b9   :  { %v741_v5 = vsel %vm740_vm2, %v2489_v4, %v737_v9  ;;  %v764_v56 = vmul.f32 %v2491_v34, %v763_v20  ;;  %vm4547_vm9 = vmmov %vm4543_vm3  ;;  %vm2228_vm2 = vcmask 654336   ;;  %v2219_v49 = vpop.permute.xlu1 %2218 }
 0x9ba   :  { %v847_v21 = vmul.f32 %v741_v5, %v4172_v54 }
 0x9bb   :  { %v765_v43 = vmul.f32 0.5, %v764_v56  ;;  %v646_v28 = vpop.xlane.xlu2 %645 }
 0x9bc   :  { %v867_v15 = vmul.f32 %v4057_v33, %v847_v21  ;;  %v664_v63 = vmul.f32 %v646_v28, %v3988_v46 }
 0x9bd   :  { %v766_v26 = vsub.f32 1.5, %v765_v43 }
 0x9be   :  { %v2493_v50 = vpop.eup %2492  ;;  %v887_v22 = vadd.f32 %v4066_v41, %v867_v15  ;;  %v680_v23 = vadd.f32 1e-05, %v664_v63 }
 0x9bf   :  { %v767_v60 = vmul.f32 %v2491_v34, %v766_v26  ;;  %v793_v44 = vmul.f32 %v2493_v50, %v677_v59  ;;  %vm799_vm14 = vweird.f32 %v2493_v50 }
 0x9c0   :  { %903 = vst.msk [vmem:[%s2705_s10 + $0x28] sm:$0xff] %vm4543_vm3, %v887_v22  ;;  %2494 = vrsqrt.f32 %v680_v23  ;;  %vm800_vm11 = vmor %vm798_vm5, %vm799_vm14  ;;  %vm828_vm10 = vweird.f32 %v680_v23 }
 0x9c1   :  { %v771_v54 = vsel %vm770_vm4, %v2491_v34, %v767_v60  ;;  %v794_v6 = vmul.f32 %v2493_v50, %v793_v44 }
 0x9c2   :  { %v850_v29 = vmul.f32 %v771_v54, %v4179_v2 }
 0x9c3   :  { %v795_v24 = vmul.f32 0.5, %v794_v6  ;;  %v2211_v52 = vpop.permute.xlu2 %2210 }
 0x9c4   :  { %v870_v46 = vmul.f32 %v4057_v33, %v850_v29  ;;  %v2225_v42 = vsel %vm4547_vm9, %v1061_v25, %v2211_v52 }
 0x9c5   :  { %v796_v61 = vsub.f32 1.5, %v795_v24  ;;  %v2226_v12 = vsel %vm385_vm0, %v2225_v42, %v2215_v47 }
 0x9c6   :  { %v2495_v53 = vpop.eup %2494  ;;  %v890_v62 = vadd.f32 %v4066_v41, %v870_v46 }
 0x9c7   :  { %v797_v36 = vmul.f32 %v2493_v50, %v796_v61  ;;  %v823_v30 = vmul.f32 %v2495_v53, %v680_v23  ;;  %vm829_vm1 = vweird.f32 %v2495_v53 }
 0x9c8   :  { %906 = vst.msk [vmem:[%s2705_s10 + $0x40] sm:$0xff] %vm4544_vm7, %v890_v62  ;;  %vm830_vm15 = vmor %vm828_vm10, %vm829_vm1 }
 0x9c9   :  { %v801_v19 = vsel %vm800_vm11, %v2493_v50, %v797_v36  ;;  %v824_v14 = vmul.f32 %v2495_v53, %v823_v30 }
 0x9ca   :  { %v853_v2 = vmul.f32 %v801_v19, %v4186_v17 }
 0x9cb   :  { %v825_v40 = vmul.f32 0.5, %v824_v14 }
 0x9cc   :  { %v873_v31 = vmul.f32 %v4057_v33, %v853_v2 }
 0x9cd   :  { %v826_v55 = vsub.f32 1.5, %v825_v40 }
 0x9ce   :  { %v893_v32 = vadd.f32 %v4066_v41, %v873_v31 }
 0x9cf   :  { %v827_v11 = vmul.f32 %v2495_v53, %v826_v55 }
 0x9d0   :  { %909 = vst.msk [vmem:[%s2705_s10 + $0x58] sm:$0xff] %vm4545_vm8, %v893_v32 }
 0x9d1   :  { %v831_v35 = vsel %vm830_vm15, %v2495_v53, %v827_v11 }
 0x9d2   :  { %v856_v37 = vmul.f32 %v831_v35, %v4193_v51 }
 0x9d4   :  { %v876_v45 = vmul.f32 %v4057_v33, %v856_v37  ;;  %v2227_v33 = vsel %vm4548_vm13, %v2226_v12, %v2219_v49 }
 0x9d6   :  { %v896_v17 = vadd.f32 %v4066_v41, %v876_v45 }
 0x9d8   :  { %912 = vst.msk [vmem:[%s2705_s10 + $0x70] sm:$0xff] %vm4546_vm6, %v896_v17 }
 0xa15   :  { %v2223_v51 = vpop.permute.xlu0 %2222 }
 0xa16   :  { %v2229_v4 = vsel %vm2228_vm2, %v2227_v33, %v2223_v51 }
 0xa17   :  { %2231 = vst.msk [vmem:[%s2710_s15] sm:$0x1] %vm2230_vm12, %v2229_v4 }
 0xa18   :  { %2248 = vsyncpa [#allocation4], 1 }

</bundles_post_ra>
